<compile_context>
chip_gen: v5e
topology: v5e:2x2
jax: 0.10.0
libtpu: 0.0.40
codegen_flags: <defaults>
</compile_context>

<pallas_src>
import functools

import jax
import jax.numpy as jnp
from jax import lax
from jax.experimental import pallas as pl
from jax.experimental.pallas import tpu as pltpu


def _round_up(v, m):
    return (v + m - 1) // m * m


# -----------------------------------------------------------------------------
# Kernel: whole Decoder forward in one invocation.
# Refs: 10 inputs, 3 outputs, 2 VMEM scratch buffers.
# -----------------------------------------------------------------------------
def _decoder_kernel(z_ref, wih_ref, whh_ref, bg_ref,
                    fcw_ref, fcb_ref, hdw_ref, hdb_ref,
                    h0_ref, c0_ref,
                    heads_ref, hT_ref, cT_ref,
                    gates_sc, hhist_sc):
    t, n_p, h_p = hhist_sc.shape

    # ---- Phase 1: hoisted input projection for ALL timesteps (one MXU matmul).
    #      Gate layout is [i | f | o | g] (reordered in weight prep) so the
    #      recurrence does ONE sigmoid over a contiguous 3*h_p slice + one tanh.
    gates_sc[...] = (
        jnp.dot(z_ref[...], wih_ref[...], preferred_element_type=jnp.float32)
        + bg_ref[...])

    # ---- Phase 2: serial LSTM recurrence; (h, c) carried in registers (f32).
    #      W_hh is read from VMEM inside the dot (not hoisted into a live
    #      value) to keep vreg pressure low across the unrolled loop.
    def step(s, carry):
        h, c = carry
        row = pl.multiple_of(s * n_p, n_p)       # sublane-aligned offset
        g = gates_sc[pl.ds(row, n_p), :] + jnp.dot(
            h.astype(jnp.bfloat16), whh_ref[...],
            preferred_element_type=jnp.float32)
        sig = jax.nn.sigmoid(g[:, :3 * h_p])     # [i|f|o] in one EUP group
        i_g = sig[:, 0 * h_p:1 * h_p]
        f_g = sig[:, 1 * h_p:2 * h_p]
        o_g = sig[:, 2 * h_p:3 * h_p]
        g_g = jnp.tanh(g[:, 3 * h_p:4 * h_p])
        c_new = f_g * c + i_g * g_g
        h_new = o_g * jnp.tanh(c_new)
        hhist_sc[s] = h_new.astype(jnp.bfloat16)  # bf16 h_t history (one tile)
        return (h_new, c_new)

    h_fin, c_fin = lax.fori_loop(0, t, step, (h0_ref[...], c0_ref[...]),
                                 unroll=min(t, 8))
    hT_ref[...] = h_fin                      # written once (not per step)
    cT_ref[...] = c_fin

    # ---- Phase 3: batched fc/relu + fused, lane-dense mu|logvar head.
    #      (t, n_p, h_p) bf16 -> (t*n_p, h_p) is layout-preserving: n_p % 16 == 0.
    h_all = hhist_sc[...].reshape(t * n_p, h_p)
    fc = jnp.maximum(
        jnp.dot(h_all, fcw_ref[...], preferred_element_type=jnp.float32)
        + fcb_ref[...], 0.0)
    heads_ref[...] = (
        jnp.dot(fc.astype(jnp.bfloat16), hdw_ref[...],
                preferred_element_type=jnp.float32)
        + hdb_ref[...])


# -----------------------------------------------------------------------------
# Wrapper
# -----------------------------------------------------------------------------
def decoder_forward(params, x_previous, z, c, hidden=None):
    """Inputs follow the PyTorch convention:
         x_previous: (n, t, x_dim), z: (n, t, x_dim), c: (n, c_dim),
         hidden: optional ((1, n, h_dim), (1, n, h_dim)).
       Returns (mu, logvar, (h_n, c_n)) with PyTorch shapes."""
    n, t, x_dim = x_previous.shape
    h_dim, h_p, hd_p = params["h_dim"], params["h_p"], params["hd_p"]
    c_dim = c.shape[-1]
    d_in = 2 * x_dim + c_dim
    n_p = _round_up(n, 16)                      # full bf16 sublane tile of batch

    # Glue (plain XLA): broadcast c, concat, time-major, pad batch, flatten.
    c_exp = jnp.broadcast_to(c.reshape(n, 1, c_dim), (n, t, c_dim))
    zc = jnp.concatenate([x_previous, z, c_exp], axis=2).astype(jnp.float32)
    z_tm = jnp.transpose(zc, (1, 0, 2))                     # (t, n, d_in)
    z_tm = jnp.pad(z_tm, ((0, 0), (0, n_p - n), (0, 0)))    # (t, n_p, d_in)
    z2d = z_tm.reshape(t * n_p, d_in).astype(jnp.bfloat16)  # bf16 MXU input

    # Padded rows/lanes of h0/c0 MUST be zero: zero state + zero-padded weight
    # columns keep the padding mathematically inert through the recurrence.
    if hidden is None:
        h0 = jnp.zeros((n_p, h_p), jnp.float32)
        c0 = jnp.zeros((n_p, h_p), jnp.float32)
    else:
        h0 = jnp.zeros((n_p, h_p), jnp.float32).at[:n, :h_dim].set(
            hidden[0].reshape(n, h_dim).astype(jnp.float32))
        c0 = jnp.zeros((n_p, h_p), jnp.float32).at[:n, :h_dim].set(
            hidden[1].reshape(n, h_dim).astype(jnp.float32))

    full = lambda shape: pl.BlockSpec(shape, lambda i: (0,) * len(shape))

    grid_spec = pltpu.PrefetchScalarGridSpec(
        num_scalar_prefetch=0,
        grid=(1,),                                          # single invocation
        in_specs=[
            full((t * n_p, d_in)),          # z (all timesteps, flattened)
            full((d_in, 4 * h_p)),          # W_ih^T (gate-reordered/padded, bf16)
            full((h_p, 4 * h_p)),           # W_hh^T (gate-reordered/padded, bf16)
            full((1, 4 * h_p)),             # b_ih + b_hh (gate-reordered/padded)
            full((h_p, h_p)),               # fc_w^T (bf16)
            full((1, h_p)),                 # fc_b
            full((h_p, hd_p)),              # [mu_w^T | logvar_w^T], lane-padded
            full((1, hd_p)),                # [mu_b | logvar_b], lane-padded
            full((n_p, h_p)),               # h0
            full((n_p, h_p)),               # c0
        ],
        out_specs=[
            full((t * n_p, hd_p)),          # fused mu|logvar (lane-dense)
            full((n_p, h_p)),               # h_n
            full((n_p, h_p)),               # c_n
        ],
        scratch_shapes=[
            pltpu.VMEM((t * n_p, 4 * h_p), jnp.float32),    # hoisted gate preacts
            pltpu.VMEM((t, n_p, h_p), jnp.bfloat16),        # h_t history (bf16)
        ],
    )

    out_shapes = (
        jax.ShapeDtypeStruct((t * n_p, hd_p), jnp.float32),
        jax.ShapeDtypeStruct((n_p, h_p), jnp.float32),
        jax.ShapeDtypeStruct((n_p, h_p), jnp.float32),
    )

    # Advisory cost hint + explicit VMEM budget (static python ints).
    flops = 2 * t * n_p * (d_in * 4 * h_p + h_p * 4 * h_p
                           + h_p * h_p + h_p * hd_p)
    transcendentals = 5 * t * n_p * h_p
    io_bytes = (z2d.size * 2
                + 2 * (params["w_ih_p"].size + params["w_hh_p"].size
                       + params["fc_w_p"].size + params["head_w_p"].size)
                + 4 * (params["b_gates_p"].size + params["fc_b_p"].size
                       + params["head_b_p"].size)
                + 4 * (t * n_p * hd_p + 4 * n_p * h_p))
    scratch_bytes = t * n_p * 4 * h_p * 4 + t * n_p * h_p * 2
    vmem_limit = int(min(48 * 2**20,
                         max(2 * (io_bytes + scratch_bytes), 8 * 2**20)))

    heads2d, h_n, c_n = pl.pallas_call(
        _decoder_kernel,
        out_shape=out_shapes,
        grid_spec=grid_spec,
        input_output_aliases={8: 1, 9: 2},                  # h0 -> h_n, c0 -> c_n
        compiler_params=pltpu.CompilerParams(
            dimension_semantics=("arbitrary",),
            vmem_limit_bytes=vmem_limit),
        cost_estimate=pl.CostEstimate(
            flops=flops,
            transcendentals=transcendentals,
            bytes_accessed=io_bytes),
    )(z2d,
      params["w_ih_p"], params["w_hh_p"], params["b_gates_p"],
      params["fc_w_p"], params["fc_b_p"],
      params["head_w_p"], params["head_b_p"],
      h0, c0)

    heads = heads2d.reshape(t, n_p, hd_p)[:, :n, :2 * x_dim]  # strip padding
    heads = jnp.transpose(heads, (1, 0, 2))                   # (n, t, 2*x_dim)
    mu = heads[..., :x_dim]
    logvar = heads[..., x_dim:]
    hidden_out = (h_n[None, :n, :h_dim], c_n[None, :n, :h_dim])
    return mu, logvar, hidden_out


# -----------------------------------------------------------------------------
# Parameters: raw PyTorch-layout weights + padded/bf16 kernel weights.
# -----------------------------------------------------------------------------
def make_params(key, x_dim, h_dim, c_dim):
    """Deterministic synthetic parameters matching the nn.Module layouts."""
    d_in = 2 * x_dim + c_dim
    ks = jax.random.split(key, 10)
    u = lambda k, shape, s: (jax.random.uniform(k, shape, jnp.float32) - 0.5) * 2.0 * s
    sc = 0.1
    return {
        "w_ih": u(ks[0], (4 * h_dim, d_in), sc),    # lstm.weight_ih_l0
        "w_hh": u(ks[1], (4 * h_dim, h_dim), sc),   # lstm.weight_hh_l0
        "b_ih": u(ks[2], (4 * h_dim,), sc),
        "b_hh": u(ks[3], (4 * h_dim,), sc),
        "fc_w": u(ks[4], (h_dim, h_dim), sc),
        "fc_b": u(ks[5], (h_dim,), sc),
        "mu_w": u(ks[6], (x_dim, h_dim), sc),
        "mu_b": u(ks[7], (x_dim,), sc),
        "lv_w": u(ks[8], (x_dim, h_dim), sc),
        "lv_b": u(ks[9], (x_dim,), sc),
    }


def prepare_decoder_params(raw, x_dim, h_dim, c_dim):
    """Transpose to (in, out); reorder gates from PyTorch [i|f|g|o] to [i|f|o|g];
    zero-pad each gate block to h_p (multiple of 128) and the fused mu|logvar
    head to a 128-lane-dense width; cast matmul weights to bf16."""
    h_p = _round_up(h_dim, 128)
    hd_p = _round_up(2 * x_dim, 128)          # lane-dense fused head width
    bf = jnp.bfloat16
    gate_order = (0, 1, 3, 2)                 # [i|f|g|o] -> [i|f|o|g]

    def gate_pad_cols(w):                     # (..., 4*h_dim) -> (..., 4*h_p)
        blocks = []
        for k in gate_order:
            blk = w[..., k * h_dim:(k + 1) * h_dim]
            blocks.append(jnp.pad(blk, [(0, 0)] * (w.ndim - 1)
                                  + [(0, h_p - h_dim)]))
        return jnp.concatenate(blocks, axis=-1)

    w_ih_p = gate_pad_cols(raw["w_ih"].T)                          # (d_in, 4*h_p)
    w_hh_p = jnp.pad(gate_pad_cols(raw["w_hh"].T),
                     ((0, h_p - h_dim), (0, 0)))                   # (h_p, 4*h_p)
    b_gates = gate_pad_cols((raw["b_ih"] + raw["b_hh"]).reshape(1, 4 * h_dim))
    fc_w_p = jnp.pad(raw["fc_w"].T, ((0, h_p - h_dim), (0, h_p - h_dim)))
    fc_b_p = jnp.pad(raw["fc_b"].reshape(1, h_dim), ((0, 0), (0, h_p - h_dim)))
    head_w = jnp.concatenate([raw["mu_w"].T, raw["lv_w"].T], axis=1)  # (h, 2x)
    head_w_p = jnp.pad(head_w, ((0, h_p - h_dim), (0, hd_p - 2 * x_dim)))
    head_b = jnp.concatenate([raw["mu_b"], raw["lv_b"]]).reshape(1, 2 * x_dim)
    head_b_p = jnp.pad(head_b, ((0, 0), (0, hd_p - 2 * x_dim)))

    return {
        "h_dim": h_dim, "h_p": h_p, "hd_p": hd_p,
        "w_ih_p": w_ih_p.astype(bf), "w_hh_p": w_hh_p.astype(bf),
        "b_gates_p": b_gates.astype(jnp.float32),
        "fc_w_p": fc_w_p.astype(bf), "fc_b_p": fc_b_p.astype(jnp.float32),
        "head_w_p": head_w_p.astype(bf),
        "head_b_p": head_b_p.astype(jnp.float32),
    }


# -----------------------------------------------------------------------------
# Pure-JAX reference with identical semantics (same bf16-in / f32-accumulate
# matmul precision as the kernel, f32 state) for a correctness check.
# -----------------------------------------------------------------------------
def decoder_reference(raw, x_previous, z, c, hidden=None):
    n, t, x_dim = x_previous.shape
    h_dim = raw["fc_w"].shape[0]
    bf = jnp.bfloat16

    c_exp = jnp.broadcast_to(c.reshape(n, 1, -1), (n, t, c.shape[-1]))
    zc = jnp.concatenate([x_previous, z, c_exp], axis=2).astype(jnp.float32)
    d_in = zc.shape[-1]

    w_ih_t = raw["w_ih"].T.astype(bf)
    w_hh_t = raw["w_hh"].T.astype(bf)
    b_g = (raw["b_ih"] + raw["b_hh"]).astype(jnp.float32)

    z_tm = jnp.transpose(zc, (1, 0, 2))                     # (t, n, d_in)
    gates_in = jnp.dot(z_tm.reshape(t * n, d_in).astype(bf), w_ih_t,
                       preferred_element_type=jnp.float32) + b_g
    gates_in = gates_in.reshape(t, n, 4 * h_dim)

    if hidden is None:
        h0 = jnp.zeros((n, h_dim), jnp.float32)
        c0 = jnp.zeros((n, h_dim), jnp.float32)
    else:
        h0 = hidden[0].reshape(n, h_dim).astype(jnp.float32)
        c0 = hidden[1].reshape(n, h_dim).astype(jnp.float32)

    def step(carry, g_in):
        h, cc = carry
        g = g_in + jnp.dot(h.astype(bf), w_hh_t,
                           preferred_element_type=jnp.float32)
        i = jax.nn.sigmoid(g[:, 0 * h_dim:1 * h_dim])
        f = jax.nn.sigmoid(g[:, 1 * h_dim:2 * h_dim])
        gg = jnp.tanh(g[:, 2 * h_dim:3 * h_dim])
        o = jax.nn.sigmoid(g[:, 3 * h_dim:4 * h_dim])
        cc = f * cc + i * gg
        h = o * jnp.tanh(cc)
        return (h, cc), h

    (h_n, c_n), hs = lax.scan(step, (h0, c0), gates_in)

    h_all = hs.reshape(t * n, h_dim).astype(bf)
    fc = jnp.maximum(
        jnp.dot(h_all, raw["fc_w"].T.astype(bf),
                preferred_element_type=jnp.float32)
        + raw["fc_b"].astype(jnp.float32), 0.0)
    head_w = jnp.concatenate([raw["mu_w"].T, raw["lv_w"].T], axis=1).astype(bf)
    head_b = jnp.concatenate([raw["mu_b"], raw["lv_b"]]).astype(jnp.float32)
    heads = jnp.dot(fc.astype(bf), head_w,
                    preferred_element_type=jnp.float32) + head_b
    heads = jnp.transpose(heads.reshape(t, n, 2 * x_dim), (1, 0, 2))
    return heads[..., :x_dim], heads[..., x_dim:], (h_n[None], c_n[None])


if __name__ == "__main__":
    x_dim, h_dim, c_dim = 4, 32, 3
    n, t = 2, 8

    key = jax.random.PRNGKey(0)
    k_p, k_x, k_z, k_c = jax.random.split(key, 4)
    raw = make_params(k_p, x_dim, h_dim, c_dim)
    kernel_params = prepare_decoder_params(raw, x_dim, h_dim, c_dim)

    x_prev = jax.random.normal(k_x, (n, t, x_dim), jnp.float32)
    z = jax.random.normal(k_z, (n, t, x_dim), jnp.float32)
    c = jax.random.normal(k_c, (n, c_dim), jnp.float32)

    fwd = jax.jit(functools.partial(decoder_forward, kernel_params))
    mu, logvar, hidden = fwd(x_prev, z, c)
    jax.block_until_ready((mu, logvar, hidden))

    mu_ref, lv_ref, hid_ref = decoder_reference(raw, x_prev, z, c)
    assert mu.shape == (n, t, x_dim) and logvar.shape == (n, t, x_dim)
    assert hidden[0].shape == (1, n, h_dim) and hidden[1].shape == (1, n, h_dim)
    assert jnp.allclose(mu, mu_ref, rtol=2e-3, atol=2e-3)
    assert jnp.allclose(logvar, lv_ref, rtol=2e-3, atol=2e-3)
    assert jnp.allclose(hidden[0], hid_ref[0], rtol=2e-3, atol=2e-3)
    assert jnp.allclose(hidden[1], hid_ref[1], rtol=2e-3, atol=2e-3)

    print("KERNEL_OK")
</pallas_src>

<mosaic_0001>
module attributes {stable_mosaic.version = 11 : i64} {
  func.func @_decoder_kernel(%arg0: i32, %arg1: memref<128x11xbf16, #tpu.memory_space<vmem>>, %arg2: memref<11x512xbf16, #tpu.memory_space<vmem>>, %arg3: memref<128x512xbf16, #tpu.memory_space<vmem>>, %arg4: memref<1x512xf32, #tpu.memory_space<vmem>>, %arg5: memref<128x128xbf16, #tpu.memory_space<vmem>>, %arg6: memref<1x128xf32, #tpu.memory_space<vmem>>, %arg7: memref<128x128xbf16, #tpu.memory_space<vmem>>, %arg8: memref<1x128xf32, #tpu.memory_space<vmem>>, %arg9: memref<16x128xf32, #tpu.memory_space<vmem>>, %arg10: memref<16x128xf32, #tpu.memory_space<vmem>>, %arg11: memref<128x128xf32, #tpu.memory_space<vmem>>, %arg12: memref<16x128xf32, #tpu.memory_space<vmem>>, %arg13: memref<16x128xf32, #tpu.memory_space<vmem>>, %arg14: memref<128x512xf32, #tpu.memory_space<vmem>>, %arg15: memref<8x16x128xbf16, #tpu.memory_space<vmem>>) attributes {dimension_semantics = [#tpu.dimension_semantics<arbitrary>], iteration_bounds = array<i64: 1>, scalar_prefetch = 0 : i64, scratch_operands = 2 : i64, tpu.core_type = #tpu.core_type<tc>, window_params = [{pipeline_mode = #tpu.pipeline_mode<synchronous>, transform_indices = @transform_0, window_bounds = array<i64: 128, 11>}, {pipeline_mode = #tpu.pipeline_mode<synchronous>, transform_indices = @transform_1, window_bounds = array<i64: 11, 512>}, {pipeline_mode = #tpu.pipeline_mode<synchronous>, transform_indices = @transform_2, window_bounds = array<i64: 128, 512>}, {pipeline_mode = #tpu.pipeline_mode<synchronous>, transform_indices = @transform_3, window_bounds = array<i64: 1, 512>}, {pipeline_mode = #tpu.pipeline_mode<synchronous>, transform_indices = @transform_4, window_bounds = array<i64: 128, 128>}, {pipeline_mode = #tpu.pipeline_mode<synchronous>, transform_indices = @transform_5, window_bounds = array<i64: 1, 128>}, {pipeline_mode = #tpu.pipeline_mode<synchronous>, transform_indices = @transform_6, window_bounds = array<i64: 128, 128>}, {pipeline_mode = #tpu.pipeline_mode<synchronous>, transform_indices = @transform_7, window_bounds = array<i64: 1, 128>}, {pipeline_mode = #tpu.pipeline_mode<synchronous>, transform_indices = @transform_8, window_bounds = array<i64: 16, 128>}, {pipeline_mode = #tpu.pipeline_mode<synchronous>, transform_indices = @transform_9, window_bounds = array<i64: 16, 128>}, {pipeline_mode = #tpu.pipeline_mode<synchronous>, transform_indices = @transform_10, window_bounds = array<i64: 128, 128>}, {pipeline_mode = #tpu.pipeline_mode<synchronous>, transform_indices = @transform_11, window_bounds = array<i64: 16, 128>}, {pipeline_mode = #tpu.pipeline_mode<synchronous>, transform_indices = @transform_12, window_bounds = array<i64: 16, 128>}]} {
    %c0 = arith.constant 0 : index
    %c0_0 = arith.constant 0 : index
    %0 = vector.load %arg1[%c0, %c0_0] : memref<128x11xbf16, #tpu.memory_space<vmem>>, vector<128x11xbf16>
    %c0_1 = arith.constant 0 : index
    %c0_2 = arith.constant 0 : index
    %1 = vector.load %arg2[%c0_1, %c0_2] : memref<11x512xbf16, #tpu.memory_space<vmem>>, vector<11x512xbf16>
    %cst = arith.constant dense<0.000000e+00> : vector<128x512xf32>
    %2 = tpu.matmul %0, %1, %cst {dimension_numbers = #tpu.dot_dimension_numbers<[1], [0], [0], [1], [0, 0, 1, 1], [], []>} : vector<128x11xbf16>, vector<11x512xbf16>, vector<128x512xf32> -> vector<128x512xf32>
    %c0_3 = arith.constant 0 : index
    %c0_4 = arith.constant 0 : index
    %3 = vector.load %arg4[%c0_3, %c0_4] : memref<1x512xf32, #tpu.memory_space<vmem>>, vector<1x512xf32>
    %4 = vector.broadcast %3 : vector<1x512xf32> to vector<128x512xf32>
    %5 = arith.addf %2, %4 : vector<128x512xf32>
    %c0_5 = arith.constant 0 : index
    %c0_6 = arith.constant 0 : index
    %6 = vector.load %arg14[%c0_5, %c0_6] : memref<128x512xf32, #tpu.memory_space<vmem>>, vector<128x512xf32>
    tpu.vector_store %arg14[%c0_5, %c0_6], %5 {strides = array<i32>} : memref<128x512xf32, #tpu.memory_space<vmem>>, vector<128x512xf32>,
    %c0_7 = arith.constant 0 : index
    %c0_8 = arith.constant 0 : index
    %7 = vector.load %arg9[%c0_7, %c0_8] : memref<16x128xf32, #tpu.memory_space<vmem>>, vector<16x128xf32>
    %c0_9 = arith.constant 0 : index
    %c0_10 = arith.constant 0 : index
    %8 = vector.load %arg10[%c0_9, %c0_10] : memref<16x128xf32, #tpu.memory_space<vmem>>, vector<16x128xf32>
    %c0_i32 = arith.constant 0 : i32
    %c16_i32 = arith.constant 16 : i32
    %9 = arith.muli %c0_i32, %c16_i32 : i32
    %10 = tpu.assume_multiple %9, 16 : i32
    %11 = arith.index_cast %10 : i32 to index
    %c0_11 = arith.constant 0 : index
    %12 = vector.load %arg14[%11, %c0_11] : memref<128x512xf32, #tpu.memory_space<vmem>>, vector<16x512xf32>
    %13 = arith.truncf %7 : vector<16x128xf32> to vector<16x128xbf16>
    %c0_12 = arith.constant 0 : index
    %c0_13 = arith.constant 0 : index
    %14 = vector.load %arg3[%c0_12, %c0_13] : memref<128x512xbf16, #tpu.memory_space<vmem>>, vector<128x512xbf16>
    %cst_14 = arith.constant dense<0.000000e+00> : vector<16x512xf32>
    %15 = tpu.matmul %13, %14, %cst_14 {dimension_numbers = #tpu.dot_dimension_numbers<[1], [0], [0], [1], [0, 0, 1, 1], [], []>} : vector<16x128xbf16>, vector<128x512xbf16>, vector<16x512xf32> -> vector<16x512xf32>
    %16 = arith.addf %12, %15 : vector<16x512xf32>
    %17 = vector.extract_strided_slice %16 {offsets = [0, 0], sizes = [16, 384], strides = [1, 1]} : vector<16x512xf32> to vector<16x384xf32>
    %18 = arith.negf %17 : vector<16x384xf32>
    %19 = math.exp %18 : vector<16x384xf32>
    %cst_15 = arith.constant 1.000000e+00 : f32
    %20 = vector.broadcast %cst_15 : f32 to vector<16x384xf32>
    %21 = arith.addf %20, %19 : vector<16x384xf32>
    %22 = arith.divf %20, %21 : vector<16x384xf32>
    %23 = vector.extract_strided_slice %22 {offsets = [0, 0], sizes = [16, 128], strides = [1, 1]} : vector<16x384xf32> to vector<16x128xf32>
    %24 = vector.extract_strided_slice %22 {offsets = [0, 128], sizes = [16, 128], strides = [1, 1]} : vector<16x384xf32> to vector<16x128xf32>
    %25 = vector.extract_strided_slice %22 {offsets = [0, 256], sizes = [16, 128], strides = [1, 1]} : vector<16x384xf32> to vector<16x128xf32>
    %26 = vector.extract_strided_slice %16 {offsets = [0, 384], sizes = [16, 128], strides = [1, 1]} : vector<16x512xf32> to vector<16x128xf32>
    %27 = math.tanh %26 : vector<16x128xf32>
    %28 = arith.mulf %24, %8 : vector<16x128xf32>
    %29 = arith.mulf %23, %27 : vector<16x128xf32>
    %30 = arith.addf %28, %29 : vector<16x128xf32>
    %31 = math.tanh %30 : vector<16x128xf32>
    %32 = arith.mulf %25, %31 : vector<16x128xf32>
    %33 = arith.truncf %32 : vector<16x128xf32> to vector<16x128xbf16>
    %34 = arith.index_cast %c0_i32 : i32 to index
    %c0_16 = arith.constant 0 : index
    %c0_17 = arith.constant 0 : index
    %35 = vector.load %arg15[%34, %c0_16, %c0_17] : memref<8x16x128xbf16, #tpu.memory_space<vmem>>, vector<1x16x128xbf16>
    %36 = vector.shape_cast %35 : vector<1x16x128xbf16> to vector<16x128xbf16>
    %37 = vector.shape_cast %33 : vector<16x128xbf16> to vector<1x16x128xbf16>
    tpu.vector_store %arg15[%34, %c0_16, %c0_17], %37 {strides = array<i32>} : memref<8x16x128xbf16, #tpu.memory_space<vmem>>, vector<1x16x128xbf16>,
    %c1_i32 = arith.constant 1 : i32
    %c16_i32_18 = arith.constant 16 : i32
    %38 = arith.muli %c1_i32, %c16_i32_18 : i32
    %39 = tpu.assume_multiple %38, 16 : i32
    %40 = arith.index_cast %39 : i32 to index
    %c0_19 = arith.constant 0 : index
    %41 = vector.load %arg14[%40, %c0_19] : memref<128x512xf32, #tpu.memory_space<vmem>>, vector<16x512xf32>
    %42 = arith.truncf %32 : vector<16x128xf32> to vector<16x128xbf16>
    %c0_20 = arith.constant 0 : index
    %c0_21 = arith.constant 0 : index
    %43 = vector.load %arg3[%c0_20, %c0_21] : memref<128x512xbf16, #tpu.memory_space<vmem>>, vector<128x512xbf16>
    %cst_22 = arith.constant dense<0.000000e+00> : vector<16x512xf32>
    %44 = tpu.matmul %42, %43, %cst_22 {dimension_numbers = #tpu.dot_dimension_numbers<[1], [0], [0], [1], [0, 0, 1, 1], [], []>} : vector<16x128xbf16>, vector<128x512xbf16>, vector<16x512xf32> -> vector<16x512xf32>
    %45 = arith.addf %41, %44 : vector<16x512xf32>
    %46 = vector.extract_strided_slice %45 {offsets = [0, 0], sizes = [16, 384], strides = [1, 1]} : vector<16x512xf32> to vector<16x384xf32>
    %47 = arith.negf %46 : vector<16x384xf32>
    %48 = math.exp %47 : vector<16x384xf32>
    %cst_23 = arith.constant 1.000000e+00 : f32
    %49 = vector.broadcast %cst_23 : f32 to vector<16x384xf32>
    %50 = arith.addf %49, %48 : vector<16x384xf32>
    %51 = arith.divf %49, %50 : vector<16x384xf32>
    %52 = vector.extract_strided_slice %51 {offsets = [0, 0], sizes = [16, 128], strides = [1, 1]} : vector<16x384xf32> to vector<16x128xf32>
    %53 = vector.extract_strided_slice %51 {offsets = [0, 128], sizes = [16, 128], strides = [1, 1]} : vector<16x384xf32> to vector<16x128xf32>
    %54 = vector.extract_strided_slice %51 {offsets = [0, 256], sizes = [16, 128], strides = [1, 1]} : vector<16x384xf32> to vector<16x128xf32>
    %55 = vector.extract_strided_slice %45 {offsets = [0, 384], sizes = [16, 128], strides = [1, 1]} : vector<16x512xf32> to vector<16x128xf32>
    %56 = math.tanh %55 : vector<16x128xf32>
    %57 = arith.mulf %53, %30 : vector<16x128xf32>
    %58 = arith.mulf %52, %56 : vector<16x128xf32>
    %59 = arith.addf %57, %58 : vector<16x128xf32>
    %60 = math.tanh %59 : vector<16x128xf32>
    %61 = arith.mulf %54, %60 : vector<16x128xf32>
    %62 = arith.truncf %61 : vector<16x128xf32> to vector<16x128xbf16>
    %63 = arith.index_cast %c1_i32 : i32 to index
    %c0_24 = arith.constant 0 : index
    %c0_25 = arith.constant 0 : index
    %64 = vector.load %arg15[%63, %c0_24, %c0_25] : memref<8x16x128xbf16, #tpu.memory_space<vmem>>, vector<1x16x128xbf16>
    %65 = vector.shape_cast %64 : vector<1x16x128xbf16> to vector<16x128xbf16>
    %66 = vector.shape_cast %62 : vector<16x128xbf16> to vector<1x16x128xbf16>
    tpu.vector_store %arg15[%63, %c0_24, %c0_25], %66 {strides = array<i32>} : memref<8x16x128xbf16, #tpu.memory_space<vmem>>, vector<1x16x128xbf16>,
    %c2_i32 = arith.constant 2 : i32
    %c16_i32_26 = arith.constant 16 : i32
    %67 = arith.muli %c2_i32, %c16_i32_26 : i32
    %68 = tpu.assume_multiple %67, 16 : i32
    %69 = arith.index_cast %68 : i32 to index
    %c0_27 = arith.constant 0 : index
    %70 = vector.load %arg14[%69, %c0_27] : memref<128x512xf32, #tpu.memory_space<vmem>>, vector<16x512xf32>
    %71 = arith.truncf %61 : vector<16x128xf32> to vector<16x128xbf16>
    %c0_28 = arith.constant 0 : index
    %c0_29 = arith.constant 0 : index
    %72 = vector.load %arg3[%c0_28, %c0_29] : memref<128x512xbf16, #tpu.memory_space<vmem>>, vector<128x512xbf16>
    %cst_30 = arith.constant dense<0.000000e+00> : vector<16x512xf32>
    %73 = tpu.matmul %71, %72, %cst_30 {dimension_numbers = #tpu.dot_dimension_numbers<[1], [0], [0], [1], [0, 0, 1, 1], [], []>} : vector<16x128xbf16>, vector<128x512xbf16>, vector<16x512xf32> -> vector<16x512xf32>
    %74 = arith.addf %70, %73 : vector<16x512xf32>
    %75 = vector.extract_strided_slice %74 {offsets = [0, 0], sizes = [16, 384], strides = [1, 1]} : vector<16x512xf32> to vector<16x384xf32>
    %76 = arith.negf %75 : vector<16x384xf32>
    %77 = math.exp %76 : vector<16x384xf32>
    %cst_31 = arith.constant 1.000000e+00 : f32
    %78 = vector.broadcast %cst_31 : f32 to vector<16x384xf32>
    %79 = arith.addf %78, %77 : vector<16x384xf32>
    %80 = arith.divf %78, %79 : vector<16x384xf32>
    %81 = vector.extract_strided_slice %80 {offsets = [0, 0], sizes = [16, 128], strides = [1, 1]} : vector<16x384xf32> to vector<16x128xf32>
    %82 = vector.extract_strided_slice %80 {offsets = [0, 128], sizes = [16, 128], strides = [1, 1]} : vector<16x384xf32> to vector<16x128xf32>
    %83 = vector.extract_strided_slice %80 {offsets = [0, 256], sizes = [16, 128], strides = [1, 1]} : vector<16x384xf32> to vector<16x128xf32>
    %84 = vector.extract_strided_slice %74 {offsets = [0, 384], sizes = [16, 128], strides = [1, 1]} : vector<16x512xf32> to vector<16x128xf32>
    %85 = math.tanh %84 : vector<16x128xf32>
    %86 = arith.mulf %82, %59 : vector<16x128xf32>
    %87 = arith.mulf %81, %85 : vector<16x128xf32>
    %88 = arith.addf %86, %87 : vector<16x128xf32>
    %89 = math.tanh %88 : vector<16x128xf32>
    %90 = arith.mulf %83, %89 : vector<16x128xf32>
    %91 = arith.truncf %90 : vector<16x128xf32> to vector<16x128xbf16>
    %92 = arith.index_cast %c2_i32 : i32 to index
    %c0_32 = arith.constant 0 : index
    %c0_33 = arith.constant 0 : index
    %93 = vector.load %arg15[%92, %c0_32, %c0_33] : memref<8x16x128xbf16, #tpu.memory_space<vmem>>, vector<1x16x128xbf16>
    %94 = vector.shape_cast %93 : vector<1x16x128xbf16> to vector<16x128xbf16>
    %95 = vector.shape_cast %91 : vector<16x128xbf16> to vector<1x16x128xbf16>
    tpu.vector_store %arg15[%92, %c0_32, %c0_33], %95 {strides = array<i32>} : memref<8x16x128xbf16, #tpu.memory_space<vmem>>, vector<1x16x128xbf16>,
    %c3_i32 = arith.constant 3 : i32
    %c16_i32_34 = arith.constant 16 : i32
    %96 = arith.muli %c3_i32, %c16_i32_34 : i32
    %97 = tpu.assume_multiple %96, 16 : i32
    %98 = arith.index_cast %97 : i32 to index
    %c0_35 = arith.constant 0 : index
    %99 = vector.load %arg14[%98, %c0_35] : memref<128x512xf32, #tpu.memory_space<vmem>>, vector<16x512xf32>
    %100 = arith.truncf %90 : vector<16x128xf32> to vector<16x128xbf16>
    %c0_36 = arith.constant 0 : index
    %c0_37 = arith.constant 0 : index
    %101 = vector.load %arg3[%c0_36, %c0_37] : memref<128x512xbf16, #tpu.memory_space<vmem>>, vector<128x512xbf16>
    %cst_38 = arith.constant dense<0.000000e+00> : vector<16x512xf32>
    %102 = tpu.matmul %100, %101, %cst_38 {dimension_numbers = #tpu.dot_dimension_numbers<[1], [0], [0], [1], [0, 0, 1, 1], [], []>} : vector<16x128xbf16>, vector<128x512xbf16>, vector<16x512xf32> -> vector<16x512xf32>
    %103 = arith.addf %99, %102 : vector<16x512xf32>
    %104 = vector.extract_strided_slice %103 {offsets = [0, 0], sizes = [16, 384], strides = [1, 1]} : vector<16x512xf32> to vector<16x384xf32>
    %105 = arith.negf %104 : vector<16x384xf32>
    %106 = math.exp %105 : vector<16x384xf32>
    %cst_39 = arith.constant 1.000000e+00 : f32
    %107 = vector.broadcast %cst_39 : f32 to vector<16x384xf32>
    %108 = arith.addf %107, %106 : vector<16x384xf32>
    %109 = arith.divf %107, %108 : vector<16x384xf32>
    %110 = vector.extract_strided_slice %109 {offsets = [0, 0], sizes = [16, 128], strides = [1, 1]} : vector<16x384xf32> to vector<16x128xf32>
    %111 = vector.extract_strided_slice %109 {offsets = [0, 128], sizes = [16, 128], strides = [1, 1]} : vector<16x384xf32> to vector<16x128xf32>
    %112 = vector.extract_strided_slice %109 {offsets = [0, 256], sizes = [16, 128], strides = [1, 1]} : vector<16x384xf32> to vector<16x128xf32>
    %113 = vector.extract_strided_slice %103 {offsets = [0, 384], sizes = [16, 128], strides = [1, 1]} : vector<16x512xf32> to vector<16x128xf32>
    %114 = math.tanh %113 : vector<16x128xf32>
    %115 = arith.mulf %111, %88 : vector<16x128xf32>
    %116 = arith.mulf %110, %114 : vector<16x128xf32>
    %117 = arith.addf %115, %116 : vector<16x128xf32>
    %118 = math.tanh %117 : vector<16x128xf32>
    %119 = arith.mulf %112, %118 : vector<16x128xf32>
    %120 = arith.truncf %119 : vector<16x128xf32> to vector<16x128xbf16>
    %121 = arith.index_cast %c3_i32 : i32 to index
    %c0_40 = arith.constant 0 : index
    %c0_41 = arith.constant 0 : index
    %122 = vector.load %arg15[%121, %c0_40, %c0_41] : memref<8x16x128xbf16, #tpu.memory_space<vmem>>, vector<1x16x128xbf16>
    %123 = vector.shape_cast %122 : vector<1x16x128xbf16> to vector<16x128xbf16>
    %124 = vector.shape_cast %120 : vector<16x128xbf16> to vector<1x16x128xbf16>
    tpu.vector_store %arg15[%121, %c0_40, %c0_41], %124 {strides = array<i32>} : memref<8x16x128xbf16, #tpu.memory_space<vmem>>, vector<1x16x128xbf16>,
    %c4_i32 = arith.constant 4 : i32
    %c16_i32_42 = arith.constant 16 : i32
    %125 = arith.muli %c4_i32, %c16_i32_42 : i32
    %126 = tpu.assume_multiple %125, 16 : i32
    %127 = arith.index_cast %126 : i32 to index
    %c0_43 = arith.constant 0 : index
    %128 = vector.load %arg14[%127, %c0_43] : memref<128x512xf32, #tpu.memory_space<vmem>>, vector<16x512xf32>
    %129 = arith.truncf %119 : vector<16x128xf32> to vector<16x128xbf16>
    %c0_44 = arith.constant 0 : index
    %c0_45 = arith.constant 0 : index
    %130 = vector.load %arg3[%c0_44, %c0_45] : memref<128x512xbf16, #tpu.memory_space<vmem>>, vector<128x512xbf16>
    %cst_46 = arith.constant dense<0.000000e+00> : vector<16x512xf32>
    %131 = tpu.matmul %129, %130, %cst_46 {dimension_numbers = #tpu.dot_dimension_numbers<[1], [0], [0], [1], [0, 0, 1, 1], [], []>} : vector<16x128xbf16>, vector<128x512xbf16>, vector<16x512xf32> -> vector<16x512xf32>
    %132 = arith.addf %128, %131 : vector<16x512xf32>
    %133 = vector.extract_strided_slice %132 {offsets = [0, 0], sizes = [16, 384], strides = [1, 1]} : vector<16x512xf32> to vector<16x384xf32>
    %134 = arith.negf %133 : vector<16x384xf32>
    %135 = math.exp %134 : vector<16x384xf32>
    %cst_47 = arith.constant 1.000000e+00 : f32
    %136 = vector.broadcast %cst_47 : f32 to vector<16x384xf32>
    %137 = arith.addf %136, %135 : vector<16x384xf32>
    %138 = arith.divf %136, %137 : vector<16x384xf32>
    %139 = vector.extract_strided_slice %138 {offsets = [0, 0], sizes = [16, 128], strides = [1, 1]} : vector<16x384xf32> to vector<16x128xf32>
    %140 = vector.extract_strided_slice %138 {offsets = [0, 128], sizes = [16, 128], strides = [1, 1]} : vector<16x384xf32> to vector<16x128xf32>
    %141 = vector.extract_strided_slice %138 {offsets = [0, 256], sizes = [16, 128], strides = [1, 1]} : vector<16x384xf32> to vector<16x128xf32>
    %142 = vector.extract_strided_slice %132 {offsets = [0, 384], sizes = [16, 128], strides = [1, 1]} : vector<16x512xf32> to vector<16x128xf32>
    %143 = math.tanh %142 : vector<16x128xf32>
    %144 = arith.mulf %140, %117 : vector<16x128xf32>
    %145 = arith.mulf %139, %143 : vector<16x128xf32>
    %146 = arith.addf %144, %145 : vector<16x128xf32>
    %147 = math.tanh %146 : vector<16x128xf32>
    %148 = arith.mulf %141, %147 : vector<16x128xf32>
    %149 = arith.truncf %148 : vector<16x128xf32> to vector<16x128xbf16>
    %150 = arith.index_cast %c4_i32 : i32 to index
    %c0_48 = arith.constant 0 : index
    %c0_49 = arith.constant 0 : index
    %151 = vector.load %arg15[%150, %c0_48, %c0_49] : memref<8x16x128xbf16, #tpu.memory_space<vmem>>, vector<1x16x128xbf16>
    %152 = vector.shape_cast %151 : vector<1x16x128xbf16> to vector<16x128xbf16>
    %153 = vector.shape_cast %149 : vector<16x128xbf16> to vector<1x16x128xbf16>
    tpu.vector_store %arg15[%150, %c0_48, %c0_49], %153 {strides = array<i32>} : memref<8x16x128xbf16, #tpu.memory_space<vmem>>, vector<1x16x128xbf16>,
    %c5_i32 = arith.constant 5 : i32
    %c16_i32_50 = arith.constant 16 : i32
    %154 = arith.muli %c5_i32, %c16_i32_50 : i32
    %155 = tpu.assume_multiple %154, 16 : i32
    %156 = arith.index_cast %155 : i32 to index
    %c0_51 = arith.constant 0 : index
    %157 = vector.load %arg14[%156, %c0_51] : memref<128x512xf32, #tpu.memory_space<vmem>>, vector<16x512xf32>
    %158 = arith.truncf %148 : vector<16x128xf32> to vector<16x128xbf16>
    %c0_52 = arith.constant 0 : index
    %c0_53 = arith.constant 0 : index
    %159 = vector.load %arg3[%c0_52, %c0_53] : memref<128x512xbf16, #tpu.memory_space<vmem>>, vector<128x512xbf16>
    %cst_54 = arith.constant dense<0.000000e+00> : vector<16x512xf32>
    %160 = tpu.matmul %158, %159, %cst_54 {dimension_numbers = #tpu.dot_dimension_numbers<[1], [0], [0], [1], [0, 0, 1, 1], [], []>} : vector<16x128xbf16>, vector<128x512xbf16>, vector<16x512xf32> -> vector<16x512xf32>
    %161 = arith.addf %157, %160 : vector<16x512xf32>
    %162 = vector.extract_strided_slice %161 {offsets = [0, 0], sizes = [16, 384], strides = [1, 1]} : vector<16x512xf32> to vector<16x384xf32>
    %163 = arith.negf %162 : vector<16x384xf32>
    %164 = math.exp %163 : vector<16x384xf32>
    %cst_55 = arith.constant 1.000000e+00 : f32
    %165 = vector.broadcast %cst_55 : f32 to vector<16x384xf32>
    %166 = arith.addf %165, %164 : vector<16x384xf32>
    %167 = arith.divf %165, %166 : vector<16x384xf32>
    %168 = vector.extract_strided_slice %167 {offsets = [0, 0], sizes = [16, 128], strides = [1, 1]} : vector<16x384xf32> to vector<16x128xf32>
    %169 = vector.extract_strided_slice %167 {offsets = [0, 128], sizes = [16, 128], strides = [1, 1]} : vector<16x384xf32> to vector<16x128xf32>
    %170 = vector.extract_strided_slice %167 {offsets = [0, 256], sizes = [16, 128], strides = [1, 1]} : vector<16x384xf32> to vector<16x128xf32>
    %171 = vector.extract_strided_slice %161 {offsets = [0, 384], sizes = [16, 128], strides = [1, 1]} : vector<16x512xf32> to vector<16x128xf32>
    %172 = math.tanh %171 : vector<16x128xf32>
    %173 = arith.mulf %169, %146 : vector<16x128xf32>
    %174 = arith.mulf %168, %172 : vector<16x128xf32>
    %175 = arith.addf %173, %174 : vector<16x128xf32>
    %176 = math.tanh %175 : vector<16x128xf32>
    %177 = arith.mulf %170, %176 : vector<16x128xf32>
    %178 = arith.truncf %177 : vector<16x128xf32> to vector<16x128xbf16>
    %179 = arith.index_cast %c5_i32 : i32 to index
    %c0_56 = arith.constant 0 : index
    %c0_57 = arith.constant 0 : index
    %180 = vector.load %arg15[%179, %c0_56, %c0_57] : memref<8x16x128xbf16, #tpu.memory_space<vmem>>, vector<1x16x128xbf16>
    %181 = vector.shape_cast %180 : vector<1x16x128xbf16> to vector<16x128xbf16>
    %182 = vector.shape_cast %178 : vector<16x128xbf16> to vector<1x16x128xbf16>
    tpu.vector_store %arg15[%179, %c0_56, %c0_57], %182 {strides = array<i32>} : memref<8x16x128xbf16, #tpu.memory_space<vmem>>, vector<1x16x128xbf16>,
    %c6_i32 = arith.constant 6 : i32
    %c16_i32_58 = arith.constant 16 : i32
    %183 = arith.muli %c6_i32, %c16_i32_58 : i32
    %184 = tpu.assume_multiple %183, 16 : i32
    %185 = arith.index_cast %184 : i32 to index
    %c0_59 = arith.constant 0 : index
    %186 = vector.load %arg14[%185, %c0_59] : memref<128x512xf32, #tpu.memory_space<vmem>>, vector<16x512xf32>
    %187 = arith.truncf %177 : vector<16x128xf32> to vector<16x128xbf16>
    %c0_60 = arith.constant 0 : index
    %c0_61 = arith.constant 0 : index
    %188 = vector.load %arg3[%c0_60, %c0_61] : memref<128x512xbf16, #tpu.memory_space<vmem>>, vector<128x512xbf16>
    %cst_62 = arith.constant dense<0.000000e+00> : vector<16x512xf32>
    %189 = tpu.matmul %187, %188, %cst_62 {dimension_numbers = #tpu.dot_dimension_numbers<[1], [0], [0], [1], [0, 0, 1, 1], [], []>} : vector<16x128xbf16>, vector<128x512xbf16>, vector<16x512xf32> -> vector<16x512xf32>
    %190 = arith.addf %186, %189 : vector<16x512xf32>
    %191 = vector.extract_strided_slice %190 {offsets = [0, 0], sizes = [16, 384], strides = [1, 1]} : vector<16x512xf32> to vector<16x384xf32>
    %192 = arith.negf %191 : vector<16x384xf32>
    %193 = math.exp %192 : vector<16x384xf32>
    %cst_63 = arith.constant 1.000000e+00 : f32
    %194 = vector.broadcast %cst_63 : f32 to vector<16x384xf32>
    %195 = arith.addf %194, %193 : vector<16x384xf32>
    %196 = arith.divf %194, %195 : vector<16x384xf32>
    %197 = vector.extract_strided_slice %196 {offsets = [0, 0], sizes = [16, 128], strides = [1, 1]} : vector<16x384xf32> to vector<16x128xf32>
    %198 = vector.extract_strided_slice %196 {offsets = [0, 128], sizes = [16, 128], strides = [1, 1]} : vector<16x384xf32> to vector<16x128xf32>
    %199 = vector.extract_strided_slice %196 {offsets = [0, 256], sizes = [16, 128], strides = [1, 1]} : vector<16x384xf32> to vector<16x128xf32>
    %200 = vector.extract_strided_slice %190 {offsets = [0, 384], sizes = [16, 128], strides = [1, 1]} : vector<16x512xf32> to vector<16x128xf32>
    %201 = math.tanh %200 : vector<16x128xf32>
    %202 = arith.mulf %198, %175 : vector<16x128xf32>
    %203 = arith.mulf %197, %201 : vector<16x128xf32>
    %204 = arith.addf %202, %203 : vector<16x128xf32>
    %205 = math.tanh %204 : vector<16x128xf32>
    %206 = arith.mulf %199, %205 : vector<16x128xf32>
    %207 = arith.truncf %206 : vector<16x128xf32> to vector<16x128xbf16>
    %208 = arith.index_cast %c6_i32 : i32 to index
    %c0_64 = arith.constant 0 : index
    %c0_65 = arith.constant 0 : index
    %209 = vector.load %arg15[%208, %c0_64, %c0_65] : memref<8x16x128xbf16, #tpu.memory_space<vmem>>, vector<1x16x128xbf16>
    %210 = vector.shape_cast %209 : vector<1x16x128xbf16> to vector<16x128xbf16>
    %211 = vector.shape_cast %207 : vector<16x128xbf16> to vector<1x16x128xbf16>
    tpu.vector_store %arg15[%208, %c0_64, %c0_65], %211 {strides = array<i32>} : memref<8x16x128xbf16, #tpu.memory_space<vmem>>, vector<1x16x128xbf16>,
    %c7_i32 = arith.constant 7 : i32
    %c16_i32_66 = arith.constant 16 : i32
    %212 = arith.muli %c7_i32, %c16_i32_66 : i32
    %213 = tpu.assume_multiple %212, 16 : i32
    %214 = arith.index_cast %213 : i32 to index
    %c0_67 = arith.constant 0 : index
    %215 = vector.load %arg14[%214, %c0_67] : memref<128x512xf32, #tpu.memory_space<vmem>>, vector<16x512xf32>
    %216 = arith.truncf %206 : vector<16x128xf32> to vector<16x128xbf16>
    %c0_68 = arith.constant 0 : index
    %c0_69 = arith.constant 0 : index
    %217 = vector.load %arg3[%c0_68, %c0_69] : memref<128x512xbf16, #tpu.memory_space<vmem>>, vector<128x512xbf16>
    %cst_70 = arith.constant dense<0.000000e+00> : vector<16x512xf32>
    %218 = tpu.matmul %216, %217, %cst_70 {dimension_numbers = #tpu.dot_dimension_numbers<[1], [0], [0], [1], [0, 0, 1, 1], [], []>} : vector<16x128xbf16>, vector<128x512xbf16>, vector<16x512xf32> -> vector<16x512xf32>
    %219 = arith.addf %215, %218 : vector<16x512xf32>
    %220 = vector.extract_strided_slice %219 {offsets = [0, 0], sizes = [16, 384], strides = [1, 1]} : vector<16x512xf32> to vector<16x384xf32>
    %221 = arith.negf %220 : vector<16x384xf32>
    %222 = math.exp %221 : vector<16x384xf32>
    %cst_71 = arith.constant 1.000000e+00 : f32
    %223 = vector.broadcast %cst_71 : f32 to vector<16x384xf32>
    %224 = arith.addf %223, %222 : vector<16x384xf32>
    %225 = arith.divf %223, %224 : vector<16x384xf32>
    %226 = vector.extract_strided_slice %225 {offsets = [0, 0], sizes = [16, 128], strides = [1, 1]} : vector<16x384xf32> to vector<16x128xf32>
    %227 = vector.extract_strided_slice %225 {offsets = [0, 128], sizes = [16, 128], strides = [1, 1]} : vector<16x384xf32> to vector<16x128xf32>
    %228 = vector.extract_strided_slice %225 {offsets = [0, 256], sizes = [16, 128], strides = [1, 1]} : vector<16x384xf32> to vector<16x128xf32>
    %229 = vector.extract_strided_slice %219 {offsets = [0, 384], sizes = [16, 128], strides = [1, 1]} : vector<16x512xf32> to vector<16x128xf32>
    %230 = math.tanh %229 : vector<16x128xf32>
    %231 = arith.mulf %227, %204 : vector<16x128xf32>
    %232 = arith.mulf %226, %230 : vector<16x128xf32>
    %233 = arith.addf %231, %232 : vector<16x128xf32>
    %234 = math.tanh %233 : vector<16x128xf32>
    %235 = arith.mulf %228, %234 : vector<16x128xf32>
    %236 = arith.truncf %235 : vector<16x128xf32> to vector<16x128xbf16>
    %237 = arith.index_cast %c7_i32 : i32 to index
    %c0_72 = arith.constant 0 : index
    %c0_73 = arith.constant 0 : index
    %238 = vector.load %arg15[%237, %c0_72, %c0_73] : memref<8x16x128xbf16, #tpu.memory_space<vmem>>, vector<1x16x128xbf16>
    %239 = vector.shape_cast %238 : vector<1x16x128xbf16> to vector<16x128xbf16>
    %240 = vector.shape_cast %236 : vector<16x128xbf16> to vector<1x16x128xbf16>
    tpu.vector_store %arg15[%237, %c0_72, %c0_73], %240 {strides = array<i32>} : memref<8x16x128xbf16, #tpu.memory_space<vmem>>, vector<1x16x128xbf16>,
    %c8_i32 = arith.constant 8 : i32
    %c0_74 = arith.constant 0 : index
    %c0_75 = arith.constant 0 : index
    %241 = vector.load %arg12[%c0_74, %c0_75] : memref<16x128xf32, #tpu.memory_space<vmem>>, vector<16x128xf32>
    tpu.vector_store %arg12[%c0_74, %c0_75], %235 {strides = array<i32>} : memref<16x128xf32, #tpu.memory_space<vmem>>, vector<16x128xf32>,
    %c0_76 = arith.constant 0 : index
    %c0_77 = arith.constant 0 : index
    %242 = vector.load %arg13[%c0_76, %c0_77] : memref<16x128xf32, #tpu.memory_space<vmem>>, vector<16x128xf32>
    tpu.vector_store %arg13[%c0_76, %c0_77], %233 {strides = array<i32>} : memref<16x128xf32, #tpu.memory_space<vmem>>, vector<16x128xf32>,
    %c0_78 = arith.constant 0 : index
    %c0_79 = arith.constant 0 : index
    %c0_80 = arith.constant 0 : index
    %243 = vector.load %arg15[%c0_78, %c0_79, %c0_80] : memref<8x16x128xbf16, #tpu.memory_space<vmem>>, vector<8x16x128xbf16>
    %244 = vector.shape_cast %243 : vector<8x16x128xbf16> to vector<128x128xbf16>
    %c0_81 = arith.constant 0 : index
    %c0_82 = arith.constant 0 : index
    %245 = vector.load %arg5[%c0_81, %c0_82] : memref<128x128xbf16, #tpu.memory_space<vmem>>, vector<128x128xbf16>
    %cst_83 = arith.constant dense<0.000000e+00> : vector<128x128xf32>
    %246 = tpu.matmul %244, %245, %cst_83 {dimension_numbers = #tpu.dot_dimension_numbers<[1], [0], [0], [1], [0, 0, 1, 1], [], []>} : vector<128x128xbf16>, vector<128x128xbf16>, vector<128x128xf32> -> vector<128x128xf32>
    %c0_84 = arith.constant 0 : index
    %c0_85 = arith.constant 0 : index
    %247 = vector.load %arg6[%c0_84, %c0_85] : memref<1x128xf32, #tpu.memory_space<vmem>>, vector<1x128xf32>
    %248 = vector.broadcast %247 : vector<1x128xf32> to vector<128x128xf32>
    %249 = arith.addf %246, %248 : vector<128x128xf32>
    %cst_86 = arith.constant 0.000000e+00 : f32
    %250 = vector.broadcast %cst_86 : f32 to vector<128x128xf32>
    %251 = arith.maximumf %249, %250 : vector<128x128xf32>
    %252 = arith.truncf %251 : vector<128x128xf32> to vector<128x128xbf16>
    %c0_87 = arith.constant 0 : index
    %c0_88 = arith.constant 0 : index
    %253 = vector.load %arg7[%c0_87, %c0_88] : memref<128x128xbf16, #tpu.memory_space<vmem>>, vector<128x128xbf16>
    %cst_89 = arith.constant dense<0.000000e+00> : vector<128x128xf32>
    %254 = tpu.matmul %252, %253, %cst_89 {dimension_numbers = #tpu.dot_dimension_numbers<[1], [0], [0], [1], [0, 0, 1, 1], [], []>} : vector<128x128xbf16>, vector<128x128xbf16>, vector<128x128xf32> -> vector<128x128xf32>
    %c0_90 = arith.constant 0 : index
    %c0_91 = arith.constant 0 : index
    %255 = vector.load %arg8[%c0_90, %c0_91] : memref<1x128xf32, #tpu.memory_space<vmem>>, vector<1x128xf32>
    %256 = vector.broadcast %255 : vector<1x128xf32> to vector<128x128xf32>
    %257 = arith.addf %254, %256 : vector<128x128xf32>
    %c0_92 = arith.constant 0 : index
    %c0_93 = arith.constant 0 : index
    %258 = vector.load %arg11[%c0_92, %c0_93] : memref<128x128xf32, #tpu.memory_space<vmem>>, vector<128x128xf32>
    tpu.vector_store %arg11[%c0_92, %c0_93], %257 {strides = array<i32>} : memref<128x128xf32, #tpu.memory_space<vmem>>, vector<128x128xf32>,
    return
  }
  func.func @transform_0(%arg0: i32) -> (i32, i32) {
    %c0_i32 = arith.constant 0 : i32
    %c0_i32_0 = arith.constant 0 : i32
    %c0_i32_1 = arith.constant 0 : i32
    return %c0_i32, %c0_i32_0 : i32, i32
  }
  func.func @transform_1(%arg0: i32) -> (i32, i32) {
    %c0_i32 = arith.constant 0 : i32
    %c0_i32_0 = arith.constant 0 : i32
    %c0_i32_1 = arith.constant 0 : i32
    return %c0_i32, %c0_i32_0 : i32, i32
  }
  func.func @transform_2(%arg0: i32) -> (i32, i32) {
    %c0_i32 = arith.constant 0 : i32
    %c0_i32_0 = arith.constant 0 : i32
    %c0_i32_1 = arith.constant 0 : i32
    return %c0_i32, %c0_i32_0 : i32, i32
  }
  func.func @transform_3(%arg0: i32) -> (i32, i32) {
    %c0_i32 = arith.constant 0 : i32
    %c0_i32_0 = arith.constant 0 : i32
    %c0_i32_1 = arith.constant 0 : i32
    return %c0_i32, %c0_i32_0 : i32, i32
  }
  func.func @transform_4(%arg0: i32) -> (i32, i32) {
    %c0_i32 = arith.constant 0 : i32
    %c0_i32_0 = arith.constant 0 : i32
    %c0_i32_1 = arith.constant 0 : i32
    return %c0_i32, %c0_i32_0 : i32, i32
  }
  func.func @transform_5(%arg0: i32) -> (i32, i32) {
    %c0_i32 = arith.constant 0 : i32
    %c0_i32_0 = arith.constant 0 : i32
    %c0_i32_1 = arith.constant 0 : i32
    return %c0_i32, %c0_i32_0 : i32, i32
  }
  func.func @transform_6(%arg0: i32) -> (i32, i32) {
    %c0_i32 = arith.constant 0 : i32
    %c0_i32_0 = arith.constant 0 : i32
    %c0_i32_1 = arith.constant 0 : i32
    return %c0_i32, %c0_i32_0 : i32, i32
  }
  func.func @transform_7(%arg0: i32) -> (i32, i32) {
    %c0_i32 = arith.constant 0 : i32
    %c0_i32_0 = arith.constant 0 : i32
    %c0_i32_1 = arith.constant 0 : i32
    return %c0_i32, %c0_i32_0 : i32, i32
  }
  func.func @transform_8(%arg0: i32) -> (i32, i32) {
    %c0_i32 = arith.constant 0 : i32
    %c0_i32_0 = arith.constant 0 : i32
    %c0_i32_1 = arith.constant 0 : i32
    return %c0_i32, %c0_i32_0 : i32, i32
  }
  func.func @transform_9(%arg0: i32) -> (i32, i32) {
    %c0_i32 = arith.constant 0 : i32
    %c0_i32_0 = arith.constant 0 : i32
    %c0_i32_1 = arith.constant 0 : i32
    return %c0_i32, %c0_i32_0 : i32, i32
  }
  func.func @transform_10(%arg0: i32) -> (i32, i32) {
    %c0_i32 = arith.constant 0 : i32
    %c0_i32_0 = arith.constant 0 : i32
    %c0_i32_1 = arith.constant 0 : i32
    return %c0_i32, %c0_i32_0 : i32, i32
  }
  func.func @transform_11(%arg0: i32) -> (i32, i32) {
    %c0_i32 = arith.constant 0 : i32
    %c0_i32_0 = arith.constant 0 : i32
    %c0_i32_1 = arith.constant 0 : i32
    return %c0_i32, %c0_i32_0 : i32, i32
  }
  func.func @transform_12(%arg0: i32) -> (i32, i32) {
    %c0_i32 = arith.constant 0 : i32
    %c0_i32_0 = arith.constant 0 : i32
    %c0_i32_1 = arith.constant 0 : i32
    return %c0_i32, %c0_i32_0 : i32, i32
  }
}

</mosaic_0001>

<bundles_post_ra>
// kernel: decoder_forward.1
= control target key start
LH: loop header
LB: loop body
LE: loop exit
PB: predicated region body
PF: predicated region fallthrough
CT: control target
= control target key end

     0   :  { %18 = vsyncpa [#allocation5], 0  ;;  %s5904_s24 = smov [#allocation4]   ;;  %s5905_s26 = smov 256   ;;  %s7676_s0 = inlined_call_operand.vmem [shape: bf16[128,11], index: 0, kind: input, shape index: {}]   ;;  %s7677_s1 = inlined_call_operand.vmem [shape: bf16[11,512], index: 1, kind: input, shape index: {}]   ;;  %s7678_s2 = inlined_call_operand.hbm [shape: bf16[128,512], index: 2, kind: input, shape index: {}]   ;;  %s7679_s3 = inlined_call_operand.vmem [shape: f32[1,512], index: 3, kind: input, shape index: {}]   ;;  %s7680_s4 = inlined_call_operand.vmem [shape: bf16[128,128], index: 4, kind: input, shape index: {}]   ;;  %s7681_s5 = inlined_call_operand.vmem [shape: f32[1,128], index: 5, kind: input, shape index: {}]   ;;  %s7682_s6 = inlined_call_operand.vmem [shape: bf16[128,128], index: 6, kind: input, shape index: {}]   ;;  %s7683_s7 = inlined_call_operand.vmem [shape: f32[1,128], index: 7, kind: input, shape index: {}]   ;;  %s7684_s8 = inlined_call_operand.vmem [shape: f32[16,128], index: 8, kind: input, shape index: {}, may-alias: {8,11}]   ;;  %s7685_s9 = inlined_call_operand.vmem [shape: f32[16,128], index: 9, kind: input, shape index: {}, may-alias: {9,12}]   ;;  %s7686_s10 = inlined_call_operand.vmem [shape: f32[128,128], index: 10, kind: output, shape index: {0}]   ;;  %s7687_s11 = inlined_call_operand.vmem [shape: f32[16,128], index: 11, kind: output, shape index: {1}, may-alias: {8,11}]   ;;  %s7688_s12 = inlined_call_operand.vmem [shape: f32[16,128], index: 12, kind: output, shape index: {2}, may-alias: {9,12}]  }
   0x1   :  { %s27_s23 = sshll.u32 %s7678_s2, 4  ;;  %s29_s25 = sshll.u32 %s5904_s24, 4  ;;  %s28_s23 = int_to_ptr.hbm [resolvable:$true] %s27_s23  ;;  %s30_s25 = int_to_ptr.vmem [resolvable:$true] %s29_s25 }
   0x2   :  { %s5906_s27 = smov 16  }
   0x3   :  { %35 = dma.hbm_to_vmem [thread:$0]  %s28_s23, 4096, %s30_s25, [#allocation5], %s5905_s26, %s5905_s26, %s5906_s27  }
   0x4   :  { %5902 = dma.done.wait [#allocation5], 4096  }
   0x5   :  { %5903 = vsyncadd [#allocation5], 4294963200  ;;  %vm166_vm0 = vcmask 1044480   ;;  %vm167_vm1 = vcmask 1045504   ;;  %v5907_v0 = vmov 65535   ;;  %v6003_v17 = vld [vmem:[%s7676_s0 + $0x20] sm:$0xff] }
   0x6   :  { %v168_v1 = vsel %vm166_vm0, 4294967295, %v5907_v0  ;;  %v4068_v3 = vld [vmem:[%s7677_s1] sm:$0xf]  ;;  %v5292_v4 = vld [vmem:[%s7677_s1 + $0xc] sm:$0x30]  ;;  %vm141_vm2 = vcmask 89088  }
   0x7   :  { %v169_v2 = vsel %vm167_vm1, %v168_v1, 0  ;;  %v5290_v5 = vld [vmem:[%s7677_s1 + $0x4] sm:$0xf]  ;;  %v4069_v6 = vor.u32 %v5292_v4, %v4068_v3  ;;  %v4070_v7 = vld [vmem:[%s7677_s1 + $0x10] sm:$0x30]  ;;  %v6021_v21 = vld [vmem:[%s7676_s0 + $0x28] sm:$0xff] }
   0x8   :  { %v4076_v8 = vld [vmem:[%s7677_s1 + $0x8] sm:$0xf]  ;;  %v4073_v9 = vor.u32 %v5290_v5, %v4070_v7  ;;  %v5293_v10 = vld [vmem:[%s7677_s1 + $0x14] sm:$0x30]  ;;  %v5291_v11 = vld [vmem:[%s7677_s1 + $0xc] sm:$0xf] }
   0x9   :  { %v4078_v12 = vld [vmem:[%s7677_s1 + $0x18] sm:$0x30]  ;;  %v171_v13 = vand.u32 %v4069_v6, %v169_v2  ;;  %v4077_v14 = vor.u32 %v5293_v10, %v4076_v8  ;;  %v6012_v20 = vld [vmem:[%s7676_s0] sm:$0xff]  ;;  %v6030_v22 = vld [vmem:[%s7676_s0 + $0x8] sm:$0xff] }
   0xa   :  { %v4081_v15 = vor.u32 %v5291_v11, %v4078_v12  ;;  %v174_v16 = vand.u32 %v4073_v9, %v169_v2  ;;  %v6039_v23 = vld [vmem:[%s7676_s0 + $0x30] sm:$0xff]  ;;  %v4236_v24 = vld [vmem:[#allocation4 + $0xe8] sm:$0xf]  ;;  %v5325_v25 = vld [vmem:[#allocation4 + $0xf4] sm:$0xf0] }
   0xb   :  { %5614 = vmatpush.bf16.msra.mxu2 %v171_v13  ;;  %v177_v18 = vand.u32 %v4077_v14, %v169_v2  ;;  %189 = vmatpush.bf16.msra.mxu0 %v171_v13  ;;  %v6048_v26 = vld [vmem:[%s7676_s0 + $0x10] sm:$0xff]  ;;  %v4237_v27 = vor.u32 %v5325_v25, %v4236_v24  ;;  %v4228_v28 = vld [vmem:[#allocation4 + $0xe0] sm:$0xf]  ;;  %v5322_v30 = vld [vmem:[#allocation4 + $0xe4] sm:$0xf] }
   0xc   :  { %v180_v19 = vand.u32 %v4081_v15, %v169_v2  ;;  %5615 = vmatpush.bf16.msra.mxu3 %v174_v16  ;;  %238 = vmatpush.bf16.msra.mxu1 %v174_v16  ;;  %v5324_v29 = vld [vmem:[#allocation4 + $0xec] sm:$0xf0]  ;;  %v4230_v32 = vld [vmem:[#allocation4 + $0xf0] sm:$0xf0]  ;;  %v5323_v33 = vld [vmem:[#allocation4 + $0xec] sm:$0xf] }
   0xd   :  { %v4229_v31 = vor.u32 %v5324_v29, %v4228_v28  ;;  %v4238_v34 = vld [vmem:[#allocation4 + $0xf8] sm:$0xf0]  ;;  %v4233_v35 = vor.u32 %v5322_v30, %v4230_v32  ;;  %v4212_v37 = vld [vmem:[#allocation4 + $0xc0] sm:$0xf]  ;;  %v5320_v38 = vld [vmem:[#allocation4 + $0xcc] sm:$0xf0] }
   0xe   :  { %4086 = vmatmul.msk.bf16.vlgmr.msra.gmra.mxu2 %vm141_vm2, %v6003_v17  ;;  %4082 = vmatmul.msk.bf16.vlgmr.msra.gmra.mxu0 %vm141_vm2, %v6012_v20  ;;  %v4241_v36 = vor.u32 %v5323_v33, %v4238_v34  ;;  %v5318_v39 = vld [vmem:[#allocation4 + $0xc4] sm:$0xf]  ;;  %v4213_v40 = vor.u32 %v5320_v38, %v4212_v37  ;;  %v4214_v41 = vld [vmem:[#allocation4 + $0xd0] sm:$0xf0]  ;;  %v6057_v43 = vld [vmem:[%s7676_s0 + $0x38] sm:$0xff] }
   0xf   :  { %287 = vmatpush.bf16.msrb.mxu2 %v177_v18  ;;  %4094 = vmatmul.msk.bf16.vlgmr.msra.gmra.mxu3 %vm141_vm2, %v6003_v17  ;;  %v4217_v42 = vor.u32 %v5318_v39, %v4214_v41  ;;  %v4196_v44 = vld [vmem:[#allocation4 + $0xa0] sm:$0xf]  ;;  %v5316_v45 = vld [vmem:[#allocation4 + $0xac] sm:$0xf0]  ;;  %v5314_v46 = vld [vmem:[#allocation4 + $0xa4] sm:$0xf] }
  0x10   :  { %336 = vmatpush.bf16.msrb.mxu3 %v180_v19  ;;  %4090 = vmatmul.msk.bf16.vlgmr.msra.gmra.mxu1 %vm141_vm2, %v6012_v20  ;;  %v4197_v47 = vor.u32 %v5316_v45, %v4196_v44  ;;  %v4198_v48 = vld [vmem:[#allocation4 + $0xb0] sm:$0xf0]  ;;  %v4220_v49 = vld [vmem:[#allocation4 + $0xc8] sm:$0xf]  ;;  %v5321_v50 = vld [vmem:[#allocation4 + $0xd4] sm:$0xf0] }
  0x11   :  { %650 = vmatpush.bf16.msrb.mxu0 %v4229_v31  ;;  %664 = vmatpush.bf16.msrb.mxu1 %v4233_v35  ;;  %v4201_v51 = vor.u32 %v5314_v46, %v4198_v48  ;;  %v4180_v52 = vld [vmem:[#allocation4 + $0x80] sm:$0xf]  ;;  %v4221_v53 = vor.u32 %v5321_v50, %v4220_v49  ;;  %v5312_v54 = vld [vmem:[#allocation4 + $0x8c] sm:$0xf0]  ;;  %v5310_v55 = vld [vmem:[#allocation4 + $0x84] sm:$0xf] }
  0x12   :  { %v4182_v56 = vld [vmem:[#allocation4 + $0x90] sm:$0xf0]  ;;  %v4181_v57 = vor.u32 %v5312_v54, %v4180_v52  ;;  %v6066_v59 = vld [vmem:[%s7676_s0 + $0x18] sm:$0xff]  ;;  %v4164_v60 = vld [vmem:[#allocation4 + $0x60] sm:$0xf] }
  0x13   :  { %678 = vmatpush.bf16.msra.mxu2 %v4237_v27  ;;  %v4185_v58 = vor.u32 %v5310_v55, %v4182_v56  ;;  %v5308_v61 = vld [vmem:[#allocation4 + $0x6c] sm:$0xf0]  ;;  %v5306_v62 = vld [vmem:[#allocation4 + $0x64] sm:$0xf]  ;;  %v4166_v63 = vld [vmem:[#allocation4 + $0x70] sm:$0xf0] }
  0x14   :  { %692 = vmatpush.bf16.msra.mxu3 %v4241_v36  ;;  %v5319_v0 = vld [vmem:[#allocation4 + $0xcc] sm:$0xf]  ;;  %v4222_v1 = vld [vmem:[#allocation4 + $0xd8] sm:$0xf0]  ;;  %v4165_v2 = vor.u32 %v5308_v61, %v4164_v60  ;;  %v4169_v4 = vor.u32 %v5306_v62, %v4166_v63  ;;  %v4148_v5 = vld [vmem:[#allocation4 + $0x40] sm:$0xf] }
  0x15   :  { %651 = vmatpush.bf16.msrb.mxu0 %v4213_v40  ;;  %665 = vmatpush.bf16.msrb.mxu1 %v4217_v42  ;;  %v4225_v3 = vor.u32 %v5319_v0, %v4222_v1  ;;  %v5304_v6 = vld [vmem:[#allocation4 + $0x4c] sm:$0xf0]  ;;  %v5302_v7 = vld [vmem:[#allocation4 + $0x44] sm:$0xf]  ;;  %v4150_v8 = vld [vmem:[#allocation4 + $0x50] sm:$0xf0] }
  0x16   :  { %v4149_v9 = vor.u32 %v5304_v6, %v4148_v5  ;;  %v4153_v10 = vor.u32 %v5302_v7, %v4150_v8  ;;  %v4132_v11 = vld [vmem:[#allocation4 + $0x20] sm:$0xf]  ;;  %v5300_v12 = vld [vmem:[#allocation4 + $0x2c] sm:$0xf0]  ;;  %v5298_v13 = vld [vmem:[#allocation4 + $0x24] sm:$0xf] }
  0x17   :  { %679 = vmatpush.bf16.msra.mxu2 %v4221_v53  ;;  %v4133_v14 = vor.u32 %v5300_v12, %v4132_v11  ;;  %v4134_v15 = vld [vmem:[#allocation4 + $0x30] sm:$0xf0]  ;;  %v4204_v16 = vld [vmem:[#allocation4 + $0xa8] sm:$0xf]  ;;  %v5317_v18 = vld [vmem:[#allocation4 + $0xb4] sm:$0xf0] }
  0x18   :  { %693 = vmatpush.bf16.msra.mxu3 %v4225_v3  ;;  %v4137_v19 = vor.u32 %v5298_v13, %v4134_v15  ;;  %v4116_v24 = vld [vmem:[#allocation4] sm:$0xf]  ;;  %v4205_v25 = vor.u32 %v5317_v18, %v4204_v16  ;;  %v5296_v27 = vld [vmem:[#allocation4 + $0xc] sm:$0xf0]  ;;  %v5294_v28 = vld [vmem:[#allocation4 + $0x4] sm:$0xf] }
  0x19   :  { %652 = vmatpush.bf16.msrb.mxu0 %v4197_v47  ;;  %666 = vmatpush.bf16.msrb.mxu1 %v4201_v51  ;;  %v4118_v29 = vld [vmem:[#allocation4 + $0x10] sm:$0xf0]  ;;  %v4117_v30 = vor.u32 %v5296_v27, %v4116_v24  ;;  %v442_v32 = vld [vmem:[%s7684_s8] sm:$0xff]  ;;  %v5315_v33 = vld [vmem:[#allocation4 + $0xac] sm:$0xf] }
  0x1a   :  { %v4121_v31 = vor.u32 %v5294_v28, %v4118_v29  ;;  %v4206_v34 = vld [vmem:[#allocation4 + $0xb8] sm:$0xf0]  ;;  %v4188_v37 = vld [vmem:[#allocation4 + $0x88] sm:$0xf]  ;;  %v5313_v38 = vld [vmem:[#allocation4 + $0x94] sm:$0xf0] }
  0x1b   :  { %680 = vmatpush.bf16.msra.mxu2 %v4205_v25  ;;  %v4209_v36 = vor.u32 %v5315_v33, %v4206_v34  ;;  %v5311_v39 = vld [vmem:[#allocation4 + $0x8c] sm:$0xf]  ;;  %v4189_v40 = vor.u32 %v5313_v38, %v4188_v37  ;;  %v4190_v41 = vld [vmem:[#allocation4 + $0x98] sm:$0xf0]  ;;  %v4172_v44 = vld [vmem:[#allocation4 + $0x68] sm:$0xf] }
  0x1c   :  { %v4193_v42 = vor.u32 %v5311_v39, %v4190_v41  ;;  %v5309_v45 = vld [vmem:[#allocation4 + $0x74] sm:$0xf0]  ;;  %v5307_v47 = vld [vmem:[#allocation4 + $0x6c] sm:$0xf]  ;;  %v4156_v49 = vld [vmem:[#allocation4 + $0x48] sm:$0xf] }
  0x1d   :  { %653 = vmatpush.bf16.msrb.mxu0 %v4181_v57  ;;  %667 = vmatpush.bf16.msrb.mxu1 %v4185_v58  ;;  %v4173_v46 = vor.u32 %v5309_v45, %v4172_v44  ;;  %v5305_v50 = vld [vmem:[#allocation4 + $0x54] sm:$0xf0]  ;;  %v5303_v52 = vld [vmem:[#allocation4 + $0x4c] sm:$0xf]  ;;  %v6101_v54 = vld [vmem:[%s7679_s3] sm:$0xf] }
  0x1e   :  { %4087 = vmatmul.msk.bf16.gmra.mxu2 %vm141_vm2, %v6021_v21  ;;  %4083 = vmatmul.msk.bf16.gmra.mxu0 %vm141_vm2, %v6030_v22  ;;  %v4157_v51 = vor.u32 %v5305_v50, %v4156_v49  ;;  %v6106_v55 = vperm.slane %v6101_v54, 0  ;;  %v6111_v56 = vperm.slane %v6101_v54, 1  ;;  %v4140_v57 = vld [vmem:[#allocation4 + $0x28] sm:$0xf]  ;;  %v5301_v58 = vld [vmem:[#allocation4 + $0x34] sm:$0xf0] }
  0x1f   :  { %4095 = vmatmul.msk.bf16.gmra.mxu3 %vm141_vm2, %v6021_v21  ;;  %681 = vmatpush.bf16.msra.mxu2 %v4189_v40  ;;  %v5297_v11 = vld [vmem:[#allocation4 + $0x14] sm:$0xf0]  ;;  %v5295_v24 = vld [vmem:[#allocation4 + $0xc] sm:$0xf]  ;;  %v4126_v25 = vld [vmem:[#allocation4 + $0x18] sm:$0xf0] }
  0x20   :  { %4091 = vmatmul.msk.bf16.gmra.mxu1 %vm141_vm2, %v6030_v22  ;;  %694 = vmatpush.bf16.msra.mxu3 %v4209_v36  ;;  %v4129_v28 = vor.u32 %v5295_v24, %v4126_v25 }
  0x21   :  { %654 = vmatpush.bf16.msrb.mxu0 %v4165_v2  ;;  %668 = vmatpush.bf16.msrb.mxu1 %v4169_v4  ;;  %v4142_v2 = vld [vmem:[#allocation4 + $0x38] sm:$0xf0] }
  0x23   :  { %682 = vmatpush.bf16.msra.mxu2 %v4173_v46 }
  0x24   :  { %695 = vmatpush.bf16.msra.mxu3 %v4193_v42 }
  0x25   :  { %655 = vmatpush.bf16.msrb.mxu0 %v4149_v9  ;;  %669 = vmatpush.bf16.msrb.mxu1 %v4153_v10  ;;  %v4124_v10 = vld [vmem:[#allocation4 + $0x8] sm:$0xf] }
  0x26   :  { %v4125_v12 = vor.u32 %v5297_v11, %v4124_v10 }
  0x27   :  { %683 = vmatpush.bf16.msra.mxu2 %v4157_v51 }
  0x29   :  { %656 = vmatpush.bf16.msrb.mxu0 %v4133_v14  ;;  %670 = vmatpush.bf16.msrb.mxu1 %v4137_v19 }
  0x2d   :  { %657 = vmatpush.bf16.msrb.mxu0 %v4117_v30  ;;  %671 = vmatpush.bf16.msrb.mxu1 %v4121_v31 }
  0x2e   :  { %4088 = vmatmul.msk.bf16.gmra.mxu2 %vm141_vm2, %v6039_v23  ;;  %4084 = vmatmul.msk.bf16.gmra.mxu0 %vm141_vm2, %v6048_v26 }
  0x2f   :  { %4096 = vmatmul.msk.bf16.gmra.mxu3 %vm141_vm2, %v6039_v23 }
  0x30   :  { %4092 = vmatmul.msk.bf16.gmra.mxu1 %vm141_vm2, %v6048_v26 }
  0x3e   :  { %4089 = vmatmul.msk.bf16.gmra.mxu2 %vm141_vm2, %v6057_v43  ;;  %4085 = vmatmul.msk.bf16.gmra.mxu0 %vm141_vm2, %v6066_v59 }
  0x3f   :  { %4097 = vmatmul.msk.bf16.gmra.mxu3 %vm141_vm2, %v6057_v43 }
  0x40   :  { %4093 = vmatmul.msk.bf16.gmra.mxu1 %vm141_vm2, %v6066_v59 }
  0x4e   :  { %4098 = vmatmul.msk.bf16.vlgmr.msrb.gmra.mxu2 %vm141_vm2, %v6012_v20 }
  0x4f   :  { %4106 = vmatmul.msk.bf16.vlgmr.msrb.gmra.mxu3 %vm141_vm2, %v6012_v20  ;;  %v443_v20 = vld [vmem:[%s7684_s8 + $0x8] sm:$0xff] }
  0x50   :  { %v6082_v35 = vpack.c.bf16 %v443_v20, %v442_v32 }
  0x52   :  { %658 = vmatmul.bf16.vlgmr.msrb.gmra.mxu0 %v6082_v35  ;;  %672 = vmatmul.bf16.vlgmr.msrb.gmra.mxu1 %v6082_v35 }
  0x5e   :  { %4099 = vmatmul.msk.bf16.gmra.mxu2 %vm141_vm2, %v6030_v22 }
  0x5f   :  { %4107 = vmatmul.msk.bf16.gmra.mxu3 %vm141_vm2, %v6030_v22  ;;  %v4174_v22 = vld [vmem:[#allocation4 + $0x78] sm:$0xf0] }
  0x60   :  { %v4177_v48 = vor.u32 %v5307_v47, %v4174_v22 }
  0x62   :  { %696 = vmatpush.bf16.msra.mxu3 %v4177_v48 }
  0x6e   :  { %4100 = vmatmul.msk.bf16.gmra.mxu2 %vm141_vm2, %v6048_v26 }
  0x6f   :  { %4108 = vmatmul.msk.bf16.gmra.mxu3 %vm141_vm2, %v6048_v26  ;;  %v4158_v26 = vld [vmem:[#allocation4 + $0x58] sm:$0xf0] }
  0x70   :  { %v4161_v53 = vor.u32 %v5303_v52, %v4158_v26 }
  0x72   :  { %697 = vmatpush.bf16.msra.mxu3 %v4161_v53 }
  0x7e   :  { %4101 = vmatmul.msk.bf16.gmra.mxu2 %vm141_vm2, %v6066_v59 }
  0x7f   :  { %4109 = vmatmul.msk.bf16.gmra.mxu3 %vm141_vm2, %v6066_v59  ;;  %v4141_v59 = vor.u32 %v5301_v58, %v4140_v57 }
  0x81   :  { %684 = vmatpush.bf16.msra.mxu2 %v4141_v59 }
  0x85   :  { %685 = vmatpush.bf16.msra.mxu2 %v4125_v12 }
  0x8b   :  { %v6119_v0 = vpop.f32.mrf.mxu0 }
  0x8d   :  { %v6121_v1 = vpop.f32.mrf.mxu1 }
  0x8e   :  { %4102 = vmatmul.msk.bf16.gmra.mxu2 %vm141_vm2, %v6003_v17 }
  0x8f   :  { %4110 = vmatmul.msk.bf16.gmra.mxu3 %vm141_vm2, %v6003_v17  ;;  %v5299_v17 = vld [vmem:[#allocation4 + $0x2c] sm:$0xf] }
  0x90   :  { %v4145_v3 = vor.u32 %v5299_v17, %v4142_v2 }
  0x91   :  { %v211_v60 = vpop.f32.mrf.mxu2 }
  0x92   :  { %v6114_v61 = vadd.f32 %v211_v60, %v6106_v55  ;;  %v260_v62 = vpop.f32.mrf.mxu3  ;;  %698 = vmatpush.bf16.msra.mxu3 %v4145_v3 }
  0x93   :  { %v6117_v63 = vadd.f32 %v260_v62, %v6111_v56  ;;  %v6129_v8 = vpop.f32.mrf.mxu0 }
  0x94   :  { %7689 = vst [vmem:[#allocation7_spill] sm:$0xff] %v6114_v61 }
  0x95   :  { %7690 = vst [vmem:[#allocation8_spill] sm:$0xff] %v6117_v63  ;;  %v6131_v9 = vpop.f32.mrf.mxu1 }
  0x96   :  { %699 = vmatpush.bf16.msra.mxu3 %v4129_v28 }
  0x99   :  { %v213_v4 = vpop.f32.mrf.mxu2 }
  0x9a   :  { %v6124_v5 = vadd.f32 %v213_v4, %v6106_v55  ;;  %v262_v6 = vpop.f32.mrf.mxu3 }
  0x9b   :  { %v6127_v7 = vadd.f32 %v262_v6, %v6111_v56  ;;  %v196_v18 = vpop.f32.mrf.mxu0 }
  0x9c   :  { %7691 = vst [vmem:[#allocation9_spill] sm:$0xff] %v6124_v5  ;;  %v6144_v27 = vadd.f32 %v196_v18, %v6106_v55  ;;  %v4322_v5 = vld [vmem:[#allocation4 + $0x88] sm:$0xf] }
  0x9d   :  { %7692 = vst [vmem:[#allocation10_spill] sm:$0xff] %v6127_v7  ;;  %v245_v19 = vpop.f32.mrf.mxu1 }
  0x9e   :  { %4103 = vmatmul.msk.bf16.gmra.mxu2 %vm141_vm2, %v6021_v21 }
  0x9f   :  { %4111 = vmatmul.msk.bf16.gmra.mxu3 %vm141_vm2, %v6021_v21  ;;  %v6147_v21 = vadd.f32 %v245_v19, %v6111_v56 }
  0xa1   :  { %v216_v13 = vpop.f32.mrf.mxu2 }
  0xa2   :  { %v6138_v14 = vadd.f32 %v216_v13, %v6106_v55  ;;  %v265_v15 = vpop.f32.mrf.mxu3 }
  0xa3   :  { %v6141_v16 = vadd.f32 %v265_v15, %v6111_v56  ;;  %v6153_v31 = vpop.f32.mrf.mxu0 }
  0xa4   :  { %7693 = vst [vmem:[#allocation11_spill] sm:$0xff] %v6138_v14 }
  0xa5   :  { %7694 = vst [vmem:[#allocation12_spill] sm:$0xff] %v6141_v16  ;;  %v6155_v32 = vpop.f32.mrf.mxu1 }
  0xa9   :  { %v6149_v29 = vpop.f32.mrf.mxu2 }
  0xaa   :  { %7695 = vst [vmem:[#allocation13_spill] sm:$0xff] %v6149_v29  ;;  %v6151_v30 = vpop.f32.mrf.mxu3  ;;  %v5352_v29 = vld [vmem:[#allocation4 + $0xcc] sm:$0xf0] }
  0xab   :  { %7696 = vst [vmem:[#allocation14_spill] sm:$0xff] %v6151_v30  ;;  %v201_v37 = vpop.f32.mrf.mxu0 }
  0xac   :  { %v6168_v39 = vadd.f32 %v201_v37, %v6106_v55 }
  0xad   :  { %v250_v38 = vpop.f32.mrf.mxu1 }
  0xae   :  { %4104 = vmatmul.msk.bf16.gmra.mxu2 %vm141_vm2, %v6039_v23  ;;  %v6171_v40 = vadd.f32 %v250_v38, %v6111_v56 }
  0xaf   :  { %4112 = vmatmul.msk.bf16.gmra.mxu3 %vm141_vm2, %v6039_v23 }
  0xb1   :  { %v221_v20 = vpop.f32.mrf.mxu2 }
  0xb2   :  { %v6162_v33 = vadd.f32 %v221_v20, %v6106_v55  ;;  %v270_v34 = vpop.f32.mrf.mxu3 }
  0xb3   :  { %v6165_v36 = vadd.f32 %v270_v34, %v6111_v56  ;;  %v6177_v23 = vpop.f32.mrf.mxu0  ;;  %v241_v34 = vadd.f32 %v6121_v1, %v6111_v56 }
  0xb4   :  { %7697 = vst [vmem:[#allocation15_spill] sm:$0xff] %v6162_v33 }
  0xb5   :  { %7698 = vst [vmem:[#allocation16_spill] sm:$0xff] %v6165_v36  ;;  %v6179_v44 = vpop.f32.mrf.mxu1 }
  0xb9   :  { %v6173_v41 = vpop.f32.mrf.mxu2 }
  0xba   :  { %7699 = vst [vmem:[#allocation17_spill] sm:$0xff] %v6173_v41  ;;  %v6175_v42 = vpop.f32.mrf.mxu3 }
  0xbb   :  { %7700 = vst [vmem:[#allocation18_spill] sm:$0xff] %v6175_v42  ;;  %v206_v48 = vpop.f32.mrf.mxu0 }
  0xbc   :  { %v6192_v50 = vadd.f32 %v206_v48, %v6106_v55  ;;  %v194_v48 = vadd.f32 %v6129_v8, %v6106_v55 }
  0xbd   :  { %v255_v49 = vpop.f32.mrf.mxu1 }
  0xbe   :  { %4105 = vmatmul.msk.bf16.gmra.mxu2 %vm141_vm2, %v6057_v43  ;;  %v6195_v51 = vadd.f32 %v255_v49, %v6111_v56 }
  0xbf   :  { %4113 = vmatmul.msk.bf16.gmra.mxu3 %vm141_vm2, %v6057_v43 }
  0xc1   :  { %v226_v45 = vpop.f32.mrf.mxu2 }
  0xc2   :  { %v6186_v46 = vadd.f32 %v226_v45, %v6106_v55  ;;  %v275_v47 = vpop.f32.mrf.mxu3  ;;  %v192_v45 = vadd.f32 %v6119_v0, %v6106_v55 }
  0xc3   :  { %v6189_v22 = vadd.f32 %v275_v47, %v6111_v56  ;;  %v6239_v18 = vpop.f32.mrf.mxu0 }
  0xc4   :  { %7701 = vst [vmem:[#allocation19_spill] sm:$0xff] %v6186_v46 }
  0xc5   :  { %7702 = vst [vmem:[#allocation20_spill] sm:$0xff] %v6189_v22  ;;  %v6241_v19 = vpop.f32.mrf.mxu1 }
  0xc6   :  { %7711 = vst [vmem:[#allocation29_spill] sm:$0xff] %v6239_v18  ;;  %v4290_v18 = vld [vmem:[#allocation4 + $0x48] sm:$0xf] }
  0xc7   :  { %7712 = vst [vmem:[#allocation30_spill] sm:$0xff] %v6241_v19  ;;  %v4284_v19 = vld [vmem:[#allocation4 + $0x50] sm:$0xf0] }
  0xc9   :  { %v6197_v52 = vpop.f32.mrf.mxu2 }
  0xca   :  { %7703 = vst [vmem:[#allocation21_spill] sm:$0xff] %v6197_v52  ;;  %v6199_v26 = vpop.f32.mrf.mxu3 }
  0xcb   :  { %7704 = vst [vmem:[#allocation22_spill] sm:$0xff] %v6199_v26  ;;  %v243_v26 = vadd.f32 %v6131_v9, %v6111_v56 }
  0xce   :  { %686 = vmatmul.bf16.vlgmr.msra.gmra.mxu2 %v6082_v35 }
  0xcf   :  { %700 = vmatmul.bf16.vlgmr.msra.gmra.mxu3 %v6082_v35  ;;  %v659_v28 = vpop.f32.mrf.mxu0  ;;  %v673_v20 = vpop.f32.mrf.mxu1 }
  0xd0   :  { %v707_v47 = vadd.f32 %v673_v20, %v241_v34  ;;  %v706_v49 = vadd.f32 %v659_v28, %v192_v45 }
  0xd1   :  { %v6203_v43 = vpop.f32.mrf.mxu2 }
  0xd2   :  { %v6205_v53 = vpop.f32.mrf.mxu3  ;;  %v4243_v52 = vmul.f32 -1.442695, %v707_v47  ;;  %v4242_v41 = vmul.f32 -1.442695, %v706_v49  ;;  %v5354_v49 = vld [vmem:[#allocation4 + $0xe4] sm:$0xf] }
  0xd4   :  { %5622 = vpow2.f32 %v4243_v52 }
  0xd5   :  { %5624 = vpow2.f32 %v4242_v41 }
  0xd7   :  { %v661_v22 = vpop.f32.mrf.mxu0  ;;  %v675_v46 = vpop.f32.mrf.mxu1 }
  0xd8   :  { %v710_v36 = vadd.f32 %v661_v22, %v194_v48  ;;  %v711_v33 = vadd.f32 %v675_v46, %v243_v26  ;;  %v4362_v26 = vld [vmem:[#allocation4 + $0xe0] sm:$0xf]  ;;  %v5356_v48 = vld [vmem:[#allocation4 + $0xec] sm:$0xf0] }
  0xd9   :  { %v6207_v57 = vpop.f32.mrf.mxu2 }
  0xda   :  { %v6209_v58 = vpop.f32.mrf.mxu3  ;;  %v4245_v0 = vmul.f32 -1.442695, %v710_v36  ;;  %v4246_v20 = vmul.f32 -1.442695, %v711_v33  ;;  %v5623_v8 = vpop.eup %5622 }
  0xdb   :  { %v5625_v9 = vpop.eup %5624  ;;  %v6267_v45 = vadd.f32 1.0, %v5623_v8  ;;  %v4370_v8 = vld [vmem:[#allocation4 + $0xe8] sm:$0xf] }
  0xdc   :  { %5626 = vpow2.f32 %v4245_v0  ;;  %v6269_v47 = vadd.f32 1.0, %v5625_v9  ;;  %v4363_v0 = vor.u32 %v5356_v48, %v4362_v26  ;;  %v5357_v9 = vld [vmem:[#allocation4 + $0xf4] sm:$0xf0]  ;;  %v4346_v48 = vld [vmem:[#allocation4 + $0xc0] sm:$0xf] }
  0xdd   :  { %5628 = vpow2.f32 %v4246_v20  ;;  %v4364_v20 = vld [vmem:[#allocation4 + $0xf0] sm:$0xf0]  ;;  %vm758_vm3 = vweird.f32 %v6267_v45 }
  0xde   :  { %5630 = vrcp.f32 %v6267_v45  ;;  %1053 = vmatpush.bf16.msra.mxu0 %v4363_v0  ;;  %v5351_v0 = vld [vmem:[#allocation4 + $0xcc] sm:$0xf]  ;;  %vm743_vm5 = vweird.f32 %v6269_v47 }
  0xdf   :  { %5632 = vrcp.f32 %v6269_v47 }
  0xe1   :  { %v6211_v59 = vpop.f32.mrf.mxu2 }
  0xe2   :  { %v6213_v60 = vpop.f32.mrf.mxu3 }
  0xe9   :  { %v6215_v62 = vpop.f32.mrf.mxu2 }
  0xea   :  { %v6217_v17 = vpop.f32.mrf.mxu3 }
  0xf1   :  { %v6219_v2 = vpop.f32.mrf.mxu2 }
  0xf2   :  { %v6221_v3 = vpop.f32.mrf.mxu3 }
  0xf9   :  { %v6223_v35 = vpop.f32.mrf.mxu2 }
  0xfa   :  { %v6225_v4 = vpop.f32.mrf.mxu3 }
 0x101   :  { %v6227_v6 = vpop.f32.mrf.mxu2 }
 0x102   :  { %7705 = vst [vmem:[#allocation23_spill] sm:$0xff] %v6227_v6  ;;  %v6229_v10 = vpop.f32.mrf.mxu3  ;;  %v5337_v6 = vld [vmem:[#allocation4 + $0x54] sm:$0xf0] }
 0x103   :  { %7706 = vst [vmem:[#allocation24_spill] sm:$0xff] %v6229_v10 }
 0x109   :  { %v6231_v11 = vpop.f32.mrf.mxu2 }
 0x10a   :  { %7707 = vst [vmem:[#allocation25_spill] sm:$0xff] %v6231_v11  ;;  %v6233_v12 = vpop.f32.mrf.mxu3  ;;  %v5334_v11 = vld [vmem:[#allocation4 + $0x44] sm:$0xf] }
 0x10b   :  { %7708 = vst [vmem:[#allocation26_spill] sm:$0xff] %v6233_v12  ;;  %v5336_v12 = vld [vmem:[#allocation4 + $0x4c] sm:$0xf0] }
 0x111   :  { %v6235_v13 = vpop.f32.mrf.mxu2 }
 0x112   :  { %7709 = vst [vmem:[#allocation27_spill] sm:$0xff] %v6235_v13  ;;  %v6237_v15 = vpop.f32.mrf.mxu3  ;;  %v762_v13 = vand.u32 2147483647, %v6267_v45 }
 0x113   :  { %7710 = vst [vmem:[#allocation28_spill] sm:$0xff] %v6237_v15  ;;  %v5349_v15 = vld [vmem:[#allocation4 + $0xb4] sm:$0xf0] }
 0x114   :  { %vm6350_vm9 = vcmp.eq.f32.partialorder %v762_v13, 8.507059e+37 }
 0x119   :  { %v6243_v24 = vpop.f32.mrf.mxu2 }
 0x11a   :  { %7713 = vst [vmem:[#allocation31_spill] sm:$0xff] %v6243_v24  ;;  %v6245_v25 = vpop.f32.mrf.mxu3  ;;  %v5348_v24 = vld [vmem:[#allocation4 + $0xac] sm:$0xf0] }
 0x11b   :  { %7714 = vst [vmem:[#allocation32_spill] sm:$0xff] %v6245_v25  ;;  %v4330_v25 = vld [vmem:[#allocation4 + $0xa0] sm:$0xf] }
 0x121   :  { %v6249_v37 = vpop.f32.mrf.mxu2 }
 0x122   :  { %7715 = vst [vmem:[#allocation33_spill] sm:$0xff] %v6249_v37  ;;  %v6251_v38 = vpop.f32.mrf.mxu3  ;;  %v6295_v37 = vperm.slane %v6101_v54, 2 }
 0x123   :  { %7716 = vst [vmem:[#allocation34_spill] sm:$0xff] %v6251_v38  ;;  %v764_v38 = vand.u32 2147483648, %v6267_v45 }
 0x129   :  { %v6259_v42 = vpop.f32.mrf.mxu2 }
 0x12a   :  { %7717 = vst [vmem:[#allocation35_spill] sm:$0xff] %v6259_v42  ;;  %v6261_v1 = vpop.f32.mrf.mxu3 }
 0x12b   :  { %7718 = vst [vmem:[#allocation36_spill] sm:$0xff] %v6261_v1  ;;  %v5627_v1 = vpop.eup %5626 }
 0x12c   :  { %v5629_v41 = vpop.eup %5628  ;;  %v6277_v33 = vadd.f32 1.0, %v5627_v1  ;;  %v4371_v1 = vor.u32 %v5357_v9, %v4370_v8  ;;  %v4354_v8 = vld [vmem:[#allocation4 + $0xc8] sm:$0xf]  ;;  %v5353_v9 = vld [vmem:[#allocation4 + $0xd4] sm:$0xf0] }
 0x12d   :  { %v6279_v46 = vadd.f32 1.0, %v5629_v41  ;;  %v6281_v52 = vpop.eup %5630  ;;  %v4372_v41 = vld [vmem:[#allocation4 + $0xf8] sm:$0xf0] }
 0x12e   :  { %5634 = vrcp.f32 %v6277_v33  ;;  %v754_v42 = vmul.f32 %v6281_v52, %v6267_v45  ;;  %1081 = vmatpush.bf16.msrb.mxu2 %v4371_v1  ;;  %v6302_v1 = vperm.slane %v6101_v54, 3  ;;  %vm759_vm4 = vweird.f32 %v6281_v52 }
 0x12f   :  { %5636 = vrcp.f32 %v6279_v46  ;;  %vm6342_vm7 = vmor %vm758_vm3, %vm759_vm4  ;;  %vm788_vm11 = vweird.f32 %v6277_v33  ;;  %vm803_vm13 = vweird.f32 %v6279_v46 }
 0x131   :  { %v6263_v34 = vpop.f32.mrf.mxu2 }
 0x132   :  { %7719 = vst [vmem:[#allocation37_spill] sm:$0xff] %v6263_v34  ;;  %v6265_v28 = vpop.f32.mrf.mxu3  ;;  %v6287_v34 = vpop.eup %5632 }
 0x133   :  { %7720 = vst [vmem:[#allocation38_spill] sm:$0xff] %v6265_v28  ;;  %v5355_v28 = vld [vmem:[#allocation4 + $0xec] sm:$0xf]  ;;  %v739_v16 = vmul.f32 %v6287_v34, %v6269_v47  ;;  %vm744_vm6 = vweird.f32 %v6287_v34 }
 0x134   :  { %v4375_v26 = vor.u32 %v5355_v28, %v4372_v41  ;;  %v4356_v28 = vld [vmem:[#allocation4 + $0xd8] sm:$0xf0]  ;;  %v755_v41 = vsub.f32 1.0, %v754_v42  ;;  %vm6359_vm10 = vmor %vm743_vm5, %vm744_vm6 }
 0x135   :  { %v740_v7 = vsub.f32 1.0, %v739_v16  ;;  %v749_v16 = vand.u32 2147483648, %v6269_v47 }
 0x136   :  { %1095 = vmatpush.bf16.msrb.mxu3 %v4375_v26  ;;  %v4359_v26 = vor.u32 %v5351_v0, %v4356_v28  ;;  %v5347_v0 = vld [vmem:[#allocation4 + $0xac] sm:$0xf] }
 0x137   :  { %v741_v61 = vmul.f32 %v6287_v34, %v740_v7  ;;  %v4276_v7 = vld [vmem:[#allocation4 + $0x38] sm:$0xf0] }
 0x139   :  { %v6272_v22 = vpop.f32.mrf.mxu2 }
 0x13a   :  { %7721 = vst [vmem:[#allocation39_spill] sm:$0xff] %v6272_v22  ;;  %v6274_v36 = vpop.f32.mrf.mxu3  ;;  %v4367_v22 = vor.u32 %v5354_v49, %v4364_v20  ;;  %v4347_v49 = vor.u32 %v5352_v29, %v4346_v48  ;;  %v4348_v20 = vld [vmem:[#allocation4 + $0xd0] sm:$0xf0]  ;;  %v6304_v29 = vor.u32 1.1754944e-38, %v764_v38  ;;  %1096 = vmatpush.bf16.msrb.mxu3 %v4359_v26  ;;  %v4314_v26 = vld [vmem:[#allocation4 + $0x80] sm:$0xf] }
 0x13b   :  { %7722 = vst [vmem:[#allocation40_spill] sm:$0xff] %v6274_v36 }
 0x13c   :  { %1067 = vmatpush.bf16.msra.mxu1 %v4367_v22  ;;  %v6299_v22 = vpop.eup %5634  ;;  %1054 = vmatpush.bf16.msra.mxu0 %v4347_v49 }
 0x13d   :  { %v6306_v48 = vpop.eup %5636  ;;  %v6310_v54 = vmul.f32 %v6299_v22, %v6277_v33  ;;  %vm789_vm12 = vweird.f32 %v6299_v22 }
 0x13e   :  { %vm804_vm14 = vweird.f32 %v6306_v48  ;;  %vm6397_vm15 = vmor %vm788_vm11, %vm789_vm12 }
 0x13f   :  { %vm6404_vm0 = vmor %vm803_vm13, %vm804_vm14 }
 0x141   :  { %v6285_v36 = vpop.f32.mrf.mxu2 }
 0x142   :  { %7723 = vst [vmem:[#allocation41_spill] sm:$0xff] %v6285_v36  ;;  %v6292_v30 = vpop.f32.mrf.mxu3  ;;  %v5350_v36 = vld [vmem:[#allocation4 + $0xc4] sm:$0xf] }
 0x143   :  { %7724 = vst [vmem:[#allocation42_spill] sm:$0xff] %v6292_v30  ;;  %v4351_v14 = vor.u32 %v5350_v36, %v4348_v20  ;;  %v4355_v30 = vor.u32 %v5353_v9, %v4354_v8  ;;  %v5346_v36 = vld [vmem:[#allocation4 + $0xa4] sm:$0xf]  ;;  %v4331_v20 = vor.u32 %v5348_v24, %v4330_v25  ;;  %v4332_v8 = vld [vmem:[#allocation4 + $0xb0] sm:$0xf0] }
 0x144   :  { %v4338_v9 = vld [vmem:[#allocation4 + $0xa8] sm:$0xf]  ;;  %v4335_v38 = vor.u32 %v5346_v36, %v4332_v8  ;;  %v747_v24 = vand.u32 2147483647, %v6269_v47  ;;  %v5342_v36 = vld [vmem:[#allocation4 + $0x84] sm:$0xf] }
 0x145   :  { %1068 = vmatpush.bf16.msra.mxu1 %v4351_v14  ;;  %1082 = vmatpush.bf16.msrb.mxu2 %v4355_v30  ;;  %v4339_v49 = vor.u32 %v5349_v15, %v4338_v9  ;;  %v4340_v14 = vld [vmem:[#allocation4 + $0xb8] sm:$0xf0]  ;;  %v6316_v30 = vmul.f32 %v6306_v48, %v6279_v46  ;;  %v756_v15 = vmul.f32 %v6281_v52, %v755_v41  ;;  %v4316_v9 = vld [vmem:[#allocation4 + $0x90] sm:$0xf0]  ;;  %v6328_v41 = vor.u32 1.1754944e-38, %v749_v16  ;;  %v444_v47 = vld [vmem:[%s7685_s9] sm:$0xff] }
 0x146   :  { %1055 = vmatpush.bf16.msra.mxu0 %v4331_v20  ;;  %v4343_v25 = vor.u32 %v5347_v0, %v4340_v14  ;;  %v4319_v20 = vor.u32 %v5342_v36, %v4316_v9  ;;  %v5338_v36 = vld [vmem:[#allocation4 + $0x64] sm:$0xf]  ;;  %v4300_v9 = vld [vmem:[#allocation4 + $0x70] sm:$0xf0]  ;;  %vm6346_vm8 = vcmp.eq.f32.partialorder %v747_v24, 8.507059e+37  ;;  %v742_v24 = vadd.f32 %v6287_v34, %v741_v61 }
 0x147   :  { %v757_v16 = vadd.f32 %v6281_v52, %v756_v15  ;;  %v4282_v14 = vld [vmem:[#allocation4 + $0x40] sm:$0xf]  ;;  %v4292_v61 = vld [vmem:[#allocation4 + $0x58] sm:$0xf0] }
 0x148   :  { %1097 = vmatpush.bf16.msrb.mxu3 %v4343_v25  ;;  %v4283_v13 = vor.u32 %v5336_v12, %v4282_v14 }
 0x149   :  { %v6312_v42 = vpop.f32.mrf.mxu2  ;;  %1069 = vmatpush.bf16.msra.mxu1 %v4335_v38  ;;  %1083 = vmatpush.bf16.msrb.mxu2 %v4339_v49  ;;  %v5343_v38 = vld [vmem:[#allocation4 + $0x8c] sm:$0xf]  ;;  %v4324_v49 = vld [vmem:[#allocation4 + $0x98] sm:$0xf0]  ;;  %v761_v12 = vsel %vm6342_vm7, %v6281_v52, %v757_v16 }
 0x14a   :  { %7725 = vst [vmem:[#allocation43_spill] sm:$0xff] %v6312_v42  ;;  %v6318_v28 = vpop.f32.mrf.mxu3  ;;  %v5344_v42 = vld [vmem:[#allocation4 + $0x8c] sm:$0xf0]  ;;  %v4327_v25 = vor.u32 %v5343_v38, %v4324_v49  ;;  %v5341_v38 = vld [vmem:[#allocation4 + $0x74] sm:$0xf0] }
 0x14b   :  { %7726 = vst [vmem:[#allocation44_spill] sm:$0xff] %v6318_v28  ;;  %v4315_v8 = vor.u32 %v5344_v42, %v4314_v26  ;;  %v5345_v28 = vld [vmem:[#allocation4 + $0x94] sm:$0xf0]  ;;  %v290_v42 = vadd.f32 %v6203_v43, %v6295_v37  ;;  %v339_v26 = vadd.f32 %v6205_v53, %v6302_v1  ;;  %v4306_v43 = vld [vmem:[#allocation4 + $0x68] sm:$0xf] }
 0x14c   :  { %v4323_v0 = vor.u32 %v5345_v28, %v4322_v5  ;;  %v4298_v5 = vld [vmem:[#allocation4 + $0x60] sm:$0xf]  ;;  %v5340_v28 = vld [vmem:[#allocation4 + $0x6c] sm:$0xf0]  ;;  %1098 = vmatpush.bf16.msrb.mxu3 %v4327_v25  ;;  %v4307_v49 = vor.u32 %v5341_v38, %v4306_v43  ;;  %v5339_v25 = vld [vmem:[#allocation4 + $0x6c] sm:$0xf] }
 0x14d   :  { %1056 = vmatpush.bf16.msra.mxu0 %v4315_v8  ;;  %1070 = vmatpush.bf16.msra.mxu1 %v4319_v20  ;;  %v4299_v8 = vor.u32 %v5340_v28, %v4298_v5  ;;  %v4308_v5 = vld [vmem:[#allocation4 + $0x78] sm:$0xf0]  ;;  %v5332_v43 = vld [vmem:[#allocation4 + $0x2c] sm:$0xf0]  ;;  %v5330_v38 = vld [vmem:[#allocation4 + $0x24] sm:$0xf] }
 0x14e   :  { %1084 = vmatpush.bf16.msrb.mxu2 %v4323_v0  ;;  %v4303_v0 = vor.u32 %v5338_v36, %v4300_v9  ;;  %v4311_v45 = vor.u32 %v5339_v25, %v4308_v5  ;;  %v4266_v9 = vld [vmem:[#allocation4 + $0x20] sm:$0xf]  ;;  %v5331_v16 = vld [vmem:[#allocation4 + $0x2c] sm:$0xf]  ;;  %v766_v25 = vsel %vm6350_vm9, %v6304_v29, %v761_v12  ;;  %v7735_v29 = vsub.f32 1.0, %v6310_v54 }
 0x14f   :  { %v4279_v5 = vor.u32 %v5331_v16, %v4276_v7  ;;  %v4260_v12 = vld [vmem:[#allocation4 + $0x18] sm:$0xf0]  ;;  %v792_v16 = vand.u32 2147483647, %v6277_v33 }
 0x150   :  { %1099 = vmatpush.bf16.msrb.mxu3 %v4311_v45  ;;  %v5326_v45 = vld [vmem:[#allocation4 + $0x4] sm:$0xf]  ;;  %v786_v15 = vmul.f32 %v6299_v22, %v7735_v29 }
 0x151   :  { %v687_v53 = vpop.f32.mrf.mxu2  ;;  %1057 = vmatpush.bf16.msra.mxu0 %v4299_v8  ;;  %1071 = vmatpush.bf16.msra.mxu1 %v4303_v0  ;;  %v4287_v8 = vor.u32 %v5334_v11, %v4284_v19  ;;  %v4268_v11 = vld [vmem:[#allocation4 + $0x30] sm:$0xf0]  ;;  %v746_v19 = vsel %vm6359_vm10, %v6287_v34, %v742_v24  ;;  %v4250_v0 = vld [vmem:[#allocation4] sm:$0xf]  ;;  %v341_v34 = vadd.f32 %v6209_v58, %v6302_v1  ;;  %vm793_vm1 = vcmp.eq.f32.partialorder %v792_v16, 8.507059e+37 }
 0x152   :  { %v708_v28 = vadd.f32 %v687_v53, %v290_v42  ;;  %v701_v63 = vpop.f32.mrf.mxu3  ;;  %1085 = vmatpush.bf16.msrb.mxu2 %v4307_v49  ;;  %v4267_v53 = vor.u32 %v5332_v43, %v4266_v9  ;;  %v292_v49 = vadd.f32 %v6207_v57, %v6295_v37  ;;  %v5329_v42 = vld [vmem:[#allocation4 + $0x14] sm:$0xf0]  ;;  %v751_v57 = vsel %vm6346_vm8, %v6328_v41, %v746_v19 }
 0x153   :  { %v709_v10 = vadd.f32 %v701_v63, %v339_v26  ;;  %v4291_v63 = vor.u32 %v5337_v6, %v4290_v18  ;;  %v5335_v26 = vld [vmem:[#allocation4 + $0x4c] sm:$0xf]  ;;  %v4274_v6 = vld [vmem:[#allocation4 + $0x28] sm:$0xf]  ;;  %v5333_v18 = vld [vmem:[#allocation4 + $0x34] sm:$0xf0]  ;;  %v830_v9 = vmul.f32 %v766_v25, %v444_v47  ;;  %v787_v47 = vadd.f32 %v6299_v22, %v786_v15 }
 0x154   :  { %v4244_v36 = vmul.f32 -1.442695, %v708_v28  ;;  %v4295_v14 = vor.u32 %v5335_v26, %v4292_v61  ;;  %v4275_v52 = vor.u32 %v5333_v18, %v4274_v6  ;;  %v5328_v28 = vld [vmem:[#allocation4 + $0xc] sm:$0xf0]  ;;  %v7736_v18 = vsub.f32 1.0, %v6316_v30 }
 0x155   :  { %5638 = vtanh.f32 %v709_v10  ;;  %1058 = vmatpush.bf16.msra.mxu0 %v4283_v13  ;;  %1072 = vmatpush.bf16.msra.mxu1 %v4287_v8  ;;  %v4271_v10 = vor.u32 %v5330_v38, %v4268_v11  ;;  %v4252_v13 = vld [vmem:[#allocation4 + $0x10] sm:$0xf0]  ;;  %v5327_v8 = vld [vmem:[#allocation4 + $0xc] sm:$0xf]  ;;  %v4251_v61 = vor.u32 %v5328_v28, %v4250_v0  ;;  %v809_v30 = vand.u32 2147483648, %v6279_v46 }
 0x156   :  { %5640 = vpow2.f32 %v4244_v36  ;;  %1086 = vmatpush.bf16.msrb.mxu2 %v4291_v63  ;;  %1100 = vmatpush.bf16.msrb.mxu3 %v4295_v14  ;;  %v4258_v36 = vld [vmem:[#allocation4 + $0x8] sm:$0xf]  ;;  %v4255_v58 = vor.u32 %v5326_v45, %v4252_v13  ;;  %v4263_v41 = vor.u32 %v5327_v8, %v4260_v12  ;;  %v801_v54 = vmul.f32 %v6306_v48, %v7736_v18 }
 0x157   :  { %v4259_v43 = vor.u32 %v5329_v42, %v4258_v36  ;;  %v807_v0 = vand.u32 2147483647, %v6279_v46  ;;  %v810_v45 = vor.u32 1.1754944e-38, %v809_v30  ;;  %v445_v42 = vld [vmem:[%s7685_s9 + $0x8] sm:$0xff] }
 0x158   :  { %v802_v7 = vadd.f32 %v6306_v48, %v801_v54 }
 0x159   :  { %v689_v24 = vpop.f32.mrf.mxu2  ;;  %1059 = vmatpush.bf16.msra.mxu0 %v4267_v53  ;;  %1073 = vmatpush.bf16.msra.mxu1 %v4271_v10  ;;  %v794_v10 = vand.u32 2147483648, %v6277_v33  ;;  %vm808_vm2 = vcmp.eq.f32.partialorder %v807_v0, 8.507059e+37 }
 0x15a   :  { %v712_v63 = vadd.f32 %v689_v24, %v292_v49  ;;  %v703_v26 = vpop.f32.mrf.mxu3  ;;  %1087 = vmatpush.bf16.msrb.mxu2 %v4275_v52  ;;  %1101 = vmatpush.bf16.msrb.mxu3 %v4279_v5  ;;  %v791_v5 = vsel %vm6397_vm15, %v6299_v22, %v787_v47  ;;  %v806_v33 = vsel %vm6404_vm0, %v6306_v48, %v802_v7 }
 0x15b   :  { %v5639_v14 = vpop.eup %5638  ;;  %v713_v20 = vadd.f32 %v703_v26, %v341_v34  ;;  %v795_v28 = vor.u32 1.1754944e-38, %v794_v10  ;;  %v811_v22 = vsel %vm808_vm2, %v810_v45, %v806_v33  ;;  %v5388_v45 = vld [vmem:[#allocation4 + $0xec] sm:$0xf0]  ;;  %v4498_v33 = vld [vmem:[#allocation4 + $0xf0] sm:$0xf0] }
 0x15c   :  { %v5641_v38 = vpop.eup %5640  ;;  %v832_v11 = vmul.f32 %v5639_v14, %v751_v57  ;;  %v4247_v6 = vmul.f32 -1.442695, %v712_v63  ;;  %v831_v29 = vmul.f32 %v811_v22, %v445_v42  ;;  %v4506_v22 = vld [vmem:[#allocation4 + $0xf8] sm:$0xf0] }
 0x15d   :  { %v734_v19 = vadd.f32 1.0, %v5641_v38  ;;  %1060 = vmatpush.bf16.msra.mxu0 %v4251_v61  ;;  %1074 = vmatpush.bf16.msra.mxu1 %v4255_v58  ;;  %v796_v8 = vsel %vm793_vm1, %v795_v28, %v791_v5  ;;  %v4496_v28 = vld [vmem:[#allocation4 + $0xe0] sm:$0xf] }
 0x15e   :  { %v6388_v53 = vadd.f32 %v832_v11, %v830_v9  ;;  %5642 = vpow2.f32 %v4247_v6  ;;  %1088 = vmatpush.bf16.msrb.mxu2 %v4259_v43  ;;  %1102 = vmatpush.bf16.msrb.mxu3 %v4263_v41 }
 0x15f   :  { %5644 = vrcp.f32 %v734_v19  ;;  %v779_v26 = vand.u32 2147483648, %v734_v19  ;;  %vm773_vm4 = vweird.f32 %v734_v19  ;;  %v777_v61 = vand.u32 2147483647, %v734_v19 }
 0x160   :  { %5646 = vtanh.f32 %v713_v20 }
 0x161   :  { %v780_v58 = vor.u32 1.1754944e-38, %v779_v26  ;;  %vm778_vm6 = vcmp.eq.f32.partialorder %v777_v61, 8.507059e+37  ;;  %v5382_v61 = vld [vmem:[#allocation4 + $0xc4] sm:$0xf] }
 0x164   :  { %v5643_v25 = vpop.eup %5642 }
 0x165   :  { %v5645_v13 = vpop.eup %5644  ;;  %v737_v34 = vadd.f32 1.0, %v5643_v25 }
 0x166   :  { %v5647_v46 = vpop.eup %5646  ;;  %v769_v24 = vmul.f32 %v5645_v13, %v734_v19  ;;  %vm774_vm3 = vweird.f32 %v5645_v13 }
 0x167   :  { %5648 = vrcp.f32 %v737_v34  ;;  %v833_v57 = vmul.f32 %v5647_v46, %v796_v8  ;;  %vm775_vm5 = vmor %vm773_vm4, %vm774_vm3  ;;  %v824_v38 = vand.u32 2147483648, %v737_v34  ;;  %v822_v20 = vand.u32 2147483647, %v737_v34  ;;  %v4504_v46 = vld [vmem:[#allocation4 + $0xe8] sm:$0xf] }
 0x168   :  { %v770_v36 = vsub.f32 1.0, %v769_v24  ;;  %5650 = vtanh.f32 %v6388_v53  ;;  %vm818_vm8 = vweird.f32 %v737_v34  ;;  %v5389_v24 = vld [vmem:[#allocation4 + $0xf4] sm:$0xf0]  ;;  %v5387_v8 = vld [vmem:[#allocation4 + $0xec] sm:$0xf] }
 0x169   :  { %v6418_v12 = vadd.f32 %v833_v57, %v831_v29  ;;  %v825_v19 = vor.u32 1.1754944e-38, %v824_v38  ;;  %vm823_vm10 = vcmp.eq.f32.partialorder %v822_v20, 8.507059e+37  ;;  %v4505_v42 = vor.u32 %v5389_v24, %v4504_v46  ;;  %v4480_v29 = vld [vmem:[#allocation4 + $0xc0] sm:$0xf]  ;;  %v5385_v38 = vld [vmem:[#allocation4 + $0xd4] sm:$0xf0] }
 0x16a   :  { %v771_v63 = vmul.f32 %v5645_v13, %v770_v36  ;;  %v4509_v57 = vor.u32 %v5387_v8, %v4506_v22  ;;  %v5383_v20 = vld [vmem:[#allocation4 + $0xcc] sm:$0xf] }
 0x16b   :  { %5652 = vtanh.f32 %v6418_v12  ;;  %1485 = vmatpush.bf16.msra.mxu2 %v4505_v42  ;;  %v5374_v42 = vld [vmem:[#allocation4 + $0x84] sm:$0xf] }
 0x16c   :  { %v772_v15 = vadd.f32 %v5645_v13, %v771_v63  ;;  %1499 = vmatpush.bf16.msra.mxu3 %v4509_v57 }
 0x16d   :  { %v5649_v48 = vpop.eup %5648 }
 0x16e   :  { %v814_v14 = vmul.f32 %v5649_v48, %v737_v34  ;;  %v776_v9 = vsel %vm775_vm5, %v5645_v13, %v772_v15  ;;  %vm819_vm7 = vweird.f32 %v5649_v48  ;;  %v5651_v41 = vpop.eup %5650  ;;  %v5386_v13 = vld [vmem:[#allocation4 + $0xe4] sm:$0xf]  ;;  %v4497_v34 = vor.u32 %v5388_v45, %v4496_v28  ;;  %v5384_v15 = vld [vmem:[#allocation4 + $0xcc] sm:$0xf0] }
 0x16f   :  { %v781_v11 = vsel %vm778_vm6, %v780_v58, %v776_v9  ;;  %vm820_vm9 = vmor %vm818_vm8, %vm819_vm7  ;;  %v4501_v36 = vor.u32 %v5386_v13, %v4498_v33  ;;  %v4481_v9 = vor.u32 %v5384_v15, %v4480_v29  ;;  %v4482_v58 = vld [vmem:[#allocation4 + $0xd0] sm:$0xf0]  ;;  %v199_v28 = vadd.f32 %v6153_v31, %v6106_v55  ;;  %v4456_v31 = vld [vmem:[#allocation4 + $0x88] sm:$0xf] }
 0x170   :  { %v815_v43 = vsub.f32 1.0, %v814_v14  ;;  %v838_v54 = vmul.f32 %v5651_v41, %v781_v11  ;;  %1457 = vmatpush.bf16.msrb.mxu0 %v4497_v34  ;;  %v4485_v11 = vor.u32 %v5382_v61, %v4482_v58  ;;  %v4490_v41 = vld [vmem:[#allocation4 + $0xd8] sm:$0xf0]  ;;  %v248_v45 = vadd.f32 %v6155_v32, %v6111_v56  ;;  %v5375_v61 = vld [vmem:[#allocation4 + $0x8c] sm:$0xf] }
 0x171   :  { %v5653_v47 = vpop.eup %5652  ;;  %1471 = vmatpush.bf16.msrb.mxu1 %v4501_v36  ;;  %v5376_v36 = vld [vmem:[#allocation4 + $0x8c] sm:$0xf0] }
 0x172   :  { %v816_v6 = vmul.f32 %v5649_v48, %v815_v43  ;;  %v840_v16 = vpack.c.bf16 %v838_v54, %v838_v54  ;;  %v4488_v43 = vld [vmem:[#allocation4 + $0xc8] sm:$0xf] }
 0x174   :  { %v817_v18 = vadd.f32 %v5649_v48, %v816_v6  ;;  %v889_v49 = vunpack.c.l.b16 %v840_v16  ;;  %v4489_v6 = vor.u32 %v5385_v38, %v4488_v43  ;;  %1458 = vmatpush.bf16.msrb.mxu0 %v4481_v9  ;;  %v5381_v16 = vld [vmem:[#allocation4 + $0xb4] sm:$0xf0] }
 0x175   :  { %1472 = vmatpush.bf16.msrb.mxu1 %v4485_v11 }
 0x176   :  { %v821_v30 = vsel %vm820_vm9, %v5649_v48, %v817_v18  ;;  %1486 = vmatpush.bf16.msra.mxu2 %v4489_v6 }
 0x177   :  { %v826_v10 = vsel %vm823_vm10, %v825_v19, %v821_v30  ;;  %v4493_v19 = vor.u32 %v5383_v20, %v4490_v41  ;;  %v4464_v30 = vld [vmem:[#allocation4 + $0xa0] sm:$0xf]  ;;  %v5372_v41 = vld [vmem:[#allocation4 + $0x6c] sm:$0xf0] }
 0x178   :  { %v839_v52 = vmul.f32 %v5653_v47, %v826_v10  ;;  %v5380_v47 = vld [vmem:[#allocation4 + $0xac] sm:$0xf0]  ;;  %v4466_v10 = vld [vmem:[#allocation4 + $0xb0] sm:$0xf0]  ;;  %v4432_v20 = vld [vmem:[#allocation4 + $0x60] sm:$0xf] }
 0x179   :  { %1500 = vmatpush.bf16.msra.mxu3 %v4493_v19  ;;  %v4433_v19 = vor.u32 %v5372_v41, %v4432_v20 }
 0x17a   :  { %v841_v7 = vpack.c.bf16 %v839_v52, %v839_v52  ;;  %v5577_v0 = vpack.c.bf16 %v839_v52, %v838_v54  ;;  %v4472_v52 = vld [vmem:[#allocation4 + $0xa8] sm:$0xf] }
 0x17c   :  { %5578 = vst [vmem:[#allocation3 + $0x30] sm:$0xff] %v5577_v0   ;;  %v890_v25 = vunpack.c.l.b16 %v841_v7  ;;  %v295_v7 = vadd.f32 %v6211_v59, %v6295_v37  ;;  %v4448_v59 = vld [vmem:[#allocation4 + $0x80] sm:$0xf] }
 0x17d   :  { %v4449_v57 = vor.u32 %v5376_v36, %v4448_v59 }
 0x17e   :  { %v891_v5 = vpack.c.b16 %v890_v25, %v889_v49  ;;  %v4473_v49 = vor.u32 %v5381_v16, %v4472_v52  ;;  %v5379_v25 = vld [vmem:[#allocation4 + $0xac] sm:$0xf]  ;;  %v4440_v52 = vld [vmem:[#allocation4 + $0x68] sm:$0xf]  ;;  %v5373_v16 = vld [vmem:[#allocation4 + $0x74] sm:$0xf0] }
 0x180   :  { %1061 = vmatmul.bf16.vlgmr.msra.gmra.mxu0 %v891_v5  ;;  %1075 = vmatmul.bf16.vlgmr.msra.gmra.mxu1 %v891_v5 }
 0x181   :  { %1089 = vmatmul.bf16.vlgmr.msrb.gmra.mxu2 %v891_v5  ;;  %1103 = vmatmul.bf16.vlgmr.msrb.gmra.mxu3 %v891_v5  ;;  %v4474_v5 = vld [vmem:[#allocation4 + $0xb8] sm:$0xf0] }
 0x182   :  { %v4477_v34 = vor.u32 %v5379_v25, %v4474_v5  ;;  %1487 = vmatpush.bf16.msra.mxu2 %v4473_v49  ;;  %v4416_v25 = vld [vmem:[#allocation4 + $0x40] sm:$0xf]  ;;  %v5368_v5 = vld [vmem:[#allocation4 + $0x4c] sm:$0xf0] }
 0x184   :  { %1501 = vmatpush.bf16.msra.mxu3 %v4477_v34  ;;  %v4417_v34 = vor.u32 %v5368_v5, %v4416_v25 }
 0x1fd   :  { %v1062_v63 = vpop.f32.mrf.mxu0  ;;  %v1076_v26 = vpop.f32.mrf.mxu1 }
 0x1fe   :  { %v1109_v48 = vadd.f32 %v1062_v63, %v6144_v27  ;;  %v1110_v14 = vadd.f32 %v1076_v26, %v6147_v21  ;;  %v5378_v27 = vld [vmem:[#allocation4 + $0xa4] sm:$0xf]  ;;  %v4465_v21 = vor.u32 %v5380_v47, %v4464_v30  ;;  %v4450_v63 = vld [vmem:[#allocation4 + $0x90] sm:$0xf0]  ;;  %v5377_v26 = vld [vmem:[#allocation4 + $0x94] sm:$0xf0]  ;;  %v297_v30 = vadd.f32 %v6215_v62, %v6295_v37 }
 0x1ff   :  { %v4469_v0 = vor.u32 %v5378_v27, %v4466_v10  ;;  %v4453_v32 = vor.u32 %v5374_v42, %v4450_v63  ;;  %v4457_v15 = vor.u32 %v5377_v26, %v4456_v31  ;;  %v5370_v47 = vld [vmem:[#allocation4 + $0x64] sm:$0xf]  ;;  %v4434_v27 = vld [vmem:[#allocation4 + $0x70] sm:$0xf0]  ;;  %v4424_v42 = vld [vmem:[#allocation4 + $0x48] sm:$0xf] }
 0x200   :  { %v4376_v18 = vmul.f32 -1.442695, %v1109_v48  ;;  %v4377_v54 = vmul.f32 -1.442695, %v1110_v14  ;;  %1459 = vmatpush.bf16.msrb.mxu0 %v4465_v21  ;;  %v4458_v48 = vld [vmem:[#allocation4 + $0x98] sm:$0xf0]  ;;  %v4437_v49 = vor.u32 %v5370_v47, %v4434_v27 }
 0x201   :  { %1473 = vmatpush.bf16.msrb.mxu1 %v4469_v0  ;;  %v4461_v43 = vor.u32 %v5375_v61, %v4458_v48  ;;  %1488 = vmatpush.bf16.msra.mxu2 %v4457_v15  ;;  %v4442_v0 = vld [vmem:[#allocation4 + $0x78] sm:$0xf0]  ;;  %v346_v61 = vadd.f32 %v6217_v17, %v6302_v1 }
 0x202   :  { %5654 = vpow2.f32 %v4376_v18  ;;  %v344_v18 = vadd.f32 %v6213_v60, %v6302_v1 }
 0x203   :  { %5656 = vpow2.f32 %v4377_v54  ;;  %1502 = vmatpush.bf16.msra.mxu3 %v4461_v43 }
 0x204   :  { %v1090_v13 = vpop.f32.mrf.mxu2  ;;  %1460 = vmatpush.bf16.msrb.mxu0 %v4449_v57  ;;  %v1104_v6 = vpop.f32.mrf.mxu3 }
 0x205   :  { %v1111_v33 = vadd.f32 %v1090_v13, %v295_v7  ;;  %v1064_v46 = vpop.f32.mrf.mxu0  ;;  %v1078_v24 = vpop.f32.mrf.mxu1  ;;  %1474 = vmatpush.bf16.msrb.mxu1 %v4453_v32  ;;  %v1112_v21 = vadd.f32 %v1104_v6, %v344_v18  ;;  %v5371_v7 = vld [vmem:[#allocation4 + $0x6c] sm:$0xf]  ;;  %v4426_v32 = vld [vmem:[#allocation4 + $0x58] sm:$0xf0]  ;;  %v4400_v18 = vld [vmem:[#allocation4 + $0x20] sm:$0xf] }
 0x206   :  { %v1113_v8 = vadd.f32 %v1064_v46, %v199_v28  ;;  %v1114_v22 = vadd.f32 %v1078_v24, %v248_v45  ;;  %v4441_v45 = vor.u32 %v5373_v16, %v4440_v52  ;;  %v4445_v13 = vor.u32 %v5371_v7, %v4442_v0  ;;  %v4418_v46 = vld [vmem:[#allocation4 + $0x50] sm:$0xf0] }
 0x207   :  { %v4378_v29 = vmul.f32 -1.442695, %v1111_v33  ;;  %v5366_v33 = vld [vmem:[#allocation4 + $0x44] sm:$0xf] }
 0x208   :  { %v5655_v14 = vpop.eup %5654  ;;  %v4379_v9 = vmul.f32 -1.442695, %v1113_v8  ;;  %v4380_v58 = vmul.f32 -1.442695, %v1114_v22  ;;  %1461 = vmatpush.bf16.msrb.mxu0 %v4433_v19  ;;  %v4421_v36 = vor.u32 %v5366_v33, %v4418_v46  ;;  %v5369_v8 = vld [vmem:[#allocation4 + $0x54] sm:$0xf0]  ;;  %1489 = vmatpush.bf16.msra.mxu2 %v4441_v45 }
 0x209   :  { %v5657_v38 = vpop.eup %5656  ;;  %v6429_v11 = vadd.f32 1.0, %v5655_v14  ;;  %5658 = vpow2.f32 %v4378_v29  ;;  %1475 = vmatpush.bf16.msrb.mxu1 %v4437_v49  ;;  %1503 = vmatpush.bf16.msra.mxu3 %v4445_v13  ;;  %v4425_v63 = vor.u32 %v5369_v8, %v4424_v42  ;;  %v5367_v29 = vld [vmem:[#allocation4 + $0x4c] sm:$0xf]  ;;  %v5364_v19 = vld [vmem:[#allocation4 + $0x2c] sm:$0xf0] }
 0x20a   :  { %v6433_v54 = vadd.f32 1.0, %v5657_v38  ;;  %5660 = vpow2.f32 %v4379_v9  ;;  %v4429_v17 = vor.u32 %v5367_v29, %v4426_v32  ;;  %v4401_v49 = vor.u32 %v5364_v19, %v4400_v18  ;;  %v5362_v13 = vld [vmem:[#allocation4 + $0x24] sm:$0xf]  ;;  %v4408_v33 = vld [vmem:[#allocation4 + $0x28] sm:$0xf] }
 0x20b   :  { %5662 = vrcp.f32 %v6429_v11  ;;  %v1150_v14 = vand.u32 2147483647, %v6429_v11  ;;  %vm1146_vm11 = vweird.f32 %v6429_v11  ;;  %v5365_v42 = vld [vmem:[#allocation4 + $0x34] sm:$0xf0]  ;;  %v5363_v8 = vld [vmem:[#allocation4 + $0x2c] sm:$0xf] }
 0x20c   :  { %5664 = vrcp.f32 %v6433_v54  ;;  %v1092_v10 = vpop.f32.mrf.mxu2  ;;  %1462 = vmatpush.bf16.msrb.mxu0 %v4417_v34  ;;  %v1165_v43 = vand.u32 2147483647, %v6433_v54  ;;  %v1106_v6 = vpop.f32.mrf.mxu3  ;;  %v1167_v41 = vand.u32 2147483648, %v6433_v54  ;;  %1490 = vmatpush.bf16.msra.mxu2 %v4425_v63  ;;  %vm1161_vm12 = vweird.f32 %v6433_v54  ;;  %v4402_v34 = vld [vmem:[#allocation4 + $0x30] sm:$0xf0] }
 0x20d   :  { %5666 = vpow2.f32 %v4380_v58  ;;  %v1115_v60 = vadd.f32 %v1092_v10, %v297_v30  ;;  %v1152_v58 = vand.u32 2147483648, %v6429_v11  ;;  %1476 = vmatpush.bf16.msrb.mxu1 %v4421_v36  ;;  %vm6468_vm15 = vcmp.eq.f32.partialorder %v1150_v14, 8.507059e+37  ;;  %1504 = vmatpush.bf16.msra.mxu3 %v4429_v17  ;;  %v5360_v29 = vld [vmem:[#allocation4 + $0xc] sm:$0xf0]  ;;  %v5361_v17 = vld [vmem:[#allocation4 + $0x14] sm:$0xf0] }
 0x20e   :  { %5668 = vtanh.f32 %v1112_v21  ;;  %v1116_v52 = vadd.f32 %v1106_v6, %v346_v61  ;;  %v1168_v5 = vor.u32 1.1754944e-38, %v1167_v41  ;;  %vm6486_vm1 = vcmp.eq.f32.partialorder %v1165_v43, 8.507059e+37  ;;  %v4392_v41 = vld [vmem:[#allocation4 + $0x8] sm:$0xf] }
 0x20f   :  { %v5659_v28 = vpop.eup %5658  ;;  %v4381_v62 = vmul.f32 -1.442695, %v1115_v60  ;;  %v1153_v7 = vor.u32 1.1754944e-38, %v1152_v58  ;;  %v4386_v58 = vld [vmem:[#allocation4 + $0x10] sm:$0xf0]  ;;  %v4405_v19 = vor.u32 %v5362_v13, %v4402_v34 }
 0x210   :  { %v5661_v24 = vpop.eup %5660  ;;  %v6439_v59 = vadd.f32 1.0, %v5659_v28  ;;  %1463 = vmatpush.bf16.msrb.mxu0 %v4401_v49 }
 0x211   :  { %v6441_v22 = vpop.eup %5662  ;;  %v6443_v57 = vadd.f32 1.0, %v5661_v24  ;;  %5670 = vpow2.f32 %v4381_v62  ;;  %1477 = vmatpush.bf16.msrb.mxu1 %v4405_v19 }
 0x212   :  { %v6445_v31 = vpop.eup %5664  ;;  %v1142_v26 = vmul.f32 %v6441_v22, %v6429_v11  ;;  %5672 = vrcp.f32 %v6439_v59  ;;  %vm1147_vm13 = vweird.f32 %v6441_v22 }
 0x213   :  { %v5667_v15 = vpop.eup %5666  ;;  %v1157_v48 = vmul.f32 %v6445_v31, %v6433_v54  ;;  %5674 = vrcp.f32 %v6443_v57  ;;  %vm1162_vm14 = vweird.f32 %v6445_v31  ;;  %vm1148_vm0 = vmor %vm1146_vm11, %vm1147_vm13  ;;  %v1195_v36 = vand.u32 2147483647, %v6443_v57 }
 0x214   :  { %v1143_v9 = vsub.f32 1.0, %v1142_v26  ;;  %v6458_v38 = vadd.f32 1.0, %v5667_v15  ;;  %v5669_v30 = vpop.eup %5668  ;;  %vm6494_vm2 = vmor %vm1161_vm12, %vm1162_vm14  ;;  %vm1191_vm3 = vweird.f32 %v6443_v57  ;;  %v4384_v26 = vld [vmem:[#allocation4] sm:$0xf]  ;;  %v1197_v14 = vand.u32 2147483648, %v6443_v57 }
 0x215   :  { %v1158_v20 = vsub.f32 1.0, %v1157_v48  ;;  %v4385_v10 = vor.u32 %v5360_v29, %v4384_v26  ;;  %vm1196_vm7 = vcmp.eq.f32.partialorder %v1195_v36, 8.507059e+37  ;;  %vm1176_vm12 = vweird.f32 %v6439_v59 }
 0x216   :  { %v1144_v47 = vmul.f32 %v6441_v22, %v1143_v9  ;;  %5676 = vrcp.f32 %v6458_v38  ;;  %v5358_v9 = vld [vmem:[#allocation4 + $0x4] sm:$0xf]  ;;  %v1198_v49 = vor.u32 1.1754944e-38, %v1197_v14  ;;  %v1210_v34 = vand.u32 2147483647, %v6458_v38 }
 0x217   :  { %v5671_v27 = vpop.eup %5670  ;;  %v1159_v21 = vmul.f32 %v6445_v31, %v1158_v20  ;;  %v1212_v20 = vand.u32 2147483648, %v6458_v38  ;;  %1464 = vmatpush.bf16.msrb.mxu0 %v4385_v10  ;;  %vm1206_vm8 = vweird.f32 %v6458_v38  ;;  %v1180_v29 = vand.u32 2147483647, %v6439_v59 }
 0x218   :  { %v6472_v16 = vpop.eup %5672  ;;  %v1145_v60 = vadd.f32 %v6441_v22, %v1144_v47  ;;  %v6475_v0 = vadd.f32 1.0, %v5671_v27  ;;  %vm1211_vm10 = vcmp.eq.f32.partialorder %v1210_v34, 8.507059e+37  ;;  %v300_v34 = vadd.f32 %v6219_v2, %v6295_v37  ;;  %v4614_v2 = vld [vmem:[#allocation4 + $0xc0] sm:$0xf] }
 0x219   :  { %v6477_v25 = vpop.eup %5674  ;;  %v1172_v28 = vmul.f32 %v6472_v16, %v6439_v59  ;;  %v1160_v62 = vadd.f32 %v6445_v31, %v1159_v21  ;;  %vm1177_vm11 = vweird.f32 %v6472_v16 }
 0x21a   :  { %v1149_v11 = vsel %vm1148_vm0, %v6441_v22, %v1145_v60  ;;  %v1187_v24 = vmul.f32 %v6477_v25, %v6443_v57  ;;  %5678 = vrcp.f32 %v6475_v0  ;;  %v4410_v22 = vld [vmem:[#allocation4 + $0x38] sm:$0xf0]  ;;  %vm1192_vm4 = vweird.f32 %v6477_v25  ;;  %vm1178_vm13 = vmor %vm1176_vm12, %vm1177_vm11 }
 0x21b   :  { %v1154_v63 = vsel %vm6468_vm15, %v1153_v7, %v1149_v11  ;;  %v1164_v54 = vsel %vm6494_vm2, %v6445_v31, %v1160_v62  ;;  %5680 = vtanh.f32 %v1116_v52  ;;  %v1173_v43 = vsub.f32 1.0, %v1172_v28  ;;  %v5359_v52 = vld [vmem:[#allocation4 + $0xc] sm:$0xf]  ;;  %v4394_v60 = vld [vmem:[#allocation4 + $0x18] sm:$0xf0]  ;;  %vm1193_vm5 = vmor %vm1191_vm3, %vm1192_vm4 }
 0x21c   :  { %v5677_v32 = vpop.eup %5676  ;;  %v1169_v15 = vsel %vm6486_vm1, %v1168_v5, %v1164_v54  ;;  %v1235_v61 = vmul.f32 %v5669_v30, %v1154_v63  ;;  %v1188_v48 = vsub.f32 1.0, %v1187_v24  ;;  %v4409_v30 = vor.u32 %v5365_v42, %v4408_v33 }
 0x21d   :  { %v1233_v6 = vmul.f32 %v1169_v15, %v6388_v53  ;;  %v1202_v31 = vmul.f32 %v5677_v32, %v6458_v38  ;;  %v4413_v21 = vor.u32 %v5363_v8, %v4410_v22  ;;  %v4389_v5 = vor.u32 %v5358_v9, %v4386_v58 }
 0x21e   :  { %v1189_v18 = vmul.f32 %v6477_v25, %v1188_v48  ;;  %1491 = vmatpush.bf16.msra.mxu2 %v4409_v30  ;;  %v4393_v28 = vor.u32 %v5361_v17, %v4392_v41  ;;  %vm1207_vm6 = vweird.f32 %v5677_v32  ;;  %v1174_v33 = vmul.f32 %v6472_v16, %v1173_v43 }
 0x21f   :  { %v6517_v47 = vadd.f32 %v1235_v61, %v1233_v6  ;;  %v1203_v27 = vsub.f32 1.0, %v1202_v31  ;;  %1505 = vmatpush.bf16.msra.mxu3 %v4413_v21  ;;  %v4397_v11 = vor.u32 %v5359_v52, %v4394_v60  ;;  %vm1208_vm9 = vmor %vm1206_vm8, %vm1207_vm6  ;;  %v1213_v63 = vor.u32 1.1754944e-38, %v1212_v20  ;;  %1478 = vmatpush.bf16.msrb.mxu1 %v4389_v5  ;;  %v5418_v5 = vld [vmem:[#allocation4 + $0xe4] sm:$0xf] }
 0x220   :  { %v5679_v53 = vpop.eup %5678  ;;  %v1190_v7 = vadd.f32 %v6477_v25, %v1189_v18  ;;  %v1175_v22 = vadd.f32 %v6472_v16, %v1174_v33  ;;  %v1182_v38 = vand.u32 2147483648, %v6439_v59  ;;  %v1227_v9 = vand.u32 2147483648, %v6475_v0 }
 0x221   :  { %v5681_v62 = vpop.eup %5680  ;;  %v1204_v45 = vmul.f32 %v5677_v32, %v1203_v27  ;;  %v1217_v13 = vmul.f32 %v5679_v53, %v6475_v0  ;;  %5682 = vtanh.f32 %v6517_v47  ;;  %vm1222_vm14 = vweird.f32 %v5679_v53 }
 0x222   :  { %v1194_v46 = vsel %vm1193_vm5, %v6477_v25, %v1190_v7  ;;  %1492 = vmatpush.bf16.msra.mxu2 %v4393_v28  ;;  %v1183_v14 = vor.u32 1.1754944e-38, %v1182_v38  ;;  %vm1221_vm15 = vweird.f32 %v6475_v0  ;;  %vm1181_vm0 = vcmp.eq.f32.partialorder %v1180_v29, 8.507059e+37  ;;  %v4630_v7 = vld [vmem:[#allocation4 + $0xe0] sm:$0xf]  ;;  %v4616_v29 = vld [vmem:[#allocation4 + $0xd0] sm:$0xf0] }
 0x223   :  { %v1218_v24 = vsub.f32 1.0, %v1217_v13  ;;  %v1199_v42 = vsel %vm1196_vm7, %v1198_v49, %v1194_v46  ;;  %v1205_v8 = vadd.f32 %v5677_v32, %v1204_v45  ;;  %1506 = vmatpush.bf16.msra.mxu3 %v4397_v11  ;;  %vm1223_vm1 = vmor %vm1221_vm15, %vm1222_vm14  ;;  %v1228_v6 = vor.u32 1.1754944e-38, %v1227_v9  ;;  %v5420_v49 = vld [vmem:[#allocation4 + $0xec] sm:$0xf0]  ;;  %v4638_v45 = vld [vmem:[#allocation4 + $0xe8] sm:$0xf] }
 0x224   :  { %v1236_v54 = vmul.f32 %v5681_v62, %v1199_v42  ;;  %v4631_v28 = vor.u32 %v5420_v49, %v4630_v7  ;;  %v4632_v62 = vld [vmem:[#allocation4 + $0xf0] sm:$0xf0]  ;;  %v5421_v13 = vld [vmem:[#allocation4 + $0xf4] sm:$0xf0]  ;;  %v5419_v11 = vld [vmem:[#allocation4 + $0xec] sm:$0xf] }
 0x225   :  { %v1209_v57 = vsel %vm1208_vm9, %v5677_v32, %v1205_v8  ;;  %v1219_v25 = vmul.f32 %v5679_v53, %v1218_v24  ;;  %v1179_v32 = vsel %vm1178_vm13, %v6472_v16, %v1175_v22  ;;  %v4635_v33 = vor.u32 %v5418_v5, %v4632_v62  ;;  %v4624_v9 = vld [vmem:[#allocation4 + $0xd8] sm:$0xf0]  ;;  %v4582_v5 = vld [vmem:[#allocation4 + $0x80] sm:$0xf] }
 0x226   :  { %v1214_v36 = vsel %vm1211_vm10, %v1213_v63, %v1209_v57  ;;  %v1184_v59 = vsel %vm1181_vm0, %v1183_v14, %v1179_v32  ;;  %v4639_v46 = vor.u32 %v5421_v13, %v4638_v45  ;;  %v253_v24 = vadd.f32 %v6179_v44, %v6111_v56  ;;  %1861 = vmatpush.bf16.msra.mxu0 %v4631_v28  ;;  %v5417_v32 = vld [vmem:[#allocation4 + $0xd4] sm:$0xf0]  ;;  %v5415_v14 = vld [vmem:[#allocation4 + $0xcc] sm:$0xf]  ;;  %v4608_v7 = vld [vmem:[#allocation4 + $0xb8] sm:$0xf0] }
 0x227   :  { %v1234_v26 = vmul.f32 %v1214_v36, %v6418_v12  ;;  %v1220_v61 = vadd.f32 %v5679_v53, %v1219_v25  ;;  %v5683_v48 = vpop.eup %5682  ;;  %v1225_v12 = vand.u32 2147483647, %v6475_v0  ;;  %1875 = vmatpush.bf16.msra.mxu1 %v4635_v33  ;;  %v5416_v25 = vld [vmem:[#allocation4 + $0xcc] sm:$0xf0]  ;;  %v5414_v36 = vld [vmem:[#allocation4 + $0xc4] sm:$0xf] }
 0x228   :  { %v1241_v43 = vmul.f32 %v5683_v48, %v1184_v59  ;;  %1889 = vmatpush.bf16.msrb.mxu2 %v4639_v46  ;;  %v4619_v44 = vor.u32 %v5414_v36, %v4616_v29  ;;  %v5408_v28 = vld [vmem:[#allocation4 + $0x8c] sm:$0xf0]  ;;  %v5406_v33 = vld [vmem:[#allocation4 + $0x84] sm:$0xf]  ;;  %v4584_v46 = vld [vmem:[#allocation4 + $0x90] sm:$0xf0] }
 0x229   :  { %v6536_v15 = vadd.f32 %v1236_v54, %v1234_v26  ;;  %v1224_v58 = vsel %vm1223_vm1, %v5679_v53, %v1220_v61  ;;  %vm1226_vm2 = vcmp.eq.f32.partialorder %v1225_v12, 8.507059e+37  ;;  %v4615_v26 = vor.u32 %v5416_v25, %v4614_v2 }
 0x22a   :  { %v1229_v16 = vsel %vm1226_vm2, %v1228_v6, %v1224_v58  ;;  %v1243_v41 = vpack.c.bf16 %v1241_v43, %v1241_v43  ;;  %v4627_v6 = vor.u32 %v5415_v14, %v4624_v9  ;;  %v351_v2 = vadd.f32 %v6225_v4, %v6302_v1 }
 0x22b   :  { %5684 = vtanh.f32 %v6536_v15  ;;  %1862 = vmatpush.bf16.msra.mxu0 %v4615_v26  ;;  %1876 = vmatpush.bf16.msra.mxu1 %v4619_v44  ;;  %v4592_v26 = vld [vmem:[#allocation4 + $0x98] sm:$0xf0] }
 0x22c   :  { %v1293_v19 = vunpack.c.l.b16 %v1243_v41  ;;  %v5412_v41 = vld [vmem:[#allocation4 + $0xac] sm:$0xf0] }
 0x231   :  { %v5685_v31 = vpop.eup %5684 }
 0x232   :  { %v1242_v20 = vmul.f32 %v5685_v31, %v1229_v16 }
 0x234   :  { %v1244_v17 = vpack.c.bf16 %v1242_v20, %v1242_v20  ;;  %v5582_v18 = vpack.c.bf16 %v1242_v20, %v1241_v43  ;;  %v4598_v20 = vld [vmem:[#allocation4 + $0xa0] sm:$0xf] }
 0x236   :  { %5583 = vst [vmem:[#allocation3] sm:$0xff] %v5582_v18   ;;  %v1294_v30 = vunpack.c.l.b16 %v1244_v17  ;;  %v349_v17 = vadd.f32 %v6221_v3, %v6302_v1 }
 0x238   :  { %v1295_v27 = vpack.c.b16 %v1294_v30, %v1293_v19  ;;  %v4599_v19 = vor.u32 %v5412_v41, %v4598_v20  ;;  %v302_v30 = vadd.f32 %v6223_v35, %v6295_v37 }
 0x23a   :  { %1465 = vmatmul.bf16.vlgmr.msrb.gmra.mxu0 %v1295_v27  ;;  %1479 = vmatmul.bf16.vlgmr.msrb.gmra.mxu1 %v1295_v27 }
 0x23b   :  { %1493 = vmatmul.bf16.vlgmr.msra.gmra.mxu2 %v1295_v27  ;;  %1507 = vmatmul.bf16.vlgmr.msra.gmra.mxu3 %v1295_v27  ;;  %v5410_v27 = vld [vmem:[#allocation4 + $0xa4] sm:$0xf] }
 0x23c   :  { %1863 = vmatpush.bf16.msra.mxu0 %v4599_v19 }
 0x2b7   :  { %v1466_v0 = vpop.f32.mrf.mxu0  ;;  %v1480_v21 = vpop.f32.mrf.mxu1 }
 0x2b8   :  { %v1513_v10 = vadd.f32 %v1466_v0, %v6168_v39  ;;  %v1514_v52 = vadd.f32 %v1480_v21, %v6171_v40  ;;  %v4640_v39 = vld [vmem:[#allocation4 + $0xf8] sm:$0xf0]  ;;  %v204_v40 = vadd.f32 %v6177_v23, %v6106_v55  ;;  %v4622_v23 = vld [vmem:[#allocation4 + $0xc8] sm:$0xf]  ;;  %v4600_v0 = vld [vmem:[#allocation4 + $0xb0] sm:$0xf0] }
 0x2b9   :  { %v4643_v8 = vor.u32 %v5419_v11, %v4640_v39  ;;  %v4623_v48 = vor.u32 %v5417_v32, %v4622_v23  ;;  %v4603_v49 = vor.u32 %v5410_v27, %v4600_v0 }
 0x2ba   :  { %v4510_v60 = vmul.f32 -1.442695, %v1513_v10  ;;  %v4511_v53 = vmul.f32 -1.442695, %v1514_v52  ;;  %v4606_v52 = vld [vmem:[#allocation4 + $0xa8] sm:$0xf] }
 0x2bb   :  { %1903 = vmatpush.bf16.msrb.mxu3 %v4643_v8  ;;  %1890 = vmatpush.bf16.msrb.mxu2 %v4623_v48 }
 0x2bc   :  { %5686 = vpow2.f32 %v4510_v60  ;;  %v5413_v60 = vld [vmem:[#allocation4 + $0xb4] sm:$0xf0]  ;;  %1877 = vmatpush.bf16.msra.mxu1 %v4603_v49  ;;  %v5402_v49 = vld [vmem:[#allocation4 + $0x64] sm:$0xf] }
 0x2bd   :  { %5688 = vpow2.f32 %v4511_v53  ;;  %v5411_v53 = vld [vmem:[#allocation4 + $0xac] sm:$0xf]  ;;  %v4607_v45 = vor.u32 %v5413_v60, %v4606_v52 }
 0x2be   :  { %v1494_v42 = vpop.f32.mrf.mxu2  ;;  %v1508_v59 = vpop.f32.mrf.mxu3  ;;  %v4611_v13 = vor.u32 %v5411_v53, %v4608_v7  ;;  %v5397_v7 = vld [vmem:[#allocation4 + $0x34] sm:$0xf0] }
 0x2bf   :  { %v1515_v63 = vadd.f32 %v1494_v42, %v300_v34  ;;  %v1468_v57 = vpop.f32.mrf.mxu0  ;;  %v1482_v54 = vpop.f32.mrf.mxu1  ;;  %1904 = vmatpush.bf16.msrb.mxu3 %v4627_v6  ;;  %v1516_v21 = vadd.f32 %v1508_v59, %v349_v17  ;;  %v4583_v34 = vor.u32 %v5408_v28, %v4582_v5  ;;  %v5409_v42 = vld [vmem:[#allocation4 + $0x94] sm:$0xf0]  ;;  %1891 = vmatpush.bf16.msrb.mxu2 %v4607_v45  ;;  %v4566_v59 = vld [vmem:[#allocation4 + $0x60] sm:$0xf]  ;;  %v4568_v5 = vld [vmem:[#allocation4 + $0x70] sm:$0xf0] }
 0x2c0   :  { %v1517_v22 = vadd.f32 %v1468_v57, %v204_v40  ;;  %v1518_v38 = vadd.f32 %v1482_v54, %v253_v24  ;;  %v4587_v40 = vor.u32 %v5406_v33, %v4584_v46  ;;  %v4590_v24 = vld [vmem:[#allocation4 + $0x88] sm:$0xf] }
 0x2c1   :  { %v4512_v61 = vmul.f32 -1.442695, %v1515_v63  ;;  %v4591_v57 = vor.u32 %v5409_v42, %v4590_v24  ;;  %1864 = vmatpush.bf16.msra.mxu0 %v4583_v34  ;;  %v4574_v28 = vld [vmem:[#allocation4 + $0x68] sm:$0xf]  ;;  %v5403_v34 = vld [vmem:[#allocation4 + $0x6c] sm:$0xf] }
 0x2c2   :  { %v5687_v12 = vpop.eup %5686  ;;  %v4513_v58 = vmul.f32 -1.442695, %v1517_v22  ;;  %v4514_v43 = vmul.f32 -1.442695, %v1518_v38  ;;  %v5407_v38 = vld [vmem:[#allocation4 + $0x8c] sm:$0xf]  ;;  %1878 = vmatpush.bf16.msra.mxu1 %v4587_v40 }
 0x2c3   :  { %v5689_v31 = vpop.eup %5688  ;;  %v6551_v16 = vadd.f32 1.0, %v5687_v12  ;;  %5690 = vpow2.f32 %v4512_v61  ;;  %1905 = vmatpush.bf16.msrb.mxu3 %v4611_v13  ;;  %1892 = vmatpush.bf16.msrb.mxu2 %v4591_v57  ;;  %v4595_v12 = vor.u32 %v5407_v38, %v4592_v26  ;;  %v5405_v13 = vld [vmem:[#allocation4 + $0x74] sm:$0xf0]  ;;  %v4576_v40 = vld [vmem:[#allocation4 + $0x78] sm:$0xf0] }
 0x2c4   :  { %v6555_v18 = vadd.f32 1.0, %v5689_v31  ;;  %5692 = vpow2.f32 %v4513_v58  ;;  %v5404_v58 = vld [vmem:[#allocation4 + $0x6c] sm:$0xf0]  ;;  %v4550_v24 = vld [vmem:[#allocation4 + $0x40] sm:$0xf] }
 0x2c5   :  { %5694 = vrcp.f32 %v6551_v16  ;;  %v1554_v36 = vand.u32 2147483647, %v6551_v16  ;;  %vm1550_vm3 = vweird.f32 %v6551_v16  ;;  %v1556_v32 = vand.u32 2147483648, %v6551_v16  ;;  %v4552_v26 = vld [vmem:[#allocation4 + $0x50] sm:$0xf0] }
 0x2c6   :  { %5696 = vrcp.f32 %v6555_v18  ;;  %v1496_v10 = vpop.f32.mrf.mxu2  ;;  %v1510_v22 = vpop.f32.mrf.mxu3  ;;  %vm1565_vm4 = vweird.f32 %v6555_v18  ;;  %v1569_v61 = vand.u32 2147483647, %v6555_v18  ;;  %v1571_v14 = vand.u32 2147483648, %v6555_v18  ;;  %v5396_v31 = vld [vmem:[#allocation4 + $0x2c] sm:$0xf0] }
 0x2c7   :  { %5698 = vpow2.f32 %v4514_v43  ;;  %v1519_v3 = vadd.f32 %v1496_v10, %v302_v30  ;;  %v1520_v9 = vadd.f32 %v1510_v22, %v351_v2  ;;  %vm6587_vm6 = vcmp.eq.f32.partialorder %v1554_v36, 8.507059e+37  ;;  %1906 = vmatpush.bf16.msrb.mxu3 %v4595_v12  ;;  %v5400_v36 = vld [vmem:[#allocation4 + $0x4c] sm:$0xf0]  ;;  %v5398_v22 = vld [vmem:[#allocation4 + $0x44] sm:$0xf] }
 0x2c8   :  { %5700 = vtanh.f32 %v1516_v21  ;;  %v1557_v17 = vor.u32 1.1754944e-38, %v1556_v32  ;;  %v4567_v10 = vor.u32 %v5404_v58, %v4566_v59  ;;  %v1572_v60 = vor.u32 1.1754944e-38, %v1571_v14  ;;  %v5399_v14 = vld [vmem:[#allocation4 + $0x4c] sm:$0xf] }
 0x2c9   :  { %v5691_v62 = vpop.eup %5690  ;;  %v4515_v35 = vmul.f32 -1.442695, %v1519_v3  ;;  %vm6612_vm9 = vcmp.eq.f32.partialorder %v1569_v61, 8.507059e+37  ;;  %v4571_v61 = vor.u32 %v5402_v49, %v4568_v5  ;;  %v4579_v58 = vor.u32 %v5403_v34, %v4576_v40  ;;  %v5395_v49 = vld [vmem:[#allocation4 + $0x2c] sm:$0xf] }
 0x2ca   :  { %v5693_v11 = vpop.eup %5692  ;;  %v6561_v39 = vadd.f32 1.0, %v5691_v62  ;;  %1865 = vmatpush.bf16.msra.mxu0 %v4567_v10  ;;  %v5394_v10 = vld [vmem:[#allocation4 + $0x24] sm:$0xf] }
 0x2cb   :  { %v6563_v8 = vpop.eup %5694  ;;  %v6565_v63 = vadd.f32 1.0, %v5693_v11  ;;  %5702 = vpow2.f32 %v4515_v35  ;;  %1879 = vmatpush.bf16.msra.mxu1 %v4571_v61  ;;  %1907 = vmatpush.bf16.msrb.mxu3 %v4579_v58 }
 0x2cc   :  { %v6567_v54 = vpop.eup %5696  ;;  %v1546_v25 = vmul.f32 %v6563_v8, %v6551_v16  ;;  %5704 = vrcp.f32 %v6561_v39  ;;  %vm1551_vm5 = vweird.f32 %v6563_v8 }
 0x2cd   :  { %v5699_v29 = vpop.eup %5698  ;;  %v1561_v23 = vmul.f32 %v6567_v54, %v6555_v18  ;;  %5706 = vrcp.f32 %v6565_v63  ;;  %vm1566_vm7 = vweird.f32 %v6567_v54  ;;  %v1599_v19 = vand.u32 2147483647, %v6565_v63  ;;  %vm6607_vm8 = vmor %vm1550_vm3, %vm1551_vm5 }
 0x2ce   :  { %v1547_v4 = vsub.f32 1.0, %v1546_v25  ;;  %v6582_v44 = vadd.f32 1.0, %v5699_v29  ;;  %v5701_v43 = vpop.eup %5700  ;;  %v1601_v21 = vand.u32 2147483648, %v6565_v63  ;;  %vm6620_vm10 = vmor %vm1565_vm4, %vm1566_vm7  ;;  %vm1595_vm12 = vweird.f32 %v6565_v63  ;;  %v4558_v29 = vld [vmem:[#allocation4 + $0x48] sm:$0xf] }
 0x2cf   :  { %v1562_v48 = vsub.f32 1.0, %v1561_v23  ;;  %vm6638_vm11 = vcmp.eq.f32.partialorder %v1599_v19, 8.507059e+37  ;;  %v5401_v23 = vld [vmem:[#allocation4 + $0x54] sm:$0xf0]  ;;  %vm1580_vm4 = vweird.f32 %v6561_v39 }
 0x2d0   :  { %v1548_v6 = vmul.f32 %v6563_v8, %v1547_v4  ;;  %5708 = vrcp.f32 %v6582_v44  ;;  %v1616_v46 = vand.u32 2147483648, %v6582_v44  ;;  %v1602_v25 = vor.u32 1.1754944e-38, %v1601_v21 }
 0x2d1   :  { %v5703_v20 = vpop.eup %5702  ;;  %v1563_v41 = vmul.f32 %v6567_v54, %v1562_v48  ;;  %5710 = vtanh.f32 %v1520_v9  ;;  %v4575_v48 = vor.u32 %v5405_v13, %v4574_v28  ;;  %v4560_v9 = vld [vmem:[#allocation4 + $0x58] sm:$0xf0]  ;;  %v1614_v19 = vand.u32 2147483647, %v6582_v44  ;;  %v5392_v13 = vld [vmem:[#allocation4 + $0xc] sm:$0xf0] }
 0x2d2   :  { %v6595_v30 = vpop.eup %5704  ;;  %v1549_v27 = vadd.f32 %v6563_v8, %v1548_v6  ;;  %v6598_v0 = vadd.f32 1.0, %v5703_v20  ;;  %v4534_v6 = vld [vmem:[#allocation4 + $0x20] sm:$0xf]  ;;  %v4559_v21 = vor.u32 %v5401_v23, %v4558_v29  ;;  %vm1610_vm15 = vweird.f32 %v6582_v44  ;;  %v5391_v29 = vld [vmem:[#allocation4 + $0xc] sm:$0xf] }
 0x2d3   :  { %v6601_v52 = vpop.eup %5706  ;;  %v1564_v53 = vadd.f32 %v6567_v54, %v1563_v41  ;;  %v1576_v62 = vmul.f32 %v6595_v30, %v6561_v39  ;;  %1893 = vmatpush.bf16.msrb.mxu2 %v4575_v48  ;;  %v4563_v16 = vor.u32 %v5399_v14, %v4560_v9  ;;  %v1617_v40 = vor.u32 1.1754944e-38, %v1616_v46  ;;  %v4528_v23 = vld [vmem:[#allocation4 + $0x18] sm:$0xf0] }
 0x2d4   :  { %v1553_v35 = vsel %vm6607_vm8, %v6563_v8, %v1549_v27  ;;  %v1591_v45 = vmul.f32 %v6601_v52, %v6565_v63  ;;  %5712 = vrcp.f32 %v6598_v0  ;;  %vm1596_vm13 = vweird.f32 %v6601_v52  ;;  %v4542_v63 = vld [vmem:[#allocation4 + $0x28] sm:$0xf] }
 0x2d5   :  { %v1558_v18 = vsel %vm6587_vm6, %v1557_v17, %v1553_v35  ;;  %v1568_v33 = vsel %vm6620_vm10, %v6567_v54, %v1564_v53  ;;  %v1577_v32 = vsub.f32 1.0, %v1576_v62  ;;  %vm6661_vm14 = vmor %vm1595_vm12, %vm1596_vm13  ;;  %v4555_v27 = vor.u32 %v5398_v22, %v4552_v26  ;;  %v4544_v35 = vld [vmem:[#allocation4 + $0x38] sm:$0xf0]  ;;  %1908 = vmatpush.bf16.msrb.mxu3 %v4563_v16  ;;  %v4526_v22 = vld [vmem:[#allocation4 + $0x8] sm:$0xf] }
 0x2d6   :  { %v6642_v42 = vpop.eup %5708  ;;  %v1573_v8 = vsel %vm6612_vm9, %v1572_v60, %v1568_v33  ;;  %v1639_v57 = vmul.f32 %v5701_v43, %v1558_v18  ;;  %v1592_v2 = vsub.f32 1.0, %v1591_v45  ;;  %v4551_v43 = vor.u32 %v5400_v36, %v4550_v24  ;;  %v4536_v60 = vld [vmem:[#allocation4 + $0x30] sm:$0xf0]  ;;  %v4518_v45 = vld [vmem:[#allocation4] sm:$0xf] }
 0x2d7   :  { %v1637_v54 = vmul.f32 %v1573_v8, %v6517_v47  ;;  %v1606_v38 = vmul.f32 %v6642_v42, %v6582_v44  ;;  %v5711_v12 = vpop.eup %5710  ;;  %vm1611_vm0 = vweird.f32 %v6642_v42  ;;  %v1578_v5 = vmul.f32 %v6595_v30, %v1577_v32  ;;  %1880 = vmatpush.bf16.msra.mxu1 %v4555_v27  ;;  %1894 = vmatpush.bf16.msrb.mxu2 %v4559_v21  ;;  %v4520_v36 = vld [vmem:[#allocation4 + $0x10] sm:$0xf0] }
 0x2d8   :  { %v1593_v4 = vmul.f32 %v6601_v52, %v1592_v2  ;;  %1866 = vmatpush.bf16.msra.mxu0 %v4551_v43  ;;  %v4535_v62 = vor.u32 %v5396_v31, %v4534_v6  ;;  %vm6682_vm1 = vmor %vm1610_vm15, %vm1611_vm0  ;;  %vm6686_vm2 = vcmp.eq.f32.partialorder %v1614_v19, 8.507059e+37  ;;  %v4539_v11 = vor.u32 %v5394_v10, %v4536_v60  ;;  %v5390_v2 = vld [vmem:[#allocation4 + $0x4] sm:$0xf] }
 0x2d9   :  { %v6652_v59 = vadd.f32 %v1639_v57, %v1637_v54  ;;  %v1607_v47 = vsub.f32 1.0, %v1606_v38  ;;  %v4543_v57 = vor.u32 %v5397_v7, %v4542_v63  ;;  %v4547_v46 = vor.u32 %v5395_v49, %v4544_v35  ;;  %v5393_v54 = vld [vmem:[#allocation4 + $0x14] sm:$0xf0]  ;;  %v7765_v35 = vld [vmem:[#allocation23_spill] sm:$0xff] }
 0x2da   :  { %v6654_v20 = vpop.eup %5712  ;;  %v1594_v41 = vadd.f32 %v6601_v52, %v1593_v4  ;;  %vm1581_vm3 = vweird.f32 %v6595_v30  ;;  %v1579_v32 = vadd.f32 %v6595_v30, %v1578_v5  ;;  %v4523_v61 = vor.u32 %v5390_v2, %v4520_v36  ;;  %v5450_v2 = vld [vmem:[#allocation4 + $0xe4] sm:$0xf]  ;;  %v4772_v36 = vld [vmem:[#allocation4 + $0xe8] sm:$0xf] }
 0x2db   :  { %v1608_v3 = vmul.f32 %v6642_v42, %v1607_v47  ;;  %v1621_v53 = vmul.f32 %v6654_v20, %v6598_v0  ;;  %5714 = vtanh.f32 %v6652_v59  ;;  %1881 = vmatpush.bf16.msra.mxu1 %v4539_v11  ;;  %1895 = vmatpush.bf16.msrb.mxu2 %v4543_v57  ;;  %v4527_v48 = vor.u32 %v5393_v54, %v4526_v22  ;;  %vm6703_vm5 = vmor %vm1580_vm4, %vm1581_vm3  ;;  %v5452_v57 = vld [vmem:[#allocation4 + $0xec] sm:$0xf0] }
 0x2dc   :  { %v1598_v28 = vsel %vm6661_vm14, %v6601_v52, %v1594_v41  ;;  %1867 = vmatpush.bf16.msra.mxu0 %v4535_v62  ;;  %v1584_v14 = vand.u32 2147483647, %v6561_v39  ;;  %1909 = vmatpush.bf16.msrb.mxu3 %v4547_v46  ;;  %v4531_v47 = vor.u32 %v5391_v29, %v4528_v23  ;;  %vm1626_vm6 = vweird.f32 %v6654_v20  ;;  %v5453_v23 = vld [vmem:[#allocation4 + $0xf4] sm:$0xf0] }
 0x2dd   :  { %v1622_v34 = vsub.f32 1.0, %v1621_v53  ;;  %v1603_v18 = vsel %vm6638_vm11, %v1602_v25, %v1598_v28  ;;  %v1609_v33 = vadd.f32 %v6642_v42, %v1608_v3  ;;  %v4519_v25 = vor.u32 %v5392_v13, %v4518_v45  ;;  %v7766_v13 = vld [vmem:[#allocation29_spill] sm:$0xff] }
 0x2de   :  { %v1640_v8 = vmul.f32 %v5711_v12, %v1603_v18  ;;  %vm1625_vm7 = vweird.f32 %v6598_v0  ;;  %vm1585_vm8 = vcmp.eq.f32.partialorder %v1584_v14, 8.507059e+37  ;;  %v1629_v31 = vand.u32 2147483647, %v6598_v0  ;;  %v7767_v18 = vld [vmem:[#allocation30_spill] sm:$0xff]  ;;  %v7768_v14 = vld [vmem:[#allocation24_spill] sm:$0xff] }
 0x2df   :  { %v1613_v44 = vsel %vm6682_vm1, %v6642_v42, %v1609_v33  ;;  %v1623_v38 = vmul.f32 %v6654_v20, %v1622_v34  ;;  %v1586_v42 = vand.u32 2147483648, %v6561_v39  ;;  %v1631_v39 = vand.u32 2147483648, %v6598_v0  ;;  %1882 = vmatpush.bf16.msra.mxu1 %v4523_v61  ;;  %1896 = vmatpush.bf16.msrb.mxu2 %v4527_v48  ;;  %vm1627_vm9 = vmor %vm1625_vm7, %vm1626_vm6  ;;  %v5451_v61 = vld [vmem:[#allocation4 + $0xec] sm:$0xf]  ;;  %v4774_v48 = vld [vmem:[#allocation4 + $0xf8] sm:$0xf0] }
 0x2e0   :  { %v1618_v26 = vsel %vm6686_vm2, %v1617_v40, %v1613_v44  ;;  %1868 = vmatpush.bf16.msra.mxu0 %v4519_v25  ;;  %1910 = vmatpush.bf16.msrb.mxu3 %v4531_v47  ;;  %vm1630_vm10 = vcmp.eq.f32.partialorder %v1629_v31, 8.507059e+37  ;;  %v305_v45 = vadd.f32 %v7765_v35, %v6295_v37  ;;  %v209_v34 = vadd.f32 %v7766_v13, %v6106_v55  ;;  %v4766_v25 = vld [vmem:[#allocation4 + $0xf0] sm:$0xf0]  ;;  %v5442_v35 = vld [vmem:[#allocation4 + $0xa4] sm:$0xf] }
 0x2e1   :  { %v1638_v4 = vmul.f32 %v1618_v26, %v6536_v15  ;;  %v1583_v15 = vsel %vm6703_vm5, %v6595_v30, %v1579_v32  ;;  %v1624_v58 = vadd.f32 %v6654_v20, %v1623_v38  ;;  %v5715_v43 = vpop.eup %5714  ;;  %v1587_v6 = vor.u32 1.1754944e-38, %v1586_v42 }
 0x2e2   :  { %v1632_v19 = vor.u32 1.1754944e-38, %v1631_v39  ;;  %v258_v33 = vadd.f32 %v7767_v18, %v6111_v56  ;;  %v4769_v29 = vor.u32 %v5450_v2, %v4766_v25  ;;  %v354_v9 = vadd.f32 %v7768_v14, %v6302_v1  ;;  %v5448_v39 = vld [vmem:[#allocation4 + $0xcc] sm:$0xf0] }
 0x2e3   :  { %v6707_v12 = vadd.f32 %v1640_v8, %v1638_v4  ;;  %v1588_v41 = vsel %vm1585_vm8, %v1587_v6, %v1583_v15  ;;  %v1628_v30 = vsel %vm1627_vm9, %v6654_v20, %v1624_v58  ;;  %v4773_v4 = vor.u32 %v5453_v23, %v4772_v36  ;;  %v7769_v58 = vld [vmem:[#allocation25_spill] sm:$0xff]  ;;  %v4748_v6 = vld [vmem:[#allocation4 + $0xc0] sm:$0xf]  ;;  %v4742_v23 = vld [vmem:[#allocation4 + $0xb8] sm:$0xf0] }
 0x2e4   :  { %v1645_v17 = vmul.f32 %v5715_v43, %v1588_v41  ;;  %v1633_v21 = vsel %vm1630_vm10, %v1632_v19, %v1628_v30  ;;  %2279 = vmatpush.bf16.msrb.mxu1 %v4769_v29  ;;  %v4777_v15 = vor.u32 %v5451_v61, %v4774_v48  ;;  %v307_v43 = vadd.f32 %v7769_v58, %v6295_v37  ;;  %v5446_v30 = vld [vmem:[#allocation4 + $0xc4] sm:$0xf]  ;;  %v5443_v29 = vld [vmem:[#allocation4 + $0xac] sm:$0xf] }
 0x2e5   :  { %5716 = vtanh.f32 %v6707_v12  ;;  %2293 = vmatpush.bf16.msra.mxu2 %v4773_v4 }
 0x2e6   :  { %v1647_v60 = vpack.c.bf16 %v1645_v17, %v1645_v17  ;;  %2307 = vmatpush.bf16.msra.mxu3 %v4777_v15 }
 0x2e8   :  { %v1697_v63 = vunpack.c.l.b16 %v1647_v60  ;;  %v5447_v60 = vld [vmem:[#allocation4 + $0xcc] sm:$0xf] }
 0x2eb   :  { %v5717_v27 = vpop.eup %5716 }
 0x2ec   :  { %v1646_v10 = vmul.f32 %v5717_v27, %v1633_v21  ;;  %v4756_v27 = vld [vmem:[#allocation4 + $0xc8] sm:$0xf]  ;;  %v5449_v21 = vld [vmem:[#allocation4 + $0xd4] sm:$0xf0] }
 0x2ee   :  { %v1648_v3 = vpack.c.bf16 %v1646_v10, %v1646_v10  ;;  %v5587_v53 = vpack.c.bf16 %v1646_v10, %v1645_v17  ;;  %v4750_v17 = vld [vmem:[#allocation4 + $0xd0] sm:$0xf0]  ;;  %v4749_v10 = vor.u32 %v5448_v39, %v4748_v6  ;;  %v4684_v6 = vld [vmem:[#allocation4 + $0x40] sm:$0xf] }
 0x2f0   :  { %5588 = vst [vmem:[#allocation3 + $0x18] sm:$0xff] %v5587_v53   ;;  %v1698_v7 = vunpack.c.l.b16 %v1648_v3  ;;  %v4758_v3 = vld [vmem:[#allocation4 + $0xd8] sm:$0xf0] }
 0x2f2   :  { %v1699_v49 = vpack.c.b16 %v1698_v7, %v1697_v63  ;;  %v4753_v7 = vor.u32 %v5446_v30, %v4750_v17  ;;  %v4745_v30 = vor.u32 %v5443_v29, %v4742_v23 }
 0x2f4   :  { %1869 = vmatmul.bf16.vlgmr.msra.gmra.mxu0 %v1699_v49  ;;  %1883 = vmatmul.bf16.vlgmr.msra.gmra.mxu1 %v1699_v49 }
 0x2f5   :  { %1897 = vmatmul.bf16.vlgmr.msrb.gmra.mxu2 %v1699_v49  ;;  %1911 = vmatmul.bf16.vlgmr.msrb.gmra.mxu3 %v1699_v49  ;;  %v4757_v49 = vor.u32 %v5449_v21, %v4756_v27 }
 0x2f6   :  { %2280 = vmatpush.bf16.msrb.mxu1 %v4753_v7  ;;  %v4718_v7 = vld [vmem:[#allocation4 + $0x90] sm:$0xf0] }
 0x2f7   :  { %2294 = vmatpush.bf16.msra.mxu2 %v4757_v49  ;;  %v4724_v49 = vld [vmem:[#allocation4 + $0x88] sm:$0xf] }
 0x371   :  { %v1870_v0 = vpop.f32.mrf.mxu0  ;;  %v1884_v5 = vpop.f32.mrf.mxu1 }
 0x372   :  { %v1917_v20 = vadd.f32 %v1870_v0, %v6192_v50  ;;  %v1918_v28 = vadd.f32 %v1884_v5, %v6195_v51  ;;  %v4764_v51 = vld [vmem:[#allocation4 + $0xe0] sm:$0xf]  ;;  %v4761_v0 = vor.u32 %v5447_v60, %v4758_v3  ;;  %v5440_v60 = vld [vmem:[#allocation4 + $0x8c] sm:$0xf0]  ;;  %v5438_v3 = vld [vmem:[#allocation4 + $0x84] sm:$0xf] }
 0x373   :  { %v4765_v46 = vor.u32 %v5452_v57, %v4764_v51  ;;  %v4732_v5 = vld [vmem:[#allocation4 + $0xa0] sm:$0xf]  ;;  %v5445_v51 = vld [vmem:[#allocation4 + $0xb4] sm:$0xf0] }
 0x374   :  { %v4644_v16 = vmul.f32 -1.442695, %v1917_v20  ;;  %v4645_v62 = vmul.f32 -1.442695, %v1918_v28  ;;  %v5444_v20 = vld [vmem:[#allocation4 + $0xac] sm:$0xf0]  ;;  %2308 = vmatpush.bf16.msra.mxu3 %v4761_v0 }
 0x375   :  { %2265 = vmatpush.bf16.msrb.mxu0 %v4765_v46  ;;  %v5441_v0 = vld [vmem:[#allocation4 + $0x94] sm:$0xf0] }
 0x376   :  { %5718 = vpow2.f32 %v4644_v16  ;;  %v4725_v29 = vor.u32 %v5441_v0, %v4724_v49 }
 0x377   :  { %5720 = vpow2.f32 %v4645_v62  ;;  %v4733_v62 = vor.u32 %v5444_v20, %v4732_v5 }
 0x378   :  { %v1898_v40 = vpop.f32.mrf.mxu2  ;;  %v1912_v54 = vpop.f32.mrf.mxu3  ;;  %2309 = vmatpush.bf16.msra.mxu3 %v4745_v30 }
 0x379   :  { %v1919_v24 = vadd.f32 %v1898_v40, %v305_v45  ;;  %v1872_v52 = vpop.f32.mrf.mxu0  ;;  %v1886_v8 = vpop.f32.mrf.mxu1  ;;  %v1920_v31 = vadd.f32 %v1912_v54, %v354_v9  ;;  %2266 = vmatpush.bf16.msrb.mxu0 %v4749_v10  ;;  %v4734_v45 = vld [vmem:[#allocation4 + $0xb0] sm:$0xf0]  ;;  %v4716_v10 = vld [vmem:[#allocation4 + $0x80] sm:$0xf] }
 0x37a   :  { %v1921_v50 = vadd.f32 %v1872_v52, %v209_v34  ;;  %v1922_v11 = vadd.f32 %v1886_v8, %v258_v33  ;;  %v7770_v34 = vld [vmem:[#allocation26_spill] sm:$0xff]  ;;  %v4737_v40 = vor.u32 %v5442_v35, %v4734_v45  ;;  %v5439_v35 = vld [vmem:[#allocation4 + $0x8c] sm:$0xf] }
 0x37b   :  { %v4646_v44 = vmul.f32 -1.442695, %v1919_v24  ;;  %v356_v18 = vadd.f32 %v7770_v34, %v6302_v1 }
 0x37c   :  { %v5719_v22 = vpop.eup %5718  ;;  %v4647_v38 = vmul.f32 -1.442695, %v1921_v50  ;;  %v4648_v26 = vmul.f32 -1.442695, %v1922_v11  ;;  %v4740_v11 = vld [vmem:[#allocation4 + $0xa8] sm:$0xf]  ;;  %2281 = vmatpush.bf16.msrb.mxu1 %v4737_v40 }
 0x37d   :  { %v5721_v32 = vpop.eup %5720  ;;  %v6727_v42 = vadd.f32 1.0, %v5719_v22  ;;  %5722 = vpow2.f32 %v4646_v44  ;;  %2267 = vmatpush.bf16.msrb.mxu0 %v4733_v62 }
 0x37e   :  { %v6731_v47 = vadd.f32 1.0, %v5721_v32  ;;  %5724 = vpow2.f32 %v4647_v38 }
 0x37f   :  { %5726 = vrcp.f32 %v6727_v42  ;;  %vm1954_vm11 = vweird.f32 %v6727_v42  ;;  %v1958_v8 = vand.u32 2147483647, %v6727_v42  ;;  %v1960_v46 = vand.u32 2147483648, %v6727_v42 }
 0x380   :  { %5728 = vrcp.f32 %v6731_v47  ;;  %v1900_v41 = vpop.f32.mrf.mxu2  ;;  %v1914_v50 = vpop.f32.mrf.mxu3  ;;  %v1975_v44 = vand.u32 2147483648, %v6731_v47  ;;  %vm1969_vm12 = vweird.f32 %v6731_v47  ;;  %v1973_v36 = vand.u32 2147483647, %v6731_v47 }
 0x381   :  { %5730 = vpow2.f32 %v4648_v26  ;;  %v1923_v19 = vadd.f32 %v1900_v41, %v307_v43  ;;  %v1924_v38 = vadd.f32 %v1914_v50, %v356_v18  ;;  %v4741_v26 = vor.u32 %v5445_v51, %v4740_v11  ;;  %v5436_v11 = vld [vmem:[#allocation4 + $0x6c] sm:$0xf0]  ;;  %v5434_v51 = vld [vmem:[#allocation4 + $0x64] sm:$0xf] }
 0x382   :  { %5732 = vtanh.f32 %v1920_v31  ;;  %vm6764_vm15 = vcmp.eq.f32.partialorder %v1958_v8, 8.507059e+37  ;;  %v1976_v9 = vor.u32 1.1754944e-38, %v1975_v44  ;;  %v1961_v15 = vor.u32 1.1754944e-38, %v1960_v46  ;;  %v4700_v8 = vld [vmem:[#allocation4 + $0x60] sm:$0xf] }
 0x383   :  { %v5723_v53 = vpop.eup %5722  ;;  %v4649_v63 = vmul.f32 -1.442695, %v1923_v19  ;;  %2295 = vmatpush.bf16.msra.mxu2 %v4741_v26  ;;  %vm6796_vm2 = vcmp.eq.f32.partialorder %v1973_v36, 8.507059e+37  ;;  %v4717_v46 = vor.u32 %v5440_v60, %v4716_v10  ;;  %v4708_v36 = vld [vmem:[#allocation4 + $0x68] sm:$0xf] }
 0x384   :  { %v5725_v28 = vpop.eup %5724  ;;  %v6737_v16 = vadd.f32 1.0, %v5723_v53  ;;  %v4686_v19 = vld [vmem:[#allocation4 + $0x50] sm:$0xf0]  ;;  %v5433_v60 = vld [vmem:[#allocation4 + $0x54] sm:$0xf0] }
 0x385   :  { %v6739_v13 = vpop.eup %5726  ;;  %v6743_v33 = vadd.f32 1.0, %v5725_v28  ;;  %5734 = vpow2.f32 %v4649_v63  ;;  %2268 = vmatpush.bf16.msrb.mxu0 %v4717_v46 }
 0x386   :  { %v6745_v24 = vpop.eup %5728  ;;  %v1950_v52 = vmul.f32 %v6739_v13, %v6727_v42  ;;  %5736 = vrcp.f32 %v6737_v16  ;;  %vm1955_vm14 = vweird.f32 %v6739_v13 }
 0x387   :  { %v5731_v57 = vpop.eup %5730  ;;  %v1965_v2 = vmul.f32 %v6745_v24, %v6731_v47  ;;  %5738 = vrcp.f32 %v6743_v33  ;;  %vm1970_vm13 = vweird.f32 %v6745_v24  ;;  %v2003_v58 = vand.u32 2147483647, %v6743_v33  ;;  %vm6791_vm1 = vmor %vm1954_vm11, %vm1955_vm14  ;;  %2296 = vmatpush.bf16.msra.mxu2 %v4725_v29 }
 0x388   :  { %v1951_v25 = vsub.f32 1.0, %v1950_v52  ;;  %v6759_v22 = vadd.f32 1.0, %v5731_v57  ;;  %v5733_v32 = vpop.eup %5732  ;;  %vm6777_vm0 = vmor %vm1969_vm12, %vm1970_vm13  ;;  %v2005_v41 = vand.u32 2147483648, %v6743_v33  ;;  %v4726_v52 = vld [vmem:[#allocation4 + $0x98] sm:$0xf0]  ;;  %vm1999_vm4 = vweird.f32 %v6743_v33 }
 0x389   :  { %v1966_v54 = vsub.f32 1.0, %v1965_v2  ;;  %vm6816_vm3 = vcmp.eq.f32.partialorder %v2003_v58, 8.507059e+37  ;;  %v4702_v57 = vld [vmem:[#allocation4 + $0x70] sm:$0xf0]  ;;  %v4729_v23 = vor.u32 %v5439_v35, %v4726_v52  ;;  %v4668_v35 = vld [vmem:[#allocation4 + $0x20] sm:$0xf]  ;;  %vm1984_vm12 = vweird.f32 %v6737_v16 }
 0x38a   :  { %v1952_v4 = vmul.f32 %v6739_v13, %v1951_v25  ;;  %5740 = vrcp.f32 %v6759_v22  ;;  %v2020_v21 = vand.u32 2147483648, %v6759_v22  ;;  %v2018_v62 = vand.u32 2147483647, %v6759_v22  ;;  %v4676_v52 = vld [vmem:[#allocation4 + $0x28] sm:$0xf] }
 0x38b   :  { %v5735_v48 = vpop.eup %5734  ;;  %v1967_v14 = vmul.f32 %v6745_v24, %v1966_v54  ;;  %5742 = vtanh.f32 %v1924_v38  ;;  %v2006_v40 = vor.u32 1.1754944e-38, %v2005_v41  ;;  %v4721_v25 = vor.u32 %v5438_v3, %v4718_v7  ;;  %v5437_v54 = vld [vmem:[#allocation4 + $0x74] sm:$0xf0]  ;;  %2310 = vmatpush.bf16.msra.mxu3 %v4729_v23  ;;  %v5431_v3 = vld [vmem:[#allocation4 + $0x4c] sm:$0xf] }
 0x38c   :  { %v6771_v43 = vpop.eup %5736  ;;  %v1953_v39 = vadd.f32 %v6739_v13, %v1952_v4  ;;  %v6782_v31 = vadd.f32 1.0, %v5735_v48  ;;  %v4710_v4 = vld [vmem:[#allocation4 + $0x78] sm:$0xf0]  ;;  %v4705_v58 = vor.u32 %v5434_v51, %v4702_v57  ;;  %vm2014_vm7 = vweird.f32 %v6759_v22  ;;  %v5422_v23 = vld [vmem:[#allocation4 + $0x4] sm:$0xf] }
 0x38d   :  { %v6785_v17 = vpop.eup %5738  ;;  %v1968_v47 = vadd.f32 %v6745_v24, %v1967_v14  ;;  %v6803_v53 = vmul.f32 %v6771_v43, %v6737_v16  ;;  %2282 = vmatpush.bf16.msrb.mxu1 %v4721_v25  ;;  %vm1985_vm9 = vweird.f32 %v6771_v43  ;;  %vm6866_vm11 = vcmp.eq.f32.partialorder %v2018_v62, 8.507059e+37  ;;  %v4678_v51 = vld [vmem:[#allocation4 + $0x38] sm:$0xf0]  ;;  %v4652_v25 = vld [vmem:[#allocation4] sm:$0xf] }
 0x38e   :  { %v1957_v42 = vsel %vm6791_vm1, %v6739_v13, %v1953_v39  ;;  %v1995_v63 = vmul.f32 %v6785_v17, %v6743_v33  ;;  %5744 = vrcp.f32 %v6782_v31  ;;  %vm2000_vm5 = vweird.f32 %v6785_v17  ;;  %v5432_v39 = vld [vmem:[#allocation4 + $0x4c] sm:$0xf0]  ;;  %v5430_v33 = vld [vmem:[#allocation4 + $0x44] sm:$0xf]  ;;  %vm6882_vm13 = vmor %vm1984_vm12, %vm1985_vm9 }
 0x38f   :  { %v1962_v5 = vsel %vm6764_vm15, %v1961_v15, %v1957_v42  ;;  %v1972_v20 = vsel %vm6777_vm0, %v6745_v24, %v1968_v47  ;;  %v1981_v2 = vsub.f32 1.0, %v6803_v53  ;;  %vm6841_vm6 = vmor %vm1999_vm4, %vm2000_vm5  ;;  %v4701_v15 = vor.u32 %v5436_v11, %v4700_v8  ;;  %v4692_v47 = vld [vmem:[#allocation4 + $0x48] sm:$0xf]  ;;  %v4694_v53 = vld [vmem:[#allocation4 + $0x58] sm:$0xf0] }
 0x390   :  { %v6821_v45 = vpop.eup %5740  ;;  %v1977_v13 = vsel %vm6796_vm2, %v1976_v9, %v1972_v20  ;;  %v2043_v34 = vmul.f32 %v5733_v32, %v1962_v5  ;;  %v1996_v18 = vsub.f32 1.0, %v1995_v63  ;;  %v5435_v32 = vld [vmem:[#allocation4 + $0x6c] sm:$0xf]  ;;  %v2021_v9 = vor.u32 1.1754944e-38, %v2020_v21 }
 0x391   :  { %v2041_v50 = vmul.f32 %v1977_v13, %v6652_v59  ;;  %v2010_v24 = vmul.f32 %v6821_v45, %v6759_v22  ;;  %v5743_v38 = vpop.eup %5742  ;;  %vm2015_vm8 = vweird.f32 %v6821_v45  ;;  %v4709_v21 = vor.u32 %v5437_v54, %v4708_v36  ;;  %2269 = vmatpush.bf16.msrb.mxu0 %v4701_v15  ;;  %2283 = vmatpush.bf16.msrb.mxu1 %v4705_v58  ;;  %v5428_v13 = vld [vmem:[#allocation4 + $0x2c] sm:$0xf0]  ;;  %v5427_v11 = vld [vmem:[#allocation4 + $0x2c] sm:$0xf] }
 0x392   :  { %v1997_v44 = vmul.f32 %v6785_v17, %v1996_v18  ;;  %v4713_v10 = vor.u32 %v5435_v32, %v4710_v4  ;;  %v1982_v42 = vmul.f32 %v6771_v43, %v1981_v2  ;;  %vm6862_vm10 = vmor %vm2014_vm7, %vm2015_vm8  ;;  %v4685_v20 = vor.u32 %v5432_v39, %v4684_v6  ;;  %v5426_v18 = vld [vmem:[#allocation4 + $0x24] sm:$0xf]  ;;  %v5424_v36 = vld [vmem:[#allocation4 + $0xc] sm:$0xf0] }
 0x393   :  { %v6832_v59 = vadd.f32 %v2043_v34, %v2041_v50  ;;  %v2011_v26 = vsub.f32 1.0, %v2010_v24  ;;  %v4689_v28 = vor.u32 %v5430_v33, %v4686_v19  ;;  %2297 = vmatpush.bf16.msra.mxu2 %v4709_v21  ;;  %v4693_v34 = vor.u32 %v5433_v60, %v4692_v47  ;;  %v5429_v24 = vld [vmem:[#allocation4 + $0x34] sm:$0xf0]  ;;  %v4654_v32 = vld [vmem:[#allocation4 + $0x10] sm:$0xf0] }
 0x394   :  { %v6834_v61 = vpop.eup %5744  ;;  %v1998_v48 = vadd.f32 %v6785_v17, %v1997_v44  ;;  %2311 = vmatpush.bf16.msra.mxu3 %v4713_v10  ;;  %v4697_v62 = vor.u32 %v5431_v3, %v4694_v53  ;;  %v1990_v57 = vand.u32 2147483648, %v6737_v16  ;;  %v4669_v44 = vor.u32 %v5428_v13, %v4668_v35  ;;  %v4660_v4 = vld [vmem:[#allocation4 + $0x8] sm:$0xf]  ;;  %v5423_v14 = vld [vmem:[#allocation4 + $0xc] sm:$0xf] }
 0x395   :  { %v2012_v41 = vmul.f32 %v6821_v45, %v2011_v26  ;;  %v2025_v30 = vmul.f32 %v6834_v61, %v6782_v31  ;;  %5746 = vtanh.f32 %v6832_v59  ;;  %2270 = vmatpush.bf16.msrb.mxu0 %v4685_v20  ;;  %2284 = vmatpush.bf16.msrb.mxu1 %v4689_v28  ;;  %v1983_v54 = vadd.f32 %v6771_v43, %v1982_v42  ;;  %v7791_v20 = vld [vmem:[#allocation7_spill] sm:$0xff]  ;;  %v7792_v35 = vld [vmem:[#allocation8_spill] sm:$0xff] }
 0x396   :  { %v2002_v27 = vsel %vm6841_vm6, %v6785_v17, %v1998_v48  ;;  %v4681_v29 = vor.u32 %v5427_v11, %v4678_v51  ;;  %vm2030_vm14 = vweird.f32 %v6834_v61  ;;  %v5425_v48 = vld [vmem:[#allocation4 + $0x14] sm:$0xf0]  ;;  %v1991_v6 = vor.u32 1.1754944e-38, %v1990_v57  ;;  %v7794_v11 = vld [vmem:[#allocation9_spill] sm:$0xff] }
 0x397   :  { %v2026_v63 = vsub.f32 1.0, %v2025_v30  ;;  %v2007_v7 = vsel %vm6816_vm3, %v2006_v40, %v2002_v27  ;;  %v2013_v49 = vadd.f32 %v6821_v45, %v2012_v41  ;;  %v4670_v40 = vld [vmem:[#allocation4 + $0x30] sm:$0xf0]  ;;  %2298 = vmatpush.bf16.msra.mxu2 %v4693_v34  ;;  %v1987_v15 = vsel %vm6882_vm13, %v6771_v43, %v1983_v54  ;;  %v7795_v57 = vld [vmem:[#allocation10_spill] sm:$0xff]  ;;  %v4882_v43 = vld [vmem:[#allocation4 + $0xc0] sm:$0xf] }
 0x398   :  { %v2044_v5 = vmul.f32 %v5743_v38, %v2007_v7  ;;  %v4673_v46 = vor.u32 %v5426_v18, %v4670_v40  ;;  %v1988_v38 = vand.u32 2147483647, %v6737_v16  ;;  %2312 = vmatpush.bf16.msra.mxu3 %v4697_v62  ;;  %vm2029_vm15 = vweird.f32 %v6782_v31  ;;  %v7793_v62 = vld [vmem:[#allocation27_spill] sm:$0xff] }
 0x399   :  { %v2017_v22 = vsel %vm6862_vm10, %v6821_v45, %v2013_v49  ;;  %v2027_v8 = vmul.f32 %v6834_v61, %v2026_v63  ;;  %v2035_v39 = vand.u32 2147483648, %v6782_v31  ;;  %2271 = vmatpush.bf16.msrb.mxu0 %v4669_v44  ;;  %v4653_v41 = vor.u32 %v5424_v36, %v4652_v25  ;;  %vm6901_vm1 = vmor %vm2029_vm15, %vm2030_vm14  ;;  %v4898_v44 = vld [vmem:[#allocation4 + $0xe0] sm:$0xf] }
 0x39a   :  { %v2022_v50 = vsel %vm6866_vm11, %v2021_v9, %v2017_v22  ;;  %v4662_v9 = vld [vmem:[#allocation4 + $0x18] sm:$0xf0]  ;;  %2285 = vmatpush.bf16.msrb.mxu1 %v4673_v46  ;;  %v4657_v30 = vor.u32 %v5422_v23, %v4654_v32  ;;  %vm1989_vm0 = vcmp.eq.f32.partialorder %v1988_v38, 8.507059e+37  ;;  %v2033_v33 = vand.u32 2147483647, %v6782_v31 }
 0x39b   :  { %v2042_v45 = vmul.f32 %v2022_v50, %v6707_v12  ;;  %v4677_v12 = vor.u32 %v5429_v24, %v4676_v52  ;;  %v2028_v16 = vadd.f32 %v6834_v61, %v2027_v8  ;;  %v5747_v58 = vpop.eup %5746  ;;  %v4661_v19 = vor.u32 %v5425_v48, %v4660_v4  ;;  %v5484_v46 = vld [vmem:[#allocation4 + $0xec] sm:$0xf0]  ;;  %v5482_v38 = vld [vmem:[#allocation4 + $0xe4] sm:$0xf]  ;;  %v4900_v32 = vld [vmem:[#allocation4 + $0xf0] sm:$0xf0] }
 0x39c   :  { %2313 = vmatpush.bf16.msra.mxu3 %v4681_v29  ;;  %v4665_v47 = vor.u32 %v5423_v14, %v4662_v9  ;;  %v1992_v27 = vsel %vm1989_vm0, %v1991_v6, %v1987_v15  ;;  %v2036_v60 = vor.u32 1.1754944e-38, %v2035_v39  ;;  %vm2034_vm2 = vcmp.eq.f32.partialorder %v2033_v33, 8.507059e+37  ;;  %v7796_v4 = vld [vmem:[#allocation28_spill] sm:$0xff]  ;;  %v7797_v15 = vld [vmem:[#allocation31_spill] sm:$0xff]  ;;  %v5485_v6 = vld [vmem:[#allocation4 + $0xf4] sm:$0xf0] }
 0x39d   :  { %v6888_v26 = vadd.f32 %v2044_v5, %v2042_v45  ;;  %2299 = vmatpush.bf16.msra.mxu2 %v4677_v12  ;;  %v2032_v21 = vsel %vm6901_vm1, %v6834_v61, %v2028_v16  ;;  %v2049_v10 = vmul.f32 %v5747_v58, %v1992_v27  ;;  %2272 = vmatpush.bf16.msrb.mxu0 %v4653_v41  ;;  %v4906_v58 = vld [vmem:[#allocation4 + $0xe8] sm:$0xf]  ;;  %v4908_v33 = vld [vmem:[#allocation4 + $0xf8] sm:$0xf0]  ;;  %v5478_v27 = vld [vmem:[#allocation4 + $0xc4] sm:$0xf] }
 0x39e   :  { %2286 = vmatpush.bf16.msrb.mxu1 %v4657_v30  ;;  %v2037_v3 = vsel %vm2034_vm2, %v2036_v60, %v2032_v21  ;;  %v310_v18 = vadd.f32 %v7793_v62, %v6295_v37  ;;  %v4899_v54 = vor.u32 %v5484_v46, %v4898_v44  ;;  %v359_v48 = vadd.f32 %v7796_v4, %v6302_v1  ;;  %v5483_v30 = vld [vmem:[#allocation4 + $0xec] sm:$0xf]  ;;  %v4834_v44 = vld [vmem:[#allocation4 + $0x60] sm:$0xf] }
 0x39f   :  { %5748 = vtanh.f32 %v6888_v26  ;;  %v2051_v42 = vpack.c.bf16 %v2049_v10, %v2049_v10  ;;  %v4903_v9 = vor.u32 %v5482_v38, %v4900_v32  ;;  %v312_v16 = vadd.f32 %v7797_v15, %v6295_v37  ;;  %v7798_v21 = vld [vmem:[#allocation32_spill] sm:$0xff]  ;;  %v5474_v38 = vld [vmem:[#allocation4 + $0xa4] sm:$0xf] }
 0x3a0   :  { %2314 = vmatpush.bf16.msra.mxu3 %v4665_v47  ;;  %v5480_v47 = vld [vmem:[#allocation4 + $0xcc] sm:$0xf0]  ;;  %v4907_v60 = vor.u32 %v5485_v6, %v4906_v58  ;;  %v4842_v15 = vld [vmem:[#allocation4 + $0x68] sm:$0xf] }
 0x3a1   :  { %2300 = vmatpush.bf16.msra.mxu2 %v4661_v19  ;;  %v2101_v49 = vunpack.c.l.b16 %v2051_v42  ;;  %2669 = vmatpush.bf16.msra.mxu0 %v4899_v54 }
 0x3a2   :  { %2683 = vmatpush.bf16.msra.mxu1 %v4903_v9 }
 0x3a5   :  { %v5749_v31 = vpop.eup %5748  ;;  %2697 = vmatpush.bf16.msrb.mxu2 %v4907_v60  ;;  %v5475_v60 = vld [vmem:[#allocation4 + $0xac] sm:$0xf] }
 0x3a6   :  { %v2050_v53 = vmul.f32 %v5749_v31, %v2037_v3  ;;  %v4884_v31 = vld [vmem:[#allocation4 + $0xd0] sm:$0xf0]  ;;  %v4890_v3 = vld [vmem:[#allocation4 + $0xc8] sm:$0xf] }
 0x3a8   :  { %v2052_v63 = vpack.c.bf16 %v2050_v53, %v2050_v53  ;;  %v5592_v7 = vpack.c.bf16 %v2050_v53, %v2049_v10  ;;  %v361_v10 = vadd.f32 %v7798_v21, %v6302_v1  ;;  %v4874_v21 = vld [vmem:[#allocation4 + $0xa8] sm:$0xf] }
 0x3aa   :  { %5593 = vst [vmem:[#allocation3 + $0x10] sm:$0xff] %v5592_v7   ;;  %v2102_v0 = vunpack.c.l.b16 %v2052_v63  ;;  %v4911_v63 = vor.u32 %v5483_v30, %v4908_v33  ;;  %v4883_v7 = vor.u32 %v5480_v47, %v4882_v43 }
 0x3ac   :  { %v2103_v17 = vpack.c.b16 %v2102_v0, %v2101_v49  ;;  %v4887_v49 = vor.u32 %v5478_v27, %v4884_v31  ;;  %v5481_v0 = vld [vmem:[#allocation4 + $0xd4] sm:$0xf0]  ;;  %2711 = vmatpush.bf16.msrb.mxu3 %v4911_v63  ;;  %2670 = vmatpush.bf16.msra.mxu0 %v4883_v7  ;;  %v4876_v31 = vld [vmem:[#allocation4 + $0xb8] sm:$0xf0]  ;;  %v4850_v63 = vld [vmem:[#allocation4 + $0x80] sm:$0xf] }
 0x3ad   :  { %v5472_v7 = vld [vmem:[#allocation4 + $0x8c] sm:$0xf0] }
 0x3ae   :  { %2273 = vmatmul.bf16.vlgmr.msrb.gmra.mxu0 %v2103_v17  ;;  %2287 = vmatmul.bf16.vlgmr.msrb.gmra.mxu1 %v2103_v17 }
 0x3af   :  { %2301 = vmatmul.bf16.vlgmr.msra.gmra.mxu2 %v2103_v17  ;;  %2315 = vmatmul.bf16.vlgmr.msra.gmra.mxu3 %v2103_v17  ;;  %v5479_v17 = vld [vmem:[#allocation4 + $0xcc] sm:$0xf] }
 0x3b0   :  { %2684 = vmatpush.bf16.msra.mxu1 %v4887_v49 }
 0x42b   :  { %v2274_v61 = vpop.f32.mrf.mxu0  ;;  %v2288_v5 = vpop.f32.mrf.mxu1 }
 0x42c   :  { %v2321_v28 = vadd.f32 %v2274_v61, %v7791_v20  ;;  %v2322_v13 = vadd.f32 %v2288_v5, %v7792_v35  ;;  %v4891_v35 = vor.u32 %v5481_v0, %v4890_v3  ;;  %v5464_v3 = vld [vmem:[#allocation4 + $0x4c] sm:$0xf0] }
 0x42e   :  { %v4778_v22 = vmul.f32 -1.442695, %v2321_v28  ;;  %v4779_v34 = vmul.f32 -1.442695, %v2322_v13  ;;  %v4892_v13 = vld [vmem:[#allocation4 + $0xd8] sm:$0xf0]  ;;  %2698 = vmatpush.bf16.msrb.mxu2 %v4891_v35 }
 0x430   :  { %5750 = vpow2.f32 %v4778_v22 }
 0x431   :  { %5752 = vpow2.f32 %v4779_v34 }
 0x432   :  { %v2302_v40 = vpop.f32.mrf.mxu2  ;;  %v2316_v24 = vpop.f32.mrf.mxu3 }
 0x433   :  { %v2323_v52 = vadd.f32 %v2302_v40, %v310_v18  ;;  %v2276_v8 = vpop.f32.mrf.mxu0  ;;  %v2290_v50 = vpop.f32.mrf.mxu1  ;;  %v2324_v39 = vadd.f32 %v2316_v24, %v359_v48  ;;  %v4895_v18 = vor.u32 %v5479_v17, %v4892_v13  ;;  %v5476_v24 = vld [vmem:[#allocation4 + $0xac] sm:$0xf0]  ;;  %v5470_v17 = vld [vmem:[#allocation4 + $0x84] sm:$0xf] }
 0x434   :  { %v2325_v51 = vadd.f32 %v2276_v8, %v7794_v11  ;;  %v2326_v45 = vadd.f32 %v2290_v50, %v7795_v57  ;;  %v4866_v50 = vld [vmem:[#allocation4 + $0xa0] sm:$0xf] }
 0x435   :  { %v4780_v2 = vmul.f32 -1.442695, %v2323_v52  ;;  %2712 = vmatpush.bf16.msrb.mxu3 %v4895_v18  ;;  %v4867_v54 = vor.u32 %v5476_v24, %v4866_v50  ;;  %v5473_v18 = vld [vmem:[#allocation4 + $0x94] sm:$0xf0] }
 0x436   :  { %v5751_v25 = vpop.eup %5750  ;;  %v4781_v36 = vmul.f32 -1.442695, %v2325_v51  ;;  %v4782_v23 = vmul.f32 -1.442695, %v2326_v45 }
 0x437   :  { %v5753_v12 = vpop.eup %5752  ;;  %v6914_v29 = vadd.f32 1.0, %v5751_v25  ;;  %5754 = vpow2.f32 %v4780_v2  ;;  %2671 = vmatpush.bf16.msra.mxu0 %v4867_v54 }
 0x438   :  { %v6918_v14 = vadd.f32 1.0, %v5753_v12  ;;  %5756 = vpow2.f32 %v4781_v36  ;;  %v4868_v12 = vld [vmem:[#allocation4 + $0xb0] sm:$0xf0] }
 0x439   :  { %5758 = vrcp.f32 %v6914_v29  ;;  %v2362_v20 = vand.u32 2147483647, %v6914_v29  ;;  %v2364_v34 = vand.u32 2147483648, %v6914_v29  ;;  %vm2358_vm3 = vweird.f32 %v6914_v29 }
 0x43a   :  { %5760 = vrcp.f32 %v6918_v14  ;;  %v2304_v41 = vpop.f32.mrf.mxu2  ;;  %v2318_v28 = vpop.f32.mrf.mxu3  ;;  %v2379_v8 = vand.u32 2147483648, %v6918_v14  ;;  %v2377_v57 = vand.u32 2147483647, %v6918_v14  ;;  %vm2373_vm5 = vweird.f32 %v6918_v14 }
 0x43b   :  { %5762 = vpow2.f32 %v4782_v23  ;;  %v2327_v19 = vadd.f32 %v2304_v41, %v312_v16  ;;  %v2328_v45 = vadd.f32 %v2318_v28, %v361_v10  ;;  %vm6945_vm4 = vcmp.eq.f32.partialorder %v2362_v20, 8.507059e+37  ;;  %v5477_v10 = vld [vmem:[#allocation4 + $0xb4] sm:$0xf0] }
 0x43c   :  { %5764 = vtanh.f32 %v2324_v39  ;;  %v2365_v36 = vor.u32 1.1754944e-38, %v2364_v34  ;;  %v2380_v32 = vor.u32 1.1754944e-38, %v2379_v8  ;;  %vm6957_vm8 = vcmp.eq.f32.partialorder %v2377_v57, 8.507059e+37  ;;  %v4858_v34 = vld [vmem:[#allocation4 + $0x88] sm:$0xf] }
 0x43d   :  { %v5755_v53 = vpop.eup %5754  ;;  %v4783_v42 = vmul.f32 -1.442695, %v2327_v19  ;;  %v4871_v41 = vor.u32 %v5474_v38, %v4868_v12  ;;  %v4851_v38 = vor.u32 %v5472_v7, %v4850_v63 }
 0x43e   :  { %v5757_v61 = vpop.eup %5756  ;;  %v6926_v5 = vadd.f32 1.0, %v5755_v53 }
 0x43f   :  { %v6929_v22 = vpop.eup %5758  ;;  %v6932_v62 = vadd.f32 1.0, %v5757_v61  ;;  %5766 = vpow2.f32 %v4783_v42  ;;  %2685 = vmatpush.bf16.msra.mxu1 %v4871_v41  ;;  %v4852_v61 = vld [vmem:[#allocation4 + $0x90] sm:$0xf0]  ;;  %2672 = vmatpush.bf16.msra.mxu0 %v4851_v38  ;;  %v5459_v38 = vld [vmem:[#allocation4 + $0x2c] sm:$0xf] }
 0x440   :  { %v6934_v40 = vpop.eup %5760  ;;  %v2354_v52 = vmul.f32 %v6929_v22, %v6914_v29  ;;  %5768 = vrcp.f32 %v6926_v5  ;;  %vm2359_vm6 = vweird.f32 %v6929_v22  ;;  %v2394_v43 = vand.u32 2147483648, %v6926_v5 }
 0x441   :  { %v5763_v11 = vpop.eup %5762  ;;  %v2369_v51 = vmul.f32 %v6934_v40, %v6918_v14  ;;  %5770 = vrcp.f32 %v6932_v62  ;;  %vm2374_vm7 = vweird.f32 %v6934_v40  ;;  %v2407_v39 = vand.u32 2147483647, %v6932_v62  ;;  %vm6978_vm9 = vmor %vm2358_vm3, %vm2359_vm6 }
 0x442   :  { %v2355_v2 = vsub.f32 1.0, %v2354_v52  ;;  %v6949_v46 = vadd.f32 1.0, %v5763_v11  ;;  %v5765_v23 = vpop.eup %5764  ;;  %v2409_v27 = vand.u32 2147483648, %v6932_v62  ;;  %vm6988_vm10 = vmor %vm2373_vm5, %vm2374_vm7  ;;  %vm2403_vm11 = vweird.f32 %v6932_v62  ;;  %v5471_v11 = vld [vmem:[#allocation4 + $0x8c] sm:$0xf] }
 0x443   :  { %v2370_v25 = vsub.f32 1.0, %v2369_v51  ;;  %vm7010_vm12 = vcmp.eq.f32.partialorder %v2407_v39, 8.507059e+37  ;;  %v4860_v51 = vld [vmem:[#allocation4 + $0x98] sm:$0xf0]  ;;  %v4855_v12 = vor.u32 %v5470_v17, %v4852_v61  ;;  %v5467_v39 = vld [vmem:[#allocation4 + $0x6c] sm:$0xf] }
 0x444   :  { %v2356_v4 = vmul.f32 %v6929_v22, %v2355_v2  ;;  %5772 = vrcp.f32 %v6949_v46  ;;  %v2424_v42 = vand.u32 2147483648, %v6949_v46  ;;  %v2422_v0 = vand.u32 2147483647, %v6949_v46  ;;  %v4826_v17 = vld [vmem:[#allocation4 + $0x48] sm:$0xf] }
 0x445   :  { %v5767_v48 = vpop.eup %5766  ;;  %v2371_v9 = vmul.f32 %v6934_v40, %v2370_v25  ;;  %5774 = vtanh.f32 %v2328_v45  ;;  %v2410_v24 = vor.u32 1.1754944e-38, %v2409_v27  ;;  %v4875_v45 = vor.u32 %v5477_v10, %v4874_v21  ;;  %v5468_v25 = vld [vmem:[#allocation4 + $0x6c] sm:$0xf0]  ;;  %2686 = vmatpush.bf16.msra.mxu1 %v4855_v12  ;;  %v4844_v21 = vld [vmem:[#allocation4 + $0x78] sm:$0xf0] }
 0x446   :  { %v6961_v16 = vpop.eup %5768  ;;  %v2357_v58 = vadd.f32 %v6929_v22, %v2356_v4  ;;  %v6964_v6 = vadd.f32 1.0, %v5767_v48  ;;  %v4879_v2 = vor.u32 %v5475_v60, %v4876_v31  ;;  %v4859_v48 = vor.u32 %v5473_v18, %v4858_v34  ;;  %v4818_v10 = vld [vmem:[#allocation4 + $0x40] sm:$0xf]  ;;  %v5465_v61 = vld [vmem:[#allocation4 + $0x54] sm:$0xf0] }
 0x447   :  { %v6967_v30 = vpop.eup %5770  ;;  %v6971_v33 = vmul.f32 %v6961_v16, %v6926_v5  ;;  %v2372_v47 = vadd.f32 %v6934_v40, %v2371_v9  ;;  %2699 = vmatpush.bf16.msrb.mxu2 %v4875_v45  ;;  %v4863_v9 = vor.u32 %v5471_v11, %v4860_v51  ;;  %vm7037_vm0 = vcmp.eq.f32.partialorder %v2422_v0, 8.507059e+37  ;;  %v4828_v34 = vld [vmem:[#allocation4 + $0x58] sm:$0xf0]  ;;  %v4802_v18 = vld [vmem:[#allocation4 + $0x20] sm:$0xf] }
 0x448   :  { %v2361_v29 = vsel %vm6978_vm9, %v6929_v22, %v2357_v58  ;;  %v2399_v53 = vmul.f32 %v6967_v30, %v6932_v62  ;;  %5776 = vrcp.f32 %v6964_v6  ;;  %vm2404_vm13 = vweird.f32 %v6967_v30  ;;  %2713 = vmatpush.bf16.msrb.mxu3 %v4879_v2  ;;  %v5469_v58 = vld [vmem:[#allocation4 + $0x74] sm:$0xf0]  ;;  %v4812_v12 = vld [vmem:[#allocation4 + $0x38] sm:$0xf0] }
 0x449   :  { %v2366_v14 = vsel %vm6945_vm4, %v2365_v36, %v2361_v29  ;;  %v2376_v49 = vsel %vm6988_vm10, %v6934_v40, %v2372_v47  ;;  %v2385_v52 = vsub.f32 1.0, %v6971_v33  ;;  %v2425_v33 = vor.u32 1.1754944e-38, %v2424_v42  ;;  %vm7033_vm15 = vmor %vm2403_vm11, %vm2404_vm13  ;;  %v5462_v29 = vld [vmem:[#allocation4 + $0x44] sm:$0xf]  ;;  %v4794_v47 = vld [vmem:[#allocation4 + $0x8] sm:$0xf] }
 0x44a   :  { %v7006_v20 = vpop.eup %5772  ;;  %v2381_v28 = vsel %vm6957_vm8, %v2380_v32, %v2376_v49  ;;  %v2447_v35 = vmul.f32 %v5765_v23, %v2366_v14  ;;  %v2400_v13 = vsub.f32 1.0, %v2399_v53  ;;  %v4836_v23 = vld [vmem:[#allocation4 + $0x70] sm:$0xf0]  ;;  %vm2418_vm1 = vweird.f32 %v6949_v46 }
 0x44b   :  { %v5775_v40 = vpop.eup %5774  ;;  %v2445_v8 = vmul.f32 %v2381_v28, %v6832_v59  ;;  %v2414_v50 = vmul.f32 %v7006_v20, %v6949_v46  ;;  %v5466_v59 = vld [vmem:[#allocation4 + $0x64] sm:$0xf]  ;;  %vm2419_vm14 = vweird.f32 %v7006_v20  ;;  %v4835_v31 = vor.u32 %v5468_v25, %v4834_v44  ;;  %v4820_v53 = vld [vmem:[#allocation4 + $0x50] sm:$0xf0]  ;;  %2700 = vmatpush.bf16.msrb.mxu2 %v4859_v48  ;;  %v5463_v28 = vld [vmem:[#allocation4 + $0x4c] sm:$0xf] }
 0x44c   :  { %v2401_v57 = vmul.f32 %v6967_v30, %v2400_v13  ;;  %v4839_v62 = vor.u32 %v5466_v59, %v4836_v23  ;;  %v2386_v42 = vmul.f32 %v6961_v16, %v2385_v52  ;;  %vm7048_vm2 = vmor %vm2418_vm1, %vm2419_vm14  ;;  %vm2389_vm3 = vweird.f32 %v6961_v16  ;;  %2714 = vmatpush.bf16.msrb.mxu3 %v4863_v9  ;;  %v4810_v44 = vld [vmem:[#allocation4 + $0x28] sm:$0xf]  ;;  %v5461_v25 = vld [vmem:[#allocation4 + $0x34] sm:$0xf0] }
 0x44d   :  { %v7020_v36 = vadd.f32 %v2447_v35, %v2445_v8  ;;  %v2415_v54 = vsub.f32 1.0, %v2414_v50  ;;  %v4843_v49 = vor.u32 %v5469_v58, %v4842_v15  ;;  %v4847_v0 = vor.u32 %v5467_v39, %v4844_v21  ;;  %2673 = vmatpush.bf16.msra.mxu0 %v4835_v31  ;;  %v5458_v50 = vld [vmem:[#allocation4 + $0x24] sm:$0xf]  ;;  %v4786_v59 = vld [vmem:[#allocation4] sm:$0xf] }
 0x44e   :  { %v7022_v32 = vpop.eup %5776  ;;  %v2402_v4 = vadd.f32 %v6967_v30, %v2401_v57  ;;  %2687 = vmatpush.bf16.msra.mxu1 %v4839_v62  ;;  %v4819_v13 = vor.u32 %v5464_v3, %v4818_v10  ;;  %v4823_v22 = vor.u32 %v5462_v29, %v4820_v53  ;;  %vm2388_vm4 = vweird.f32 %v6926_v5  ;;  %v5454_v48 = vld [vmem:[#allocation4 + $0x4] sm:$0xf]  ;;  %v4788_v9 = vld [vmem:[#allocation4 + $0x10] sm:$0xf0]  ;;  %v4796_v31 = vld [vmem:[#allocation4 + $0x18] sm:$0xf0] }
 0x44f   :  { %v2416_v41 = vmul.f32 %v7006_v20, %v2415_v54  ;;  %v2429_v19 = vmul.f32 %v7022_v32, %v6964_v6  ;;  %5778 = vtanh.f32 %v7020_v36  ;;  %v2395_v11 = vor.u32 1.1754944e-38, %v2394_v43  ;;  %vm7069_vm5 = vmor %vm2388_vm4, %vm2389_vm3  ;;  %2701 = vmatpush.bf16.msrb.mxu2 %v4843_v49 }
 0x450   :  { %v2406_v60 = vsel %vm7033_vm15, %v6967_v30, %v2402_v4  ;;  %2715 = vmatpush.bf16.msrb.mxu3 %v4847_v0  ;;  %v4827_v57 = vor.u32 %v5465_v61, %v4826_v17  ;;  %v4831_v45 = vor.u32 %v5463_v28, %v4828_v34  ;;  %v2392_v54 = vand.u32 2147483647, %v6926_v5  ;;  %v5456_v4 = vld [vmem:[#allocation4 + $0xc] sm:$0xf0] }
 0x451   :  { %v2430_v7 = vsub.f32 1.0, %v2429_v19  ;;  %v2411_v46 = vsel %vm7010_vm12, %v2410_v24, %v2406_v60  ;;  %v2417_v14 = vadd.f32 %v7006_v20, %v2416_v41  ;;  %v4804_v24 = vld [vmem:[#allocation4 + $0x30] sm:$0xf0]  ;;  %vm2434_vm6 = vweird.f32 %v7022_v32  ;;  %2674 = vmatpush.bf16.msra.mxu0 %v4819_v13  ;;  %v5457_v60 = vld [vmem:[#allocation4 + $0x14] sm:$0xf0]  ;;  %v7825_v41 = vld [vmem:[#allocation35_spill] sm:$0xff] }
 0x452   :  { %v2448_v30 = vmul.f32 %v5775_v40, %v2411_v46  ;;  %v5460_v40 = vld [vmem:[#allocation4 + $0x2c] sm:$0xf0]  ;;  %2688 = vmatpush.bf16.msra.mxu1 %v4823_v22  ;;  %v2387_v23 = vadd.f32 %v6961_v16, %v2386_v42  ;;  %vm2433_vm7 = vweird.f32 %v6964_v6  ;;  %v2439_v5 = vand.u32 2147483648, %v6964_v6  ;;  %v7820_v22 = vld [vmem:[#allocation12_spill] sm:$0xff] }
 0x453   :  { %v2421_v35 = vsel %vm7048_vm2, %v7006_v20, %v2417_v14  ;;  %v2431_v52 = vmul.f32 %v7022_v32, %v2430_v7  ;;  %v4803_v2 = vor.u32 %v5460_v40, %v4802_v18  ;;  %vm7087_vm8 = vmor %vm2433_vm7, %vm2434_vm6  ;;  %2702 = vmatpush.bf16.msrb.mxu2 %v4827_v57  ;;  %v4815_v19 = vor.u32 %v5459_v38, %v4812_v12 }
 0x454   :  { %v2426_v8 = vsel %vm7037_vm0, %v2425_v33, %v2421_v35  ;;  %v2391_v39 = vsel %vm7069_vm5, %v6961_v16, %v2387_v23  ;;  %2716 = vmatpush.bf16.msrb.mxu3 %v4831_v45  ;;  %v4811_v33 = vor.u32 %v5461_v25, %v4810_v44  ;;  %vm2393_vm9 = vcmp.eq.f32.partialorder %v2392_v54, 8.507059e+37  ;;  %v5455_v16 = vld [vmem:[#allocation4 + $0xc] sm:$0xf]  ;;  %v7819_v35 = vld [vmem:[#allocation11_spill] sm:$0xff] }
 0x455   :  { %v2446_v20 = vmul.f32 %v2426_v8, %v6888_v26  ;;  %v4807_v26 = vor.u32 %v5458_v50, %v4804_v24  ;;  %v2432_v15 = vadd.f32 %v7022_v32, %v2431_v52  ;;  %v5779_v58 = vpop.eup %5778  ;;  %v2437_v27 = vand.u32 2147483647, %v6964_v6  ;;  %2675 = vmatpush.bf16.msra.mxu0 %v4803_v2  ;;  %v7821_v52 = vld [vmem:[#allocation33_spill] sm:$0xff] }
 0x456   :  { %v4787_v21 = vor.u32 %v5456_v4, %v4786_v59  ;;  %v4791_v10 = vor.u32 %v5454_v48, %v4788_v9  ;;  %v2396_v62 = vsel %vm2393_vm9, %v2395_v11, %v2391_v39  ;;  %v2440_v53 = vor.u32 1.1754944e-38, %v2439_v5  ;;  %v7822_v50 = vld [vmem:[#allocation13_spill] sm:$0xff]  ;;  %v7823_v11 = vld [vmem:[#allocation14_spill] sm:$0xff]  ;;  %v5032_v48 = vld [vmem:[#allocation4 + $0xe0] sm:$0xf] }
 0x457   :  { %v7075_v43 = vadd.f32 %v2448_v30, %v2446_v20  ;;  %2689 = vmatpush.bf16.msra.mxu1 %v4807_v26  ;;  %v2436_v3 = vsel %vm7087_vm8, %v7022_v32, %v2432_v15  ;;  %v2453_v29 = vmul.f32 %v5779_v58, %v2396_v62  ;;  %2703 = vmatpush.bf16.msrb.mxu2 %v4811_v33  ;;  %vm2438_vm10 = vcmp.eq.f32.partialorder %v2437_v27, 8.507059e+37  ;;  %v5516_v9 = vld [vmem:[#allocation4 + $0xec] sm:$0xf0]  ;;  %v7824_v15 = vld [vmem:[#allocation34_spill] sm:$0xff]  ;;  %v5515_v62 = vld [vmem:[#allocation4 + $0xec] sm:$0xf] }
 0x458   :  { %2717 = vmatpush.bf16.msrb.mxu3 %v4815_v19  ;;  %v4795_v42 = vor.u32 %v5457_v60, %v4794_v47  ;;  %v4799_v63 = vor.u32 %v5455_v16, %v4796_v31  ;;  %v2441_v7 = vsel %vm2438_vm10, %v2440_v53, %v2436_v3  ;;  %v315_v8 = vadd.f32 %v7821_v52, %v6295_v37  ;;  %v5514_v19 = vld [vmem:[#allocation4 + $0xe4] sm:$0xf]  ;;  %v5034_v47 = vld [vmem:[#allocation4 + $0xf0] sm:$0xf0]  ;;  %v5517_v60 = vld [vmem:[#allocation4 + $0xf4] sm:$0xf0] }
 0x459   :  { %5780 = vtanh.f32 %v7075_v43  ;;  %2676 = vmatpush.bf16.msra.mxu0 %v4787_v21  ;;  %v2455_v14 = vpack.c.bf16 %v2453_v29, %v2453_v29  ;;  %v219_v24 = vadd.f32 %v7822_v50, %v6106_v55  ;;  %v268_v20 = vadd.f32 %v7823_v11, %v6111_v56  ;;  %v5042_v3 = vld [vmem:[#allocation4 + $0xf8] sm:$0xf0] }
 0x45a   :  { %v364_v58 = vadd.f32 %v7824_v15, %v6302_v1  ;;  %v5033_v39 = vor.u32 %v5516_v9, %v5032_v48  ;;  %v317_v33 = vadd.f32 %v7825_v41, %v6295_v37  ;;  %v5037_v53 = vor.u32 %v5514_v19, %v5034_v47  ;;  %v5508_v48 = vld [vmem:[#allocation4 + $0xac] sm:$0xf0] }
 0x45b   :  { %2690 = vmatpush.bf16.msra.mxu1 %v4791_v10  ;;  %2704 = vmatpush.bf16.msrb.mxu2 %v4795_v42  ;;  %v2505_v0 = vunpack.c.l.b16 %v2455_v14  ;;  %v5040_v10 = vld [vmem:[#allocation4 + $0xe8] sm:$0xf]  ;;  %v5016_v42 = vld [vmem:[#allocation4 + $0xc0] sm:$0xf]  ;;  %v5045_v14 = vor.u32 %v5515_v62, %v5042_v3 }
 0x45c   :  { %2718 = vmatpush.bf16.msrb.mxu3 %v4799_v63  ;;  %v5512_v63 = vld [vmem:[#allocation4 + $0xcc] sm:$0xf0]  ;;  %v4976_v3 = vld [vmem:[#allocation4 + $0x68] sm:$0xf] }
 0x45d   :  { %3073 = vmatpush.bf16.msrb.mxu0 %v5033_v39 }
 0x45f   :  { %v5781_v6 = vpop.eup %5780  ;;  %3087 = vmatpush.bf16.msrb.mxu1 %v5037_v53  ;;  %v5506_v53 = vld [vmem:[#allocation4 + $0xa4] sm:$0xf] }
 0x460   :  { %v2454_v46 = vmul.f32 %v5781_v6, %v2441_v7  ;;  %3115 = vmatpush.bf16.msra.mxu3 %v5045_v14  ;;  %v5507_v14 = vld [vmem:[#allocation4 + $0xac] sm:$0xf] }
 0x462   :  { %v2456_v30 = vpack.c.bf16 %v2454_v46, %v2454_v46  ;;  %v5597_v49 = vpack.c.bf16 %v2454_v46, %v2453_v29  ;;  %v5041_v46 = vor.u32 %v5517_v60, %v5040_v10 }
 0x464   :  { %5598 = vst [vmem:[#allocation3 + $0x8] sm:$0xff] %v5597_v49   ;;  %v2506_v32 = vunpack.c.l.b16 %v2456_v30  ;;  %v5017_v30 = vor.u32 %v5512_v63, %v5016_v42  ;;  %v5510_v49 = vld [vmem:[#allocation4 + $0xc4] sm:$0xf]  ;;  %3101 = vmatpush.bf16.msra.mxu2 %v5041_v46  ;;  %v5002_v42 = vld [vmem:[#allocation4 + $0xb0] sm:$0xf0] }
 0x465   :  { %v5008_v63 = vld [vmem:[#allocation4 + $0xa8] sm:$0xf]  ;;  %v5509_v46 = vld [vmem:[#allocation4 + $0xb4] sm:$0xf0] }
 0x466   :  { %v2507_v17 = vpack.c.b16 %v2506_v32, %v2505_v0  ;;  %v5018_v0 = vld [vmem:[#allocation4 + $0xd0] sm:$0xf0]  ;;  %3074 = vmatpush.bf16.msrb.mxu0 %v5017_v30  ;;  %v5010_v30 = vld [vmem:[#allocation4 + $0xb8] sm:$0xf0] }
 0x468   :  { %2677 = vmatmul.bf16.vlgmr.msra.gmra.mxu0 %v2507_v17  ;;  %2691 = vmatmul.bf16.vlgmr.msra.gmra.mxu1 %v2507_v17 }
 0x469   :  { %2705 = vmatmul.bf16.vlgmr.msrb.gmra.mxu2 %v2507_v17  ;;  %2719 = vmatmul.bf16.vlgmr.msrb.gmra.mxu3 %v2507_v17 }
 0x4e5   :  { %v2678_v61 = vpop.f32.mrf.mxu0  ;;  %v2692_v28 = vpop.f32.mrf.mxu1 }
 0x4e6   :  { %v2725_v13 = vadd.f32 %v2678_v61, %v7819_v35  ;;  %v2726_v34 = vadd.f32 %v2692_v28, %v7820_v22  ;;  %v5021_v28 = vor.u32 %v5510_v49, %v5018_v0  ;;  %v5024_v35 = vld [vmem:[#allocation4 + $0xc8] sm:$0xf] }
 0x4e8   :  { %v4912_v18 = vmul.f32 -1.442695, %v2725_v13  ;;  %v4913_v40 = vmul.f32 -1.442695, %v2726_v34  ;;  %v5513_v13 = vld [vmem:[#allocation4 + $0xd4] sm:$0xf0]  ;;  %3088 = vmatpush.bf16.msrb.mxu1 %v5021_v28 }
 0x4e9   :  { %v7826_v34 = vld [vmem:[#allocation36_spill] sm:$0xff]  ;;  %v5025_v52 = vor.u32 %v5513_v13, %v5024_v35  ;;  %v4984_v28 = vld [vmem:[#allocation4 + $0x80] sm:$0xf]  ;;  %v5504_v35 = vld [vmem:[#allocation4 + $0x8c] sm:$0xf0] }
 0x4ea   :  { %5782 = vpow2.f32 %v4912_v18  ;;  %v366_v18 = vadd.f32 %v7826_v34, %v6302_v1 }
 0x4eb   :  { %5784 = vpow2.f32 %v4913_v40  ;;  %3102 = vmatpush.bf16.msra.mxu2 %v5025_v52 }
 0x4ec   :  { %v2706_v51 = vpop.f32.mrf.mxu2  ;;  %v2720_v38 = vpop.f32.mrf.mxu3 }
 0x4ed   :  { %v2727_v57 = vadd.f32 %v2706_v51, %v315_v8  ;;  %v2680_v45 = vpop.f32.mrf.mxu0  ;;  %v2694_v2 = vpop.f32.mrf.mxu1  ;;  %v2728_v27 = vadd.f32 %v2720_v38, %v364_v58  ;;  %v5026_v51 = vld [vmem:[#allocation4 + $0xd8] sm:$0xf0] }
 0x4ee   :  { %v2729_v44 = vadd.f32 %v2680_v45, %v219_v24  ;;  %v2730_v25 = vadd.f32 %v2694_v2, %v268_v20  ;;  %v5511_v20 = vld [vmem:[#allocation4 + $0xcc] sm:$0xf] }
 0x4ef   :  { %v4914_v54 = vmul.f32 -1.442695, %v2727_v57 }
 0x4f0   :  { %v5783_v26 = vpop.eup %5782  ;;  %v4915_v12 = vmul.f32 -1.442695, %v2729_v44  ;;  %v4916_v59 = vmul.f32 -1.442695, %v2730_v25 }
 0x4f1   :  { %v5785_v23 = vpop.eup %5784  ;;  %v7103_v4 = vadd.f32 1.0, %v5783_v26  ;;  %5786 = vpow2.f32 %v4914_v54 }
 0x4f2   :  { %v7107_v5 = vadd.f32 1.0, %v5785_v23  ;;  %5788 = vpow2.f32 %v4915_v12  ;;  %v5000_v23 = vld [vmem:[#allocation4 + $0xa0] sm:$0xf] }
 0x4f3   :  { %5790 = vrcp.f32 %v7103_v4  ;;  %v2766_v16 = vand.u32 2147483647, %v7103_v4  ;;  %v2768_v29 = vand.u32 2147483648, %v7103_v4  ;;  %vm2762_vm11 = vweird.f32 %v7103_v4 }
 0x4f4   :  { %5792 = vrcp.f32 %v7107_v5  ;;  %v2708_v21 = vpop.f32.mrf.mxu2  ;;  %v2783_v17 = vand.u32 2147483648, %v7107_v5  ;;  %v2781_v24 = vand.u32 2147483647, %v7107_v5  ;;  %v2722_v11 = vpop.f32.mrf.mxu3  ;;  %vm2777_vm12 = vweird.f32 %v7107_v5 }
 0x4f5   :  { %5794 = vpow2.f32 %v4916_v59  ;;  %v2731_v31 = vadd.f32 %v2708_v21, %v317_v33  ;;  %vm7134_vm13 = vcmp.eq.f32.partialorder %v2766_v16, 8.507059e+37  ;;  %v2769_v54 = vor.u32 1.1754944e-38, %v2768_v29  ;;  %v5498_v21 = vld [vmem:[#allocation4 + $0x64] sm:$0xf] }
 0x4f6   :  { %5796 = vtanh.f32 %v2728_v27  ;;  %v2784_v25 = vor.u32 1.1754944e-38, %v2783_v17  ;;  %v2732_v12 = vadd.f32 %v2722_v11, %v366_v18  ;;  %v5029_v59 = vor.u32 %v5511_v20, %v5026_v51  ;;  %v4992_v51 = vld [vmem:[#allocation4 + $0x88] sm:$0xf] }
 0x4f7   :  { %v5787_v6 = vpop.eup %5786  ;;  %v4917_v7 = vmul.f32 -1.442695, %v2731_v31  ;;  %vm7144_vm0 = vcmp.eq.f32.partialorder %v2781_v24, 8.507059e+37  ;;  %v5001_v31 = vor.u32 %v5508_v48, %v5000_v23  ;;  %v4986_v24 = vld [vmem:[#allocation4 + $0x90] sm:$0xf0]  ;;  %v5013_v23 = vor.u32 %v5507_v14, %v5010_v30 }
 0x4f8   :  { %v5789_v32 = vpop.eup %5788  ;;  %v7116_v61 = vadd.f32 1.0, %v5787_v6  ;;  %3116 = vmatpush.bf16.msra.mxu3 %v5029_v59  ;;  %v4985_v48 = vor.u32 %v5504_v35, %v4984_v28  ;;  %v5494_v28 = vld [vmem:[#allocation4 + $0x44] sm:$0xf]  ;;  %v4954_v35 = vld [vmem:[#allocation4 + $0x50] sm:$0xf0] }
 0x4f9   :  { %v7118_v22 = vpop.eup %5790  ;;  %v7122_v40 = vadd.f32 1.0, %v5789_v32  ;;  %5798 = vpow2.f32 %v4917_v7  ;;  %3075 = vmatpush.bf16.msrb.mxu0 %v5001_v31 }
 0x4fa   :  { %v7124_v8 = vpop.eup %5792  ;;  %v2758_v50 = vmul.f32 %v7118_v22, %v7103_v4  ;;  %5800 = vrcp.f32 %v7116_v61  ;;  %vm2763_vm15 = vweird.f32 %v7118_v22  ;;  %v2798_v33 = vand.u32 2147483648, %v7116_v61 }
 0x4fb   :  { %v5795_v57 = vpop.eup %5794  ;;  %v2773_v45 = vmul.f32 %v7124_v8, %v7107_v5  ;;  %5802 = vrcp.f32 %v7122_v40  ;;  %vm2778_vm14 = vweird.f32 %v7124_v8  ;;  %v2811_v19 = vand.u32 2147483647, %v7122_v40  ;;  %vm7173_vm2 = vmor %vm2762_vm11, %vm2763_vm15 }
 0x4fc   :  { %v2759_v44 = vsub.f32 1.0, %v2758_v50  ;;  %v7139_v26 = vadd.f32 1.0, %v5795_v57  ;;  %v5797_v9 = vpop.eup %5796  ;;  %v2813_v47 = vand.u32 2147483648, %v7122_v40  ;;  %vm7159_vm1 = vmor %vm2777_vm12, %vm2778_vm14  ;;  %vm2807_vm3 = vweird.f32 %v7122_v40  ;;  %v5502_v50 = vld [vmem:[#allocation4 + $0x84] sm:$0xf]  ;;  %3117 = vmatpush.bf16.msra.mxu3 %v5013_v23 }
 0x4fd   :  { %v2774_v38 = vsub.f32 1.0, %v2773_v45  ;;  %vm7195_vm4 = vcmp.eq.f32.partialorder %v2811_v19, 8.507059e+37  ;;  %v5505_v57 = vld [vmem:[#allocation4 + $0x94] sm:$0xf0]  ;;  %v4989_v19 = vor.u32 %v5502_v50, %v4986_v24  ;;  %3076 = vmatpush.bf16.msrb.mxu0 %v4985_v48  ;;  %v5495_v50 = vld [vmem:[#allocation4 + $0x4c] sm:$0xf]  ;;  %vm2792_vm12 = vweird.f32 %v7116_v61 }
 0x4fe   :  { %v2760_v15 = vmul.f32 %v7118_v22, %v2759_v44  ;;  %5804 = vrcp.f32 %v7139_v26  ;;  %v2828_v60 = vand.u32 2147483648, %v7139_v26  ;;  %v2826_v29 = vand.u32 2147483647, %v7139_v26  ;;  %v4962_v24 = vld [vmem:[#allocation4 + $0x58] sm:$0xf0] }
 0x4ff   :  { %v5799_v39 = vpop.eup %5798  ;;  %v2775_v41 = vmul.f32 %v7124_v8, %v2774_v38  ;;  %5806 = vtanh.f32 %v2732_v12  ;;  %v2814_v17 = vor.u32 1.1754944e-38, %v2813_v47  ;;  %v5005_v44 = vor.u32 %v5506_v53, %v5002_v42  ;;  %v4994_v38 = vld [vmem:[#allocation4 + $0x98] sm:$0xf0]  ;;  %v5491_v23 = vld [vmem:[#allocation4 + $0x2c] sm:$0xf] }
 0x500   :  { %v7153_v27 = vpop.eup %5800  ;;  %v2761_v10 = vadd.f32 %v7118_v22, %v2760_v15  ;;  %v7165_v16 = vadd.f32 1.0, %v5799_v39  ;;  %v7203_v52 = vor.u32 1.1754944e-38, %v2828_v60  ;;  %vm7209_vm6 = vcmp.eq.f32.partialorder %v2826_v29, 8.507059e+37  ;;  %v5500_v15 = vld [vmem:[#allocation4 + $0x6c] sm:$0xf0] }
 0x501   :  { %v7167_v62 = vpop.eup %5802  ;;  %v2776_v5 = vadd.f32 %v7124_v8, %v2775_v41  ;;  %v7182_v6 = vmul.f32 %v7153_v27, %v7116_v61  ;;  %3089 = vmatpush.bf16.msrb.mxu1 %v5005_v44  ;;  %v4993_v47 = vor.u32 %v5505_v57, %v4992_v51  ;;  %vm2822_vm9 = vweird.f32 %v7139_v26  ;;  %v4936_v51 = vld [vmem:[#allocation4 + $0x20] sm:$0xf]  ;;  %v5492_v57 = vld [vmem:[#allocation4 + $0x2c] sm:$0xf0] }
 0x502   :  { %v2765_v4 = vsel %vm7173_vm2, %v7118_v22, %v2761_v10  ;;  %v2803_v7 = vmul.f32 %v7167_v62, %v7122_v40  ;;  %5808 = vrcp.f32 %v7165_v16  ;;  %vm2808_vm5 = vweird.f32 %v7167_v62  ;;  %v4970_v10 = vld [vmem:[#allocation4 + $0x70] sm:$0xf0]  ;;  %v5499_v40 = vld [vmem:[#allocation4 + $0x6c] sm:$0xf] }
 0x503   :  { %v2770_v49 = vsel %vm7134_vm13, %v2769_v54, %v2765_v4  ;;  %v2780_v0 = vsel %vm7159_vm1, %v7124_v8, %v2776_v5  ;;  %v2789_v45 = vsub.f32 1.0, %v7182_v6  ;;  %v5503_v54 = vld [vmem:[#allocation4 + $0x8c] sm:$0xf]  ;;  %vm7225_vm8 = vmor %vm2807_vm3, %vm2808_vm5  ;;  %v5501_v5 = vld [vmem:[#allocation4 + $0x74] sm:$0xf0]  ;;  %vm2793_vm11 = vweird.f32 %v7153_v27 }
 0x504   :  { %v7199_v13 = vpop.eup %5804  ;;  %v2785_v22 = vsel %vm7144_vm0, %v2784_v25, %v2780_v0  ;;  %v2851_v34 = vmul.f32 %v5797_v9, %v2770_v49  ;;  %v2804_v18 = vsub.f32 1.0, %v2803_v7  ;;  %v5009_v25 = vor.u32 %v5509_v46, %v5008_v63  ;;  %v4968_v9 = vld [vmem:[#allocation4 + $0x60] sm:$0xf]  ;;  %v4978_v63 = vld [vmem:[#allocation4 + $0x78] sm:$0xf0]  ;;  %vm7261_vm13 = vmor %vm2792_vm12, %vm2793_vm11 }
 0x505   :  { %v2849_v8 = vmul.f32 %v2785_v22, %v7020_v36  ;;  %v2818_v11 = vmul.f32 %v7199_v13, %v7139_v26  ;;  %v5807_v36 = vpop.eup %5806  ;;  %vm2823_vm7 = vweird.f32 %v7199_v13  ;;  %v4997_v53 = vor.u32 %v5503_v54, %v4994_v38  ;;  %v4952_v6 = vld [vmem:[#allocation4 + $0x40] sm:$0xf]  ;;  %v5496_v4 = vld [vmem:[#allocation4 + $0x4c] sm:$0xf0]  ;;  %3090 = vmatpush.bf16.msrb.mxu1 %v4989_v19  ;;  %v4960_v22 = vld [vmem:[#allocation4 + $0x48] sm:$0xf] }
 0x506   :  { %v2805_v2 = vmul.f32 %v7167_v62, %v2804_v18  ;;  %3103 = vmatpush.bf16.msra.mxu2 %v5009_v25  ;;  %v4969_v42 = vor.u32 %v5500_v15, %v4968_v9  ;;  %v2790_v7 = vmul.f32 %v7153_v27, %v2789_v45  ;;  %vm7239_vm10 = vmor %vm2822_vm9, %vm2823_vm7  ;;  %v4973_v49 = vor.u32 %v5498_v21, %v4970_v10  ;;  %v5497_v18 = vld [vmem:[#allocation4 + $0x54] sm:$0xf0]  ;;  %v5490_v25 = vld [vmem:[#allocation4 + $0x24] sm:$0xf] }
 0x507   :  { %v7215_v12 = vadd.f32 %v2851_v34, %v2849_v8  ;;  %v2819_v59 = vsub.f32 1.0, %v2818_v11  ;;  %v4977_v0 = vor.u32 %v5501_v5, %v4976_v3  ;;  %3118 = vmatpush.bf16.msra.mxu3 %v4997_v53  ;;  %v4981_v32 = vor.u32 %v5499_v40, %v4978_v63  ;;  %v4938_v54 = vld [vmem:[#allocation4 + $0x30] sm:$0xf0]  ;;  %v4946_v9 = vld [vmem:[#allocation4 + $0x38] sm:$0xf0] }
 0x508   :  { %v7217_v58 = vpop.eup %5808  ;;  %v2806_v39 = vadd.f32 %v7167_v62, %v2805_v2  ;;  %3077 = vmatpush.bf16.msrb.mxu0 %v4969_v42  ;;  %v4957_v44 = vor.u32 %v5494_v28, %v4954_v35  ;;  %v4961_v20 = vor.u32 %v5497_v18, %v4960_v22  ;;  %v2796_v38 = vand.u32 2147483647, %v7116_v61  ;;  %v4920_v15 = vld [vmem:[#allocation4] sm:$0xf]  ;;  %v5489_v53 = vld [vmem:[#allocation4 + $0x14] sm:$0xf0] }
 0x509   :  { %v2820_v60 = vmul.f32 %v7199_v13, %v2819_v59  ;;  %v2833_v31 = vmul.f32 %v7217_v58, %v7165_v16  ;;  %5810 = vtanh.f32 %v7215_v12  ;;  %3091 = vmatpush.bf16.msrb.mxu1 %v4973_v49  ;;  %vm2838_vm14 = vweird.f32 %v7217_v58  ;;  %v5493_v59 = vld [vmem:[#allocation4 + $0x34] sm:$0xf0]  ;;  %v5487_v63 = vld [vmem:[#allocation4 + $0xc] sm:$0xf]  ;;  %v5150_v2 = vld [vmem:[#allocation4 + $0xc0] sm:$0xf] }
 0x50a   :  { %v2810_v29 = vsel %vm7225_vm8, %v7167_v62, %v2806_v39  ;;  %3104 = vmatpush.bf16.msra.mxu2 %v4993_v47  ;;  %v2791_v48 = vadd.f32 %v7153_v27, %v2790_v7  ;;  %v5488_v39 = vld [vmem:[#allocation4 + $0xc] sm:$0xf0]  ;;  %vm2837_vm15 = vweird.f32 %v7165_v16  ;;  %v2843_v61 = vand.u32 2147483648, %v7165_v16 }
 0x50b   :  { %v2834_v14 = vsub.f32 1.0, %v2833_v31  ;;  %v2815_v26 = vsel %vm7195_vm4, %v2814_v17, %v2810_v29  ;;  %v2821_v30 = vadd.f32 %v7199_v13, %v2820_v60  ;;  %v4953_v17 = vor.u32 %v5496_v4, %v4952_v6  ;;  %3119 = vmatpush.bf16.msra.mxu3 %v4981_v32  ;;  %vm7279_vm0 = vmor %vm2837_vm15, %vm2838_vm14  ;;  %v5486_v31 = vld [vmem:[#allocation4 + $0x4] sm:$0xf]  ;;  %v4922_v29 = vld [vmem:[#allocation4 + $0x10] sm:$0xf0] }
 0x50c   :  { %v2852_v62 = vmul.f32 %v5807_v36, %v2815_v26  ;;  %v4944_v36 = vld [vmem:[#allocation4 + $0x28] sm:$0xf]  ;;  %v2795_v47 = vsel %vm7261_vm13, %v7153_v27, %v2791_v48  ;;  %v4941_v10 = vor.u32 %v5490_v25, %v4938_v54  ;;  %vm2797_vm1 = vcmp.eq.f32.partialorder %v2796_v38, 8.507059e+37  ;;  %v4930_v6 = vld [vmem:[#allocation4 + $0x18] sm:$0xf0]  ;;  %v7850_v54 = vld [vmem:[#allocation17_spill] sm:$0xff] }
 0x50d   :  { %v2825_v34 = vsel %vm7239_vm10, %v7199_v13, %v2821_v30  ;;  %v2835_v8 = vmul.f32 %v7217_v58, %v2834_v14  ;;  %v2799_v13 = vor.u32 1.1754944e-38, %v2798_v33  ;;  %3078 = vmatpush.bf16.msrb.mxu0 %v4953_v17  ;;  %3092 = vmatpush.bf16.msrb.mxu1 %v4957_v44  ;;  %v4945_v60 = vor.u32 %v5493_v59, %v4944_v36  ;;  %v4928_v27 = vld [vmem:[#allocation4 + $0x8] sm:$0xf]  ;;  %v5166_v32 = vld [vmem:[#allocation4 + $0xe0] sm:$0xf] }
 0x50e   :  { %v2830_v11 = vsel %vm7209_vm6, %v7203_v52, %v2825_v34  ;;  %3105 = vmatpush.bf16.msra.mxu2 %v4977_v0  ;;  %v4965_v52 = vor.u32 %v5495_v50, %v4962_v24  ;;  %v2841_v3 = vand.u32 2147483647, %v7165_v16  ;;  %v4949_v5 = vor.u32 %v5491_v23, %v4946_v9  ;;  %v5548_v17 = vld [vmem:[#allocation4 + $0xec] sm:$0xf0]  ;;  %v5134_v23 = vld [vmem:[#allocation4 + $0xa0] sm:$0xf] }
 0x50f   :  { %v2850_v45 = vmul.f32 %v2830_v11, %v7075_v43  ;;  %v4937_v43 = vor.u32 %v5492_v57, %v4936_v51  ;;  %v2836_v41 = vadd.f32 %v7217_v58, %v2835_v8  ;;  %v5811_v19 = vpop.eup %5810  ;;  %v4921_v40 = vor.u32 %v5488_v39, %v4920_v15  ;;  %v7847_v8 = vld [vmem:[#allocation15_spill] sm:$0xff]  ;;  %v7848_v51 = vld [vmem:[#allocation16_spill] sm:$0xff]  ;;  %v5544_v44 = vld [vmem:[#allocation4 + $0xcc] sm:$0xf0] }
 0x510   :  { %3120 = vmatpush.bf16.msra.mxu3 %v4965_v52  ;;  %v2800_v42 = vsel %vm2797_vm1, %v2799_v13, %v2795_v47  ;;  %v2844_v46 = vor.u32 1.1754944e-38, %v2843_v61  ;;  %v4925_v14 = vor.u32 %v5486_v31, %v4922_v29  ;;  %v4929_v16 = vor.u32 %v5489_v53, %v4928_v27  ;;  %v7849_v52 = vld [vmem:[#allocation37_spill] sm:$0xff]  ;;  %v5118_v31 = vld [vmem:[#allocation4 + $0x80] sm:$0xf]  ;;  %v7852_v27 = vld [vmem:[#allocation38_spill] sm:$0xff] }
 0x511   :  { %v7267_v33 = vadd.f32 %v2852_v62, %v2850_v45  ;;  %3079 = vmatpush.bf16.msrb.mxu0 %v4937_v43  ;;  %v2840_v4 = vsel %vm7279_vm0, %v7217_v58, %v2836_v41  ;;  %v2857_v7 = vmul.f32 %v5811_v19, %v2800_v42  ;;  %3093 = vmatpush.bf16.msrb.mxu1 %v4941_v10  ;;  %vm2842_vm2 = vcmp.eq.f32.partialorder %v2841_v3, 8.507059e+37  ;;  %v7851_v43 = vld [vmem:[#allocation18_spill] sm:$0xff]  ;;  %v5540_v48 = vld [vmem:[#allocation4 + $0xac] sm:$0xf0] }
 0x512   :  { %3106 = vmatpush.bf16.msra.mxu2 %v4961_v20  ;;  %v4933_v30 = vor.u32 %v5487_v63, %v4930_v6  ;;  %v2845_v62 = vsel %vm2842_vm2, %v2844_v46, %v2840_v4  ;;  %v5167_v24 = vor.u32 %v5548_v17, %v5166_v32  ;;  %v5151_v20 = vor.u32 %v5544_v44, %v5150_v2  ;;  %v5536_v29 = vld [vmem:[#allocation4 + $0x8c] sm:$0xf0]  ;;  %v7853_v6 = vld [vmem:[#allocation39_spill] sm:$0xff]  ;;  %v5168_v46 = vld [vmem:[#allocation4 + $0xf0] sm:$0xf0] }
 0x513   :  { %5812 = vtanh.f32 %v7267_v33  ;;  %v2859_v0 = vpack.c.bf16 %v2857_v7, %v2857_v7  ;;  %v320_v25 = vadd.f32 %v7849_v52, %v6295_v37  ;;  %v224_v38 = vadd.f32 %v7850_v54, %v6106_v55  ;;  %v7854_v52 = vld [vmem:[#allocation40_spill] sm:$0xff] }
 0x514   :  { %3121 = vmatpush.bf16.msra.mxu3 %v4949_v5  ;;  %v273_v36 = vadd.f32 %v7851_v43, %v6111_v56  ;;  %v5135_v41 = vor.u32 %v5540_v48, %v5134_v23  ;;  %v369_v53 = vadd.f32 %v7852_v27, %v6302_v1  ;;  %v5119_v63 = vor.u32 %v5536_v29, %v5118_v31 }
 0x515   :  { %3080 = vmatpush.bf16.msrb.mxu0 %v4921_v40  ;;  %3094 = vmatpush.bf16.msrb.mxu1 %v4925_v14  ;;  %v2909_v58 = vunpack.c.l.b16 %v2859_v0  ;;  %v322_v4 = vadd.f32 %v7853_v6, %v6295_v37  ;;  %v5176_v0 = vld [vmem:[#allocation4 + $0xf8] sm:$0xf0] }
 0x516   :  { %3107 = vmatpush.bf16.msra.mxu2 %v4945_v60 }
 0x518   :  { %3122 = vmatpush.bf16.msra.mxu3 %v4933_v30  ;;  %v5549_v30 = vld [vmem:[#allocation4 + $0xf4] sm:$0xf0] }
 0x519   :  { %v5813_v26 = vpop.eup %5812  ;;  %3477 = vmatpush.bf16.msra.mxu0 %v5167_v24  ;;  %v5152_v24 = vld [vmem:[#allocation4 + $0xd0] sm:$0xf0] }
 0x51a   :  { %v2858_v49 = vmul.f32 %v5813_v26, %v2845_v62  ;;  %3108 = vmatpush.bf16.msra.mxu2 %v4929_v16  ;;  %v5174_v26 = vld [vmem:[#allocation4 + $0xe8] sm:$0xf]  ;;  %v5547_v62 = vld [vmem:[#allocation4 + $0xec] sm:$0xf] }
 0x51b   :  { %v5175_v17 = vor.u32 %v5549_v30, %v5174_v26  ;;  %v5110_v30 = vld [vmem:[#allocation4 + $0x68] sm:$0xf] }
 0x51c   :  { %v2860_v28 = vpack.c.bf16 %v2858_v49, %v2858_v49  ;;  %v5602_v35 = vpack.c.bf16 %v2858_v49, %v2857_v7  ;;  %v5546_v7 = vld [vmem:[#allocation4 + $0xe4] sm:$0xf] }
 0x51d   :  { %3478 = vmatpush.bf16.msra.mxu0 %v5151_v20 }
 0x51e   :  { %5603 = vst [vmem:[#allocation3 + $0x20] sm:$0xff] %v5602_v35   ;;  %v2910_v22 = vunpack.c.l.b16 %v2860_v28  ;;  %v5102_v28 = vld [vmem:[#allocation4 + $0x60] sm:$0xf]  ;;  %v5171_v35 = vor.u32 %v5546_v7, %v5168_v46  ;;  %3505 = vmatpush.bf16.msrb.mxu2 %v5175_v17  ;;  %v5539_v17 = vld [vmem:[#allocation4 + $0xac] sm:$0xf] }
 0x520   :  { %v2911_v34 = vpack.c.b16 %v2910_v22, %v2909_v58  ;;  %v5532_v58 = vld [vmem:[#allocation4 + $0x6c] sm:$0xf0]  ;;  %v5542_v22 = vld [vmem:[#allocation4 + $0xc4] sm:$0xf]  ;;  %3491 = vmatpush.bf16.msra.mxu1 %v5171_v35  ;;  %v5142_v35 = vld [vmem:[#allocation4 + $0xa8] sm:$0xf] }
 0x521   :  { %3479 = vmatpush.bf16.msra.mxu0 %v5135_v41 }
 0x522   :  { %3081 = vmatmul.bf16.vlgmr.msrb.gmra.mxu0 %v2911_v34  ;;  %3095 = vmatmul.bf16.vlgmr.msrb.gmra.mxu1 %v2911_v34 }
 0x523   :  { %3109 = vmatmul.bf16.vlgmr.msra.gmra.mxu2 %v2911_v34  ;;  %3123 = vmatmul.bf16.vlgmr.msra.gmra.mxu3 %v2911_v34 }
 0x525   :  { %3480 = vmatpush.bf16.msra.mxu0 %v5119_v63 }
 0x59f   :  { %v3082_v18 = vpop.f32.mrf.mxu0  ;;  %v3096_v50 = vpop.f32.mrf.mxu1 }
 0x5a0   :  { %v3129_v11 = vadd.f32 %v3082_v18, %v7847_v8  ;;  %v3130_v57 = vadd.f32 %v3096_v50, %v7848_v51  ;;  %v5179_v18 = vor.u32 %v5547_v62, %v5176_v0  ;;  %v5103_v50 = vor.u32 %v5532_v58, %v5102_v28  ;;  %v5158_v8 = vld [vmem:[#allocation4 + $0xc8] sm:$0xf]  ;;  %v5538_v0 = vld [vmem:[#allocation4 + $0xa4] sm:$0xf]  ;;  %v5136_v28 = vld [vmem:[#allocation4 + $0xb0] sm:$0xf0] }
 0x5a1   :  { %v5531_v58 = vld [vmem:[#allocation4 + $0x6c] sm:$0xf] }
 0x5a2   :  { %v5046_v13 = vmul.f32 -1.442695, %v3129_v11  ;;  %v5047_v45 = vmul.f32 -1.442695, %v3130_v57  ;;  %v5155_v57 = vor.u32 %v5542_v22, %v5152_v24  ;;  %3519 = vmatpush.bf16.msrb.mxu3 %v5179_v18  ;;  %3481 = vmatpush.bf16.msra.mxu0 %v5103_v50  ;;  %v5144_v50 = vld [vmem:[#allocation4 + $0xb8] sm:$0xf0] }
 0x5a3   :  { %v5070_v24 = vld [vmem:[#allocation4 + $0x20] sm:$0xf] }
 0x5a4   :  { %5814 = vpow2.f32 %v5046_v13  ;;  %v5545_v13 = vld [vmem:[#allocation4 + $0xd4] sm:$0xf0]  ;;  %3492 = vmatpush.bf16.msra.mxu1 %v5155_v57 }
 0x5a5   :  { %5816 = vpow2.f32 %v5047_v45  ;;  %v5159_v44 = vor.u32 %v5545_v13, %v5158_v8  ;;  %v5524_v8 = vld [vmem:[#allocation4 + $0x2c] sm:$0xf0] }
 0x5a6   :  { %v3110_v59 = vpop.f32.mrf.mxu2  ;;  %v3124_v10 = vpop.f32.mrf.mxu3 }
 0x5a7   :  { %v3131_v9 = vadd.f32 %v3110_v59, %v320_v25  ;;  %v3084_v15 = vpop.f32.mrf.mxu0  ;;  %v3098_v39 = vpop.f32.mrf.mxu1  ;;  %v3132_v14 = vadd.f32 %v3124_v10, %v369_v53  ;;  %v371_v25 = vadd.f32 %v7854_v52, %v6302_v1  ;;  %v5160_v59 = vld [vmem:[#allocation4 + $0xd8] sm:$0xf0]  ;;  %3506 = vmatpush.bf16.msrb.mxu2 %v5159_v44  ;;  %v5086_v10 = vld [vmem:[#allocation4 + $0x40] sm:$0xf]  ;;  %v5534_v52 = vld [vmem:[#allocation4 + $0x84] sm:$0xf] }
 0x5a8   :  { %v3133_v19 = vadd.f32 %v3084_v15, %v224_v38  ;;  %v3134_v61 = vadd.f32 %v3098_v39, %v273_v36  ;;  %v5543_v36 = vld [vmem:[#allocation4 + $0xcc] sm:$0xf] }
 0x5a9   :  { %v5048_v47 = vmul.f32 -1.442695, %v3131_v9 }
 0x5aa   :  { %v5815_v21 = vpop.eup %5814  ;;  %v5049_v60 = vmul.f32 -1.442695, %v3133_v19  ;;  %v5050_v40 = vmul.f32 -1.442695, %v3134_v61 }
 0x5ab   :  { %v5817_v3 = vpop.eup %5816  ;;  %v7295_v5 = vadd.f32 1.0, %v5815_v21  ;;  %5818 = vpow2.f32 %v5048_v47  ;;  %v5163_v21 = vor.u32 %v5543_v36, %v5160_v59  ;;  %v5126_v36 = vld [vmem:[#allocation4 + $0x88] sm:$0xf]  ;;  %v5537_v59 = vld [vmem:[#allocation4 + $0x94] sm:$0xf0] }
 0x5ac   :  { %v7299_v42 = vadd.f32 1.0, %v5817_v3  ;;  %5820 = vpow2.f32 %v5049_v60  ;;  %v5528_v60 = vld [vmem:[#allocation4 + $0x4c] sm:$0xf0] }
 0x5ad   :  { %5822 = vrcp.f32 %v7295_v5  ;;  %v3170_v38 = vand.u32 2147483647, %v7295_v5  ;;  %v3172_v15 = vand.u32 2147483648, %v7295_v5  ;;  %vm3166_vm3 = vweird.f32 %v7295_v5  ;;  %3520 = vmatpush.bf16.msrb.mxu3 %v5163_v21 }
 0x5ae   :  { %5824 = vrcp.f32 %v7299_v42  ;;  %v3112_v16 = vpop.f32.mrf.mxu2  ;;  %v3126_v43 = vpop.f32.mrf.mxu3  ;;  %v3187_v9 = vand.u32 2147483648, %v7299_v42  ;;  %v3185_v41 = vand.u32 2147483647, %v7299_v42  ;;  %vm3181_vm4 = vweird.f32 %v7299_v42 }
 0x5af   :  { %5826 = vpow2.f32 %v5050_v40  ;;  %v3135_v49 = vadd.f32 %v3112_v16, %v322_v4  ;;  %v3136_v47 = vadd.f32 %v3126_v43, %v371_v25  ;;  %vm7331_vm6 = vcmp.eq.f32.partialorder %v3170_v38, 8.507059e+37  ;;  %v5120_v25 = vld [vmem:[#allocation4 + $0x90] sm:$0xf0] }
 0x5b0   :  { %5828 = vtanh.f32 %v3132_v14  ;;  %v3188_v53 = vor.u32 1.1754944e-38, %v3187_v9  ;;  %v3173_v63 = vor.u32 1.1754944e-38, %v3172_v15  ;;  %vm7341_vm8 = vcmp.eq.f32.partialorder %v3185_v41, 8.507059e+37  ;;  %v5535_v15 = vld [vmem:[#allocation4 + $0x8c] sm:$0xf] }
 0x5b1   :  { %v5819_v34 = vpop.eup %5818  ;;  %v5051_v32 = vmul.f32 -1.442695, %v3135_v49  ;;  %v5087_v14 = vor.u32 %v5528_v60, %v5086_v10  ;;  %v5071_v21 = vor.u32 %v5524_v8, %v5070_v24  ;;  %v5054_v10 = vld [vmem:[#allocation4] sm:$0xf]  ;;  %v5520_v60 = vld [vmem:[#allocation4 + $0xc] sm:$0xf0] }
 0x5b2   :  { %v5821_v11 = vpop.eup %5820  ;;  %v7305_v51 = vadd.f32 1.0, %v5819_v34  ;;  %v5526_v8 = vld [vmem:[#allocation4 + $0x44] sm:$0xf] }
 0x5b3   :  { %v7307_v45 = vpop.eup %5822  ;;  %v7309_v2 = vadd.f32 1.0, %v5821_v11  ;;  %5830 = vpow2.f32 %v5051_v32  ;;  %3482 = vmatpush.bf16.msra.mxu0 %v5087_v14  ;;  %v5541_v32 = vld [vmem:[#allocation4 + $0xb4] sm:$0xf0] }
 0x5b4   :  { %v7311_v20 = vpop.eup %5824  ;;  %v3162_v54 = vmul.f32 %v7307_v45, %v7295_v5  ;;  %5832 = vrcp.f32 %v7305_v51  ;;  %vm3167_vm5 = vweird.f32 %v7307_v45  ;;  %v5143_v9 = vor.u32 %v5541_v32, %v5142_v35 }
 0x5b5   :  { %v5827_v23 = vpop.eup %5826  ;;  %v3177_v48 = vmul.f32 %v7311_v20, %v7299_v42  ;;  %5834 = vrcp.f32 %v7309_v2  ;;  %vm3182_vm7 = vweird.f32 %v7311_v20  ;;  %vm7357_vm9 = vmor %vm3166_vm3, %vm3167_vm5  ;;  %v3215_v49 = vand.u32 2147483647, %v7309_v2 }
 0x5b6   :  { %v3163_v39 = vsub.f32 1.0, %v3162_v54  ;;  %v7326_v19 = vadd.f32 1.0, %v5827_v23  ;;  %v5829_v31 = vpop.eup %5828  ;;  %vm7367_vm10 = vmor %vm3181_vm4, %vm3182_vm7  ;;  %v3217_v34 = vand.u32 2147483648, %v7309_v2  ;;  %vm3211_vm12 = vweird.f32 %v7309_v2  ;;  %3507 = vmatpush.bf16.msrb.mxu2 %v5143_v9 }
 0x5b7   :  { %v3178_v61 = vsub.f32 1.0, %v3177_v48  ;;  %vm7394_vm13 = vcmp.eq.f32.partialorder %v3215_v49, 8.507059e+37  ;;  %v5139_v48 = vor.u32 %v5538_v0, %v5136_v28  ;;  %3483 = vmatpush.bf16.msra.mxu0 %v5071_v21  ;;  %v5055_v35 = vor.u32 %v5520_v60, %v5054_v10  ;;  %v5523_v21 = vld [vmem:[#allocation4 + $0x2c] sm:$0xf]  ;;  %v5080_v10 = vld [vmem:[#allocation4 + $0x38] sm:$0xf0] }
 0x5b8   :  { %v3164_v3 = vmul.f32 %v7307_v45, %v3163_v39  ;;  %5836 = vrcp.f32 %v7326_v19  ;;  %vm3226_vm11 = vweird.f32 %v7326_v19  ;;  %v3232_v44 = vand.u32 2147483648, %v7326_v19  ;;  %v5128_v39 = vld [vmem:[#allocation4 + $0x98] sm:$0xf0]  ;;  %v5563_v60 = vld [vmem:[%s7680_s4 + $0x28] sm:$0xff] }
 0x5b9   :  { %v5831_v29 = vpop.eup %5830  ;;  %v3179_v27 = vmul.f32 %v7311_v20, %v3178_v61  ;;  %5838 = vtanh.f32 %v3136_v47  ;;  %v5147_v47 = vor.u32 %v5539_v17, %v5144_v50  ;;  %v3230_v40 = vand.u32 2147483647, %v7326_v19  ;;  %3493 = vmatpush.bf16.msra.mxu1 %v5139_v48  ;;  %v5522_v48 = vld [vmem:[#allocation4 + $0x24] sm:$0xf] }
 0x5ba   :  { %v7338_v6 = vpop.eup %5832  ;;  %v3165_v4 = vadd.f32 %v7307_v45, %v3164_v3  ;;  %v7345_v46 = vadd.f32 1.0, %v5831_v29  ;;  %v5123_v29 = vor.u32 %v5534_v52, %v5120_v25  ;;  %v3233_v49 = vor.u32 1.1754944e-38, %v3232_v44  ;;  %v5529_v44 = vld [vmem:[#allocation4 + $0x54] sm:$0xf0] }
 0x5bb   :  { %v7347_v16 = vpop.eup %5834  ;;  %v7351_v26 = vmul.f32 %v7338_v6, %v7305_v51  ;;  %v3180_v62 = vadd.f32 %v7311_v20, %v3179_v27  ;;  %v5127_v27 = vor.u32 %v5537_v59, %v5126_v36  ;;  %3521 = vmatpush.bf16.msrb.mxu3 %v5147_v47  ;;  %v5131_v28 = vor.u32 %v5535_v15, %v5128_v39  ;;  %v5525_v47 = vld [vmem:[#allocation4 + $0x34] sm:$0xf0]  ;;  %v5572_v36 = vld [vmem:[%s7682_s6 + $0x30] sm:$0xff] }
 0x5bc   :  { %v3169_v5 = vsel %vm7357_vm9, %v7307_v45, %v3165_v4  ;;  %v3207_v22 = vmul.f32 %v7347_v16, %v7309_v2  ;;  %5840 = vrcp.f32 %v7345_v46  ;;  %vm3212_vm14 = vweird.f32 %v7347_v16  ;;  %v5565_v2 = vld [vmem:[%s7680_s4 + $0x38] sm:$0xff]  ;;  %3484 = vmatpush.bf16.msra.mxu0 %v5055_v35  ;;  %v5562_v35 = vld [vmem:[%s7680_s4 + $0x20] sm:$0xff] }
 0x5bd   :  { %v3174_v42 = vsel %vm7331_vm6, %v3173_v63, %v3169_v5  ;;  %v3184_v18 = vsel %vm7367_vm10, %v7311_v20, %v3180_v62  ;;  %v3193_v20 = vsub.f32 1.0, %v7351_v26  ;;  %v5104_v63 = vld [vmem:[#allocation4 + $0x70] sm:$0xf0]  ;;  %vm7414_vm0 = vmor %vm3211_vm12, %vm3212_vm14  ;;  %v3218_v26 = vor.u32 1.1754944e-38, %v3217_v34  ;;  %v5533_v62 = vld [vmem:[#allocation4 + $0x74] sm:$0xf0]  ;;  %3494 = vmatpush.bf16.msra.mxu1 %v5123_v29  ;;  %3508 = vmatpush.bf16.msrb.mxu2 %v5127_v27 }
 0x5be   :  { %v7385_v11 = vpop.eup %5836  ;;  %v3189_v57 = vsel %vm7341_vm8, %v3188_v53, %v3184_v18  ;;  %v3255_v13 = vmul.f32 %v5829_v31, %v3174_v42  ;;  %v3208_v45 = vsub.f32 1.0, %v3207_v22  ;;  %v5530_v53 = vld [vmem:[#allocation4 + $0x64] sm:$0xf]  ;;  %v5112_v5 = vld [vmem:[#allocation4 + $0x78] sm:$0xf0]  ;;  %vm7436_vm2 = vcmp.eq.f32.partialorder %v3230_v40, 8.507059e+37 }
 0x5bf   :  { %v3253_v54 = vmul.f32 %v3189_v57, %v7215_v12  ;;  %v3222_v38 = vmul.f32 %v7385_v11, %v7326_v19  ;;  %v5839_v41 = vpop.eup %5838  ;;  %vm3227_vm15 = vweird.f32 %v7385_v11  ;;  %v3194_v22 = vmul.f32 %v7338_v6, %v3193_v20  ;;  %3522 = vmatpush.bf16.msrb.mxu3 %v5131_v28  ;;  %v5527_v20 = vld [vmem:[#allocation4 + $0x4c] sm:$0xf]  ;;  %v5064_v28 = vld [vmem:[#allocation4 + $0x18] sm:$0xf0] }
 0x5c0   :  { %v3209_v23 = vmul.f32 %v7347_v16, %v3208_v45  ;;  %vm7432_vm1 = vmor %vm3226_vm11, %vm3227_vm15  ;;  %v5107_v50 = vor.u32 %v5530_v53, %v5104_v63  ;;  %v5111_v24 = vor.u32 %v5533_v62, %v5110_v30  ;;  %vm3197_vm3 = vweird.f32 %v7338_v6  ;;  %v5094_v45 = vld [vmem:[#allocation4 + $0x48] sm:$0xf]  ;;  %3808 = vmatpush.bf16.msrb.mxu0 %v5565_v2  ;;  %v5521_v62 = vld [vmem:[#allocation4 + $0x14] sm:$0xf0] }
 0x5c1   :  { %v7400_v61 = vadd.f32 %v3255_v13, %v3253_v54  ;;  %v3223_v12 = vsub.f32 1.0, %v3222_v38  ;;  %v5115_v57 = vor.u32 %v5531_v58, %v5112_v5  ;;  %v5088_v13 = vld [vmem:[#allocation4 + $0x50] sm:$0xf0]  ;;  %v5096_v54 = vld [vmem:[#allocation4 + $0x58] sm:$0xf0]  ;;  %vm3196_vm4 = vweird.f32 %v7305_v51 }
 0x5c2   :  { %v7402_v31 = vpop.eup %5840  ;;  %v3210_v3 = vadd.f32 %v7347_v16, %v3209_v23  ;;  %v5564_v38 = vld [vmem:[%s7680_s4 + $0x30] sm:$0xff]  ;;  %vm7456_vm5 = vmor %vm3196_vm4, %vm3197_vm3  ;;  %3495 = vmatpush.bf16.msra.mxu1 %v5107_v50  ;;  %3509 = vmatpush.bf16.msrb.mxu2 %v5111_v24  ;;  %v5091_v59 = vor.u32 %v5526_v8, %v5088_v13  ;;  %v5095_v23 = vor.u32 %v5529_v44, %v5094_v45  ;;  %v3200_v15 = vand.u32 2147483647, %v7305_v51  ;;  %v5062_v30 = vld [vmem:[#allocation4 + $0x8] sm:$0xf] }
 0x5c3   :  { %v3224_v4 = vmul.f32 %v7385_v11, %v3223_v12  ;;  %v3237_v7 = vmul.f32 %v7402_v31, %v7345_v46  ;;  %5842 = vtanh.f32 %v7400_v61  ;;  %v3195_v9 = vadd.f32 %v7338_v6, %v3194_v22  ;;  %3523 = vmatpush.bf16.msrb.mxu3 %v5115_v57  ;;  %v5078_v12 = vld [vmem:[#allocation4 + $0x28] sm:$0xf]  ;;  %v5560_v57 = vld [vmem:[%s7680_s4 + $0x10] sm:$0xff]  ;;  %v5558_v45 = vld [vmem:[%s7680_s4] sm:$0xff] }
 0x5c4   :  { %v3214_v0 = vsel %vm7414_vm0, %v7347_v16, %v3210_v3  ;;  %vm3242_vm6 = vweird.f32 %v7402_v31  ;;  %3809 = vmatpush.bf16.msrb.mxu0 %v5564_v38  ;;  %vm3241_vm7 = vweird.f32 %v7345_v46  ;;  %v3247_v27 = vand.u32 2147483648, %v7345_v46  ;;  %v5559_v13 = vld [vmem:[%s7680_s4 + $0x8] sm:$0xff]  ;;  %v5550_v44 = vld [vmem:[#allocation3 + $0x30] sm:$0xff]  ;;  %v5555_v38 = vld [vmem:[#allocation3 + $0x20] sm:$0xff] }
 0x5c5   :  { %v3238_v34 = vsub.f32 1.0, %v3237_v7  ;;  %v3219_v32 = vsel %vm7394_vm13, %v3218_v26, %v3214_v0  ;;  %v3225_v17 = vadd.f32 %v7385_v11, %v3224_v4  ;;  %vm7477_vm8 = vmor %vm3241_vm7, %vm3242_vm6  ;;  %v5518_v4 = vld [vmem:[#allocation4 + $0x4] sm:$0xf]  ;;  %vm3201_vm9 = vcmp.eq.f32.partialorder %v3200_v15, 8.507059e+37  ;;  %v5056_v26 = vld [vmem:[#allocation4 + $0x10] sm:$0xf0] }
 0x5c6   :  { %v3256_v18 = vmul.f32 %v5839_v41, %v3219_v32  ;;  %v5072_v41 = vld [vmem:[#allocation4 + $0x30] sm:$0xf0]  ;;  %3496 = vmatpush.bf16.msra.mxu1 %v5091_v59  ;;  %3510 = vmatpush.bf16.msrb.mxu2 %v5095_v23  ;;  %v3245_v7 = vand.u32 2147483647, %v7345_v46  ;;  %v5083_v14 = vor.u32 %v5523_v21, %v5080_v10  ;;  %v5519_v0 = vld [vmem:[#allocation4 + $0xc] sm:$0xf]  ;;  %v5059_v46 = vor.u32 %v5518_v4, %v5056_v26 }
 0x5c7   :  { %v3229_v19 = vsel %vm7432_vm1, %v7385_v11, %v3225_v17  ;;  %v3239_v52 = vmul.f32 %v7402_v31, %v3238_v34  ;;  %v3202_v11 = vand.u32 2147483648, %v7305_v51  ;;  %v3199_v51 = vsel %vm7456_vm5, %v7338_v6, %v3195_v9  ;;  %v5571_v59 = vld [vmem:[%s7682_s6 + $0x28] sm:$0xff]  ;;  %v5570_v23 = vld [vmem:[%s7682_s6 + $0x20] sm:$0xff]  ;;  %v5569_v15 = vld [vmem:[%s7682_s6 + $0x18] sm:$0xff] }
 0x5c8   :  { %v3234_v25 = vsel %vm7436_vm2, %v3233_v49, %v3229_v19  ;;  %v5075_v63 = vor.u32 %v5522_v48, %v5072_v41  ;;  %v5079_v6 = vor.u32 %v5525_v47, %v5078_v12  ;;  %3810 = vmatpush.bf16.msrb.mxu0 %v5563_v60  ;;  %v3248_v2 = vor.u32 1.1754944e-38, %v3247_v27  ;;  %v7876_v12 = vld [vmem:[#allocation20_spill] sm:$0xff]  ;;  %v5568_v60 = vld [vmem:[%s7682_s6 + $0x10] sm:$0xff]  ;;  %v7879_v27 = vld [vmem:[#allocation22_spill] sm:$0xff] }
 0x5c9   :  { %v3254_v43 = vmul.f32 %v3234_v25, %v7267_v33  ;;  %v5099_v33 = vor.u32 %v5527_v20, %v5096_v54  ;;  %v3240_v3 = vadd.f32 %v7402_v31, %v3239_v52  ;;  %v5843_v40 = vpop.eup %5842  ;;  %v3203_v29 = vor.u32 1.1754944e-38, %v3202_v11  ;;  %v5551_v52 = vld [vmem:[#allocation3] sm:$0xff]  ;;  %v5552_v25 = vld [vmem:[#allocation3 + $0x18] sm:$0xff]  ;;  %v5553_v20 = vld [vmem:[#allocation3 + $0x10] sm:$0xff] }
 0x5ca   :  { %3497 = vmatpush.bf16.msra.mxu1 %v5075_v63  ;;  %3511 = vmatpush.bf16.msrb.mxu2 %v5079_v6  ;;  %v5063_v22 = vor.u32 %v5521_v62, %v5062_v30  ;;  %vm3246_vm10 = vcmp.eq.f32.partialorder %v3245_v7, 8.507059e+37  ;;  %v5067_v32 = vor.u32 %v5519_v0, %v5064_v28  ;;  %v5554_v54 = vld [vmem:[#allocation3 + $0x8] sm:$0xff]  ;;  %v5573_v11 = vld [vmem:[%s7682_s6 + $0x38] sm:$0xff]  ;;  %v278_v53 = vadd.f32 %v7879_v27, %v6111_v56  ;;  %v5566_v56 = vld [vmem:[%s7682_s6] sm:$0xff] }
 0x5cb   :  { %v7463_v39 = vadd.f32 %v3256_v18, %v3254_v43  ;;  %3524 = vmatpush.bf16.msrb.mxu3 %v5099_v33  ;;  %v3204_v49 = vsel %vm3201_vm9, %v3203_v29, %v3199_v51  ;;  %v3244_v58 = vsel %vm7477_vm8, %v7402_v31, %v3240_v3  ;;  %v5561_v18 = vld [vmem:[%s7680_s4 + $0x18] sm:$0xff]  ;;  %v7875_v33 = vld [vmem:[#allocation19_spill] sm:$0xff]  ;;  %v7877_v51 = vld [vmem:[#allocation41_spill] sm:$0xff] }
 0x5cc   :  { %v3261_v5 = vmul.f32 %v5843_v40, %v3204_v49  ;;  %v3249_v17 = vsel %vm3246_vm10, %v3248_v2, %v3244_v58  ;;  %3811 = vmatpush.bf16.msrb.mxu0 %v5562_v35  ;;  %v325_v3 = vadd.f32 %v7877_v51, %v6295_v37  ;;  %v7878_v40 = vld [vmem:[#allocation21_spill] sm:$0xff]  ;;  %v7880_v2 = vld [vmem:[#allocation43_spill] sm:$0xff] }
 0x5cd   :  { %5844 = vtanh.f32 %v7463_v39  ;;  %v229_v29 = vadd.f32 %v7878_v40, %v6106_v55 }
 0x5ce   :  { %v3263_v42 = vpack.c.bf16 %v3261_v5, %v3261_v5  ;;  %3498 = vmatpush.bf16.msra.mxu1 %v5059_v46  ;;  %3512 = vmatpush.bf16.msrb.mxu2 %v5063_v22  ;;  %v327_v46 = vadd.f32 %v7880_v2, %v6295_v37 }
 0x5cf   :  { %3525 = vmatpush.bf16.msrb.mxu3 %v5083_v14  ;;  %v5567_v14 = vld [vmem:[%s7682_s6 + $0x8] sm:$0xff] }
 0x5d0   :  { %v3313_v24 = vunpack.c.l.b16 %v3263_v42  ;;  %3812 = vmatpush.bf16.msrb.mxu0 %v5561_v18 }
 0x5d2   :  { %3949 = vmatpush.bf16.msrb.mxu1 %v5573_v11 }
 0x5d3   :  { %v5845_v34 = vpop.eup %5844  ;;  %3526 = vmatpush.bf16.msrb.mxu3 %v5067_v32 }
 0x5d4   :  { %v3262_v16 = vmul.f32 %v5845_v34, %v3249_v17  ;;  %3813 = vmatpush.bf16.msrb.mxu0 %v5560_v57  ;;  %v7881_v34 = vld [vmem:[#allocation42_spill] sm:$0xff] }
 0x5d5   :  { %v374_v32 = vadd.f32 %v7881_v34, %v6302_v1 }
 0x5d6   :  { %v3264_v31 = vpack.c.bf16 %v3262_v16, %v3262_v16  ;;  %v5607_v50 = vpack.c.bf16 %v3262_v16, %v3261_v5  ;;  %3950 = vmatpush.bf16.msrb.mxu1 %v5572_v36 }
 0x5d8   :  { %5608 = vst [vmem:[#allocation3 + $0x28] sm:$0xff] %v5607_v50   ;;  %v3314_v8 = vunpack.c.l.b16 %v3264_v31  ;;  %3814 = vmatpush.bf16.msrb.mxu0 %v5559_v13 }
 0x5da   :  { %v3315_v19 = vpack.c.b16 %v3314_v8, %v3313_v24  ;;  %3951 = vmatpush.bf16.msrb.mxu1 %v5571_v59 }
 0x5dc   :  { %3485 = vmatmul.bf16.vlgmr.msra.gmra.mxu0 %v3315_v19  ;;  %3499 = vmatmul.bf16.vlgmr.msra.gmra.mxu1 %v3315_v19 }
 0x5dd   :  { %3513 = vmatmul.bf16.vlgmr.msrb.gmra.mxu2 %v3315_v19  ;;  %3527 = vmatmul.bf16.vlgmr.msrb.gmra.mxu3 %v3315_v19 }
 0x5de   :  { %3815 = vmatpush.bf16.msrb.mxu0 %v5558_v45  ;;  %3952 = vmatpush.bf16.msrb.mxu1 %v5570_v23  ;;  %v7544_v45 = vld [vmem:[%s7681_s5] ss:$0 sm:$0xff] }
 0x5df   :  { %v5556_v43 = vld [vmem:[#allocation3 + $0x28] sm:$0xff] }
 0x5e2   :  { %3953 = vmatpush.bf16.msrb.mxu1 %v5569_v15 }
 0x5e6   :  { %3954 = vmatpush.bf16.msrb.mxu1 %v5568_v60 }
 0x5ea   :  { %3955 = vmatpush.bf16.msrb.mxu1 %v5567_v14 }
 0x5ec   :  { %3816 = vmatmul.bf16.vlgmr.msrb.gmra.mxu0 %v5550_v44 }
 0x5ee   :  { %3956 = vmatpush.bf16.msrb.mxu1 %v5566_v56 }
 0x5fc   :  { %3821 = vmatmul.bf16.gmra.mxu0 %v5551_v52  ;;  %v7882_v52 = vld [vmem:[#allocation44_spill] sm:$0xff] }
 0x60c   :  { %3826 = vmatmul.bf16.gmra.mxu0 %v5552_v25  ;;  %v376_v25 = vadd.f32 %v7882_v52, %v6302_v1 }
 0x61c   :  { %3831 = vmatmul.bf16.gmra.mxu0 %v5553_v20 }
 0x62c   :  { %3836 = vmatmul.bf16.gmra.mxu0 %v5554_v54 }
 0x63c   :  { %3841 = vmatmul.bf16.gmra.mxu0 %v5555_v38 }
 0x64c   :  { %3846 = vmatmul.bf16.gmra.mxu0 %v5556_v43 }
 0x659   :  { %v3486_v48 = vpop.f32.mrf.mxu0  ;;  %v3500_v9 = vpop.f32.mrf.mxu1 }
 0x65a   :  { %v3533_v41 = vadd.f32 %v3486_v48, %v7875_v33  ;;  %v3534_v47 = vadd.f32 %v3500_v9, %v7876_v12 }
 0x65c   :  { %v5180_v21 = vmul.f32 -1.442695, %v3533_v41  ;;  %v5181_v10 = vmul.f32 -1.442695, %v3534_v47 }
 0x65e   :  { %5846 = vpow2.f32 %v5180_v21 }
 0x65f   :  { %5848 = vpow2.f32 %v5181_v10 }
 0x660   :  { %v3514_v63 = vpop.f32.mrf.mxu2  ;;  %v3528_v0 = vpop.f32.mrf.mxu3 }
 0x661   :  { %v3535_v6 = vadd.f32 %v3514_v63, %v325_v3  ;;  %v3488_v4 = vpop.f32.mrf.mxu0  ;;  %v3502_v7 = vpop.f32.mrf.mxu1  ;;  %v3536_v18 = vadd.f32 %v3528_v0, %v374_v32 }
 0x662   :  { %v3537_v26 = vadd.f32 %v3488_v4, %v229_v29  ;;  %v3538_v30 = vadd.f32 %v3502_v7, %v278_v53 }
 0x663   :  { %v5182_v62 = vmul.f32 -1.442695, %v3535_v6 }
 0x664   :  { %v5847_v49 = vpop.eup %5846  ;;  %v5183_v28 = vmul.f32 -1.442695, %v3537_v26  ;;  %v5184_v58 = vmul.f32 -1.442695, %v3538_v30 }
 0x665   :  { %v5849_v35 = vpop.eup %5848  ;;  %v3559_v55 = vadd.f32 1.0, %v5847_v49  ;;  %5850 = vpow2.f32 %v5182_v62 }
 0x666   :  { %v3560_v5 = vadd.f32 1.0, %v5849_v35  ;;  %5852 = vpow2.f32 %v5183_v28 }
 0x667   :  { %5854 = vrcp.f32 %v3559_v55  ;;  %v3574_v54 = vand.u32 2147483647, %v3559_v55  ;;  %v3576_v11 = vand.u32 2147483648, %v3559_v55  ;;  %vm3570_vm14 = vweird.f32 %v3559_v55 }
 0x668   :  { %5856 = vrcp.f32 %v3560_v5  ;;  %v3516_v22 = vpop.f32.mrf.mxu2  ;;  %v3530_v13 = vpop.f32.mrf.mxu3  ;;  %v3591_v59 = vand.u32 2147483648, %v3560_v5  ;;  %v3589_v23 = vand.u32 2147483647, %v3560_v5  ;;  %vm3585_vm12 = vweird.f32 %v3560_v5 }
 0x669   :  { %5858 = vpow2.f32 %v5184_v58  ;;  %v3539_v17 = vadd.f32 %v3516_v22, %v327_v46  ;;  %v3817_v16 = vpop.f32.mrf.mxu0  ;;  %v3540_v48 = vadd.f32 %v3530_v13, %v376_v25  ;;  %vm7555_vm15 = vcmp.eq.f32.partialorder %v3574_v54, 8.507059e+37 }
 0x66a   :  { %v3818_v1 = vadd.f32 %v7544_v45, %v3817_v16  ;;  %v3577_v10 = vor.u32 1.1754944e-38, %v3576_v11  ;;  %v3592_v3 = vor.u32 1.1754944e-38, %v3591_v59  ;;  %vm3590_vm2 = vcmp.eq.f32.partialorder %v3589_v23, 8.507059e+37 }
 0x66b   :  { %v5851_v42 = vpop.eup %5850  ;;  %v5185_v31 = vmul.f32 -1.442695, %v3539_v17 }
 0x66c   :  { %v5853_v50 = vpop.eup %5852  ;;  %v7536_v24 = vadd.f32 1.0, %v5851_v42  ;;  %v3857_v63 = vmax.f32 %v3818_v1, 0.0 }
 0x66d   :  { %v5855_v8 = vpop.eup %5854  ;;  %v7538_v19 = vadd.f32 1.0, %v5853_v50  ;;  %5860 = vpow2.f32 %v5185_v31 }
 0x66e   :  { %v5857_v37 = vpop.eup %5856  ;;  %v3566_v57 = vmul.f32 %v5855_v8, %v3559_v55  ;;  %5862 = vrcp.f32 %v7536_v24  ;;  %vm3571_vm11 = vweird.f32 %v5855_v8  ;;  %vm3600_vm3 = vweird.f32 %v7536_v24 }
 0x66f   :  { %v5859_v44 = vpop.eup %5858  ;;  %v3581_v20 = vmul.f32 %v5857_v37, %v3560_v5  ;;  %5864 = vtanh.f32 %v3536_v18  ;;  %vm3586_vm13 = vweird.f32 %v5857_v37  ;;  %vm3572_vm0 = vmor %vm3570_vm14, %vm3571_vm11  ;;  %v3606_v56 = vand.u32 2147483648, %v7536_v24 }
 0x670   :  { %v3567_v38 = vsub.f32 1.0, %v3566_v57  ;;  %5866 = vrcp.f32 %v7538_v19  ;;  %v7549_v43 = vadd.f32 1.0, %v5859_v44  ;;  %vm3587_vm1 = vmor %vm3585_vm12, %vm3586_vm13  ;;  %v3619_v2 = vand.u32 2147483647, %v7538_v19 }
 0x671   :  { %v3582_v36 = vsub.f32 1.0, %v3581_v20  ;;  %v3819_v9 = vpop.f32.mrf.mxu0  ;;  %v3621_v46 = vand.u32 2147483648, %v7538_v19  ;;  %vm3615_vm8 = vweird.f32 %v7538_v19 }
 0x672   :  { %v3568_v15 = vmul.f32 %v5855_v8, %v3567_v38  ;;  %5868 = vrcp.f32 %v7549_v43  ;;  %v3820_v49 = vadd.f32 %v7544_v45, %v3819_v9  ;;  %v3636_v5 = vand.u32 2147483648, %v7549_v43 }
 0x673   :  { %v5861_v33 = vpop.eup %5860  ;;  %v3583_v41 = vmul.f32 %v5857_v37, %v3582_v36  ;;  %5870 = vtanh.f32 %v3540_v48  ;;  %v3634_v42 = vand.u32 2147483647, %v7549_v43  ;;  %vm3630_vm9 = vweird.f32 %v7549_v43 }
 0x674   :  { %v7553_v12 = vpop.eup %5862  ;;  %v3569_v47 = vadd.f32 %v5855_v8, %v3568_v15  ;;  %v7559_v60 = vadd.f32 1.0, %v5861_v33  ;;  %v3858_v18 = vmax.f32 %v3820_v49, 0.0  ;;  %v3622_v52 = vor.u32 1.1754944e-38, %v3621_v46 }
 0x675   :  { %v5865_v51 = vpop.eup %5864  ;;  %v3596_v40 = vmul.f32 %v7553_v12, %v7536_v24  ;;  %v3584_v29 = vadd.f32 %v5857_v37, %v3583_v41  ;;  %vm3601_vm4 = vweird.f32 %v7553_v12  ;;  %v3637_v54 = vor.u32 1.1754944e-38, %v3636_v5 }
 0x676   :  { %v5867_v27 = vpop.eup %5866  ;;  %v3573_v53 = vsel %vm3572_vm0, %v5855_v8, %v3569_v47  ;;  %5872 = vrcp.f32 %v7559_v60  ;;  %vm7587_vm7 = vmor %vm3600_vm3, %vm3601_vm4  ;;  %v3873_v13 = vpack.c.bf16 %v3858_v18, %v3857_v63  ;;  %vm3620_vm12 = vcmp.eq.f32.partialorder %v3619_v2, 8.507059e+37 }
 0x677   :  { %v3597_v6 = vsub.f32 1.0, %v3596_v40  ;;  %v3578_v4 = vsel %vm7555_vm15, %v3577_v10, %v3573_v53  ;;  %v3588_v7 = vsel %vm3587_vm1, %v5857_v37, %v3584_v29  ;;  %v3611_v14 = vmul.f32 %v5867_v27, %v7538_v19 }
 0x678   :  { %v5869_v26 = vpop.eup %5868  ;;  %v3593_v30 = vsel %vm3590_vm2, %v3592_v3, %v3588_v7  ;;  %v3659_v62 = vmul.f32 %v5865_v51, %v3578_v4  ;;  %vm3616_vm5 = vweird.f32 %v5867_v27  ;;  %v3604_v37 = vand.u32 2147483647, %v7536_v24  ;;  %3957 = vmatmul.bf16.vlgmr.msrb.gmra.mxu1 %v3873_v13 }
 0x679   :  { %v3598_v0 = vmul.f32 %v7553_v12, %v3597_v6  ;;  %v3657_v28 = vmul.f32 %v3593_v30, %v7400_v61  ;;  %v3612_v35 = vsub.f32 1.0, %v3611_v14  ;;  %v3626_v55 = vmul.f32 %v5869_v26, %v7549_v43  ;;  %v3822_v58 = vpop.f32.mrf.mxu0  ;;  %v5871_v22 = vpop.eup %5870  ;;  %vm3617_vm10 = vmor %vm3615_vm8, %vm3616_vm5 }
 0x67a   :  { %vm3631_vm6 = vweird.f32 %v5869_v26  ;;  %v3607_v24 = vor.u32 1.1754944e-38, %v3606_v56  ;;  %vm3635_vm13 = vcmp.eq.f32.partialorder %v3634_v42, 8.507059e+37  ;;  %vm3605_vm14 = vcmp.eq.f32.partialorder %v3604_v37, 8.507059e+37 }
 0x67b   :  { %v3661_v34 = vadd.f32 %v3659_v62, %v3657_v28  ;;  %v3627_v32 = vsub.f32 1.0, %v3626_v55  ;;  %v3613_v17 = vmul.f32 %v5867_v27, %v3612_v35  ;;  %v3599_v61 = vadd.f32 %v7553_v12, %v3598_v0  ;;  %vm3632_vm11 = vmor %vm3630_vm9, %vm3631_vm6 }
 0x67c   :  { %v5873_v16 = vpop.eup %5872  ;;  %v3823_v47 = vadd.f32 %v7544_v45, %v3822_v58  ;;  %v3651_v21 = vand.u32 2147483648, %v7559_v60  ;;  %vm3645_vm0 = vweird.f32 %v7559_v60 }
 0x67d   :  { %5874 = vtanh.f32 %v3661_v34  ;;  %3674 = vst [vmem:[%s7688_s12] sm:$0xff] %v3661_v34  ;;  %v3628_v31 = vmul.f32 %v5869_v26, %v3627_v32  ;;  %v3641_v50 = vmul.f32 %v5873_v16, %v7559_v60  ;;  %v3614_v57 = vadd.f32 %v5867_v27, %v3613_v17 }
 0x67e   :  { %v3603_v20 = vsel %vm7587_vm7, %v7553_v12, %v3599_v61  ;;  %vm3646_vm15 = vweird.f32 %v5873_v16  ;;  %v3859_v40 = vmax.f32 %v3823_v47, 0.0  ;;  %v3652_v29 = vor.u32 1.1754944e-38, %v3651_v21 }
 0x67f   :  { %v3642_v44 = vsub.f32 1.0, %v3641_v50  ;;  %v3629_v25 = vadd.f32 %v5869_v26, %v3628_v31  ;;  %v3618_v38 = vsel %vm3617_vm10, %v5867_v27, %v3614_v57  ;;  %v3608_v9 = vsel %vm3605_vm14, %v3607_v24, %v3603_v20  ;;  %vm3647_vm1 = vmor %vm3645_vm0, %vm3646_vm15 }
 0x680   :  { %v3623_v11 = vsel %vm3620_vm12, %v3622_v52, %v3618_v38  ;;  %v5621_v38 = vld [vmem:[%s7683_s7] ss:$0 sm:$0xff] }
 0x681   :  { %v3633_v19 = vsel %vm3632_vm11, %v5869_v26, %v3629_v25  ;;  %v3824_v36 = vpop.f32.mrf.mxu0  ;;  %v3643_v43 = vmul.f32 %v5873_v16, %v3642_v44  ;;  %v3660_v23 = vmul.f32 %v5871_v22, %v3623_v11 }
 0x682   :  { %v3638_v59 = vsel %vm3635_vm13, %v3637_v54, %v3633_v19  ;;  %v3825_v33 = vadd.f32 %v7544_v45, %v3824_v36 }
 0x683   :  { %v5875_v48 = vpop.eup %5874  ;;  %v3658_v15 = vmul.f32 %v3638_v59, %v7463_v39  ;;  %v3644_v12 = vadd.f32 %v5873_v16, %v3643_v43  ;;  %v3649_v39 = vand.u32 2147483647, %v7559_v60 }
 0x684   :  { %v3665_v1 = vmul.f32 %v5875_v48, %v3608_v9  ;;  %v3860_v10 = vmax.f32 %v3825_v33, 0.0 }
 0x685   :  { %v3662_v41 = vadd.f32 %v3660_v23, %v3658_v15  ;;  %v3648_v3 = vsel %vm3647_vm1, %v5873_v16, %v3644_v12  ;;  %vm3650_vm2 = vcmp.eq.f32.partialorder %v3649_v39, 8.507059e+37 }
 0x686   :  { %3672 = vst [vmem:[%s7687_s11] sm:$0xff] %v3665_v1  ;;  %v3874_v27 = vpack.c.bf16 %v3860_v10, %v3859_v40  ;;  %v3653_v63 = vsel %vm3650_vm2, %v3652_v29, %v3648_v3 }
 0x687   :  { %5876 = vtanh.f32 %v3662_v41  ;;  %3675 = vst [vmem:[%s7688_s12 + $0x8] sm:$0xff] %v3662_v41 }
 0x688   :  { %3962 = vmatmul.bf16.gmra.mxu1 %v3874_v27 }
 0x689   :  { %v3827_v51 = vpop.f32.mrf.mxu0 }
 0x68a   :  { %v3828_v14 = vadd.f32 %v7544_v45, %v3827_v51 }
 0x68c   :  { %v3861_v49 = vmax.f32 %v3828_v14, 0.0 }
 0x68d   :  { %v5877_v53 = vpop.eup %5876 }
 0x68e   :  { %v3666_v6 = vmul.f32 %v5877_v53, %v3653_v63 }
 0x690   :  { %v5612_v4 = vpack.c.bf16 %v3666_v6, %v3665_v1  ;;  %3673 = vst [vmem:[%s7687_s11 + $0x8] sm:$0xff] %v3666_v6 }
 0x691   :  { %v3829_v7 = vpop.f32.mrf.mxu0 }
 0x692   :  { %5613 = vst [vmem:[#allocation3 + $0x38] sm:$0xff] %v5612_v4   ;;  %v3830_v60 = vadd.f32 %v7544_v45, %v3829_v7 }
 0x694   :  { %v3862_v26 = vmax.f32 %v3830_v60, 0.0 }
 0x696   :  { %v3875_v0 = vpack.c.bf16 %v3862_v26, %v3861_v49 }
 0x698   :  { %3967 = vmatmul.bf16.gmra.mxu1 %v3875_v0 }
 0x699   :  { %v3832_v30 = vpop.f32.mrf.mxu0  ;;  %v5557_v62 = vld [vmem:[#allocation3 + $0x38] sm:$0xff] }
 0x69a   :  { %3851 = vmatmul.bf16.gmra.mxu0 %v5557_v62  ;;  %v3833_v55 = vadd.f32 %v7544_v45, %v3832_v30 }
 0x69c   :  { %v3863_v5 = vmax.f32 %v3833_v55, 0.0 }
 0x6a1   :  { %v3834_v28 = vpop.f32.mrf.mxu0 }
 0x6a2   :  { %v3835_v35 = vadd.f32 %v7544_v45, %v3834_v28 }
 0x6a4   :  { %v3864_v58 = vmax.f32 %v3835_v35, 0.0 }
 0x6a6   :  { %v3876_v2 = vpack.c.bf16 %v3864_v58, %v3863_v5 }
 0x6a8   :  { %3972 = vmatmul.bf16.gmra.mxu1 %v3876_v2 }
 0x6a9   :  { %v3837_v56 = vpop.f32.mrf.mxu0 }
 0x6aa   :  { %v3838_v34 = vadd.f32 %v7544_v45, %v3837_v56 }
 0x6ac   :  { %v3865_v16 = vmax.f32 %v3838_v34, 0.0 }
 0x6b1   :  { %v3839_v46 = vpop.f32.mrf.mxu0 }
 0x6b2   :  { %v3840_v22 = vadd.f32 %v7544_v45, %v3839_v46 }
 0x6b4   :  { %v3866_v32 = vmax.f32 %v3840_v22, 0.0 }
 0x6b6   :  { %v3877_v61 = vpack.c.bf16 %v3866_v32, %v3865_v16 }
 0x6b8   :  { %3977 = vmatmul.bf16.gmra.mxu1 %v3877_v61 }
 0x6b9   :  { %v3842_v17 = vpop.f32.mrf.mxu0 }
 0x6ba   :  { %v3843_v31 = vadd.f32 %v7544_v45, %v3842_v17 }
 0x6bc   :  { %v3867_v37 = vmax.f32 %v3843_v31, 0.0 }
 0x6c1   :  { %v3844_v42 = vpop.f32.mrf.mxu0 }
 0x6c2   :  { %v3845_v18 = vadd.f32 %v7544_v45, %v3844_v42 }
 0x6c4   :  { %v3868_v50 = vmax.f32 %v3845_v18, 0.0 }
 0x6c6   :  { %v3878_v57 = vpack.c.bf16 %v3868_v50, %v3867_v37 }
 0x6c8   :  { %3982 = vmatmul.bf16.gmra.mxu1 %v3878_v57 }
 0x6c9   :  { %v3847_v8 = vpop.f32.mrf.mxu0 }
 0x6ca   :  { %v3848_v52 = vadd.f32 %v7544_v45, %v3847_v8 }
 0x6cc   :  { %v3869_v20 = vmax.f32 %v3848_v52, 0.0 }
 0x6d1   :  { %v3849_v13 = vpop.f32.mrf.mxu0 }
 0x6d2   :  { %v3850_v44 = vadd.f32 %v7544_v45, %v3849_v13 }
 0x6d4   :  { %v3870_v25 = vmax.f32 %v3850_v44, 0.0 }
 0x6d6   :  { %v3879_v54 = vpack.c.bf16 %v3870_v25, %v3869_v20 }
 0x6d8   :  { %3987 = vmatmul.bf16.gmra.mxu1 %v3879_v54 }
 0x6f5   :  { %v3958_v24 = vpop.f32.mrf.mxu1 }
 0x6f6   :  { %v3959_v11 = vadd.f32 %v5621_v38, %v3958_v24 }
 0x6f8   :  { %3998 = vst [vmem:[%s7686_s10] sm:$0xff] %v3959_v11 }
 0x6fd   :  { %v3960_v19 = vpop.f32.mrf.mxu1 }
 0x6fe   :  { %v3961_v36 = vadd.f32 %v5621_v38, %v3960_v19 }
 0x700   :  { %3999 = vst [vmem:[%s7686_s10 + $0x8] sm:$0xff] %v3961_v36 }
 0x705   :  { %v3963_v43 = vpop.f32.mrf.mxu1 }
 0x706   :  { %v3964_v59 = vadd.f32 %v5621_v38, %v3963_v43 }
 0x708   :  { %4000 = vst [vmem:[%s7686_s10 + $0x10] sm:$0xff] %v3964_v59 }
 0x70d   :  { %v3965_v23 = vpop.f32.mrf.mxu1 }
 0x70e   :  { %v3966_v48 = vadd.f32 %v5621_v38, %v3965_v23 }
 0x710   :  { %4001 = vst [vmem:[%s7686_s10 + $0x18] sm:$0xff] %v3966_v48 }
 0x715   :  { %v3968_v15 = vpop.f32.mrf.mxu1 }
 0x716   :  { %v3969_v1 = vadd.f32 %v5621_v38, %v3968_v15 }
 0x717   :  { %v3852_v9 = vpop.f32.mrf.mxu0 }
 0x718   :  { %v3853_v33 = vadd.f32 %v7544_v45, %v3852_v9  ;;  %4002 = vst [vmem:[%s7686_s10 + $0x20] sm:$0xff] %v3969_v1 }
 0x71a   :  { %v3871_v47 = vmax.f32 %v3853_v33, 0.0 }
 0x71d   :  { %v3970_v39 = vpop.f32.mrf.mxu1 }
 0x71e   :  { %v3971_v51 = vadd.f32 %v5621_v38, %v3970_v39 }
 0x71f   :  { %v3854_v41 = vpop.f32.mrf.mxu0 }
 0x720   :  { %v3855_v12 = vadd.f32 %v7544_v45, %v3854_v41  ;;  %4003 = vst [vmem:[%s7686_s10 + $0x28] sm:$0xff] %v3971_v51 }
 0x722   :  { %v3872_v21 = vmax.f32 %v3855_v12, 0.0 }
 0x724   :  { %v3880_v10 = vpack.c.bf16 %v3872_v21, %v3871_v47 }
 0x725   :  { %v3973_v3 = vpop.f32.mrf.mxu1 }
 0x726   :  { %3992 = vmatmul.bf16.gmra.mxu1 %v3880_v10  ;;  %v3974_v40 = vadd.f32 %v5621_v38, %v3973_v3 }
 0x728   :  { %4004 = vst [vmem:[%s7686_s10 + $0x30] sm:$0xff] %v3974_v40 }
 0x72d   :  { %v3975_v29 = vpop.f32.mrf.mxu1 }
 0x72e   :  { %v3976_v27 = vadd.f32 %v5621_v38, %v3975_v29 }
 0x730   :  { %4005 = vst [vmem:[%s7686_s10 + $0x38] sm:$0xff] %v3976_v27 }
 0x735   :  { %v3978_v45 = vpop.f32.mrf.mxu1 }
 0x736   :  { %v3979_v53 = vadd.f32 %v5621_v38, %v3978_v45 }
 0x738   :  { %4006 = vst [vmem:[%s7686_s10 + $0x40] sm:$0xff] %v3979_v53 }
 0x73d   :  { %v3980_v63 = vpop.f32.mrf.mxu1 }
 0x73e   :  { %v3981_v6 = vadd.f32 %v5621_v38, %v3980_v63 }
 0x740   :  { %4007 = vst [vmem:[%s7686_s10 + $0x48] sm:$0xff] %v3981_v6 }
 0x745   :  { %v3983_v4 = vpop.f32.mrf.mxu1 }
 0x746   :  { %v3984_v7 = vadd.f32 %v5621_v38, %v3983_v4 }
 0x748   :  { %4008 = vst [vmem:[%s7686_s10 + $0x50] sm:$0xff] %v3984_v7 }
 0x74d   :  { %v3985_v60 = vpop.f32.mrf.mxu1 }
 0x74e   :  { %v3986_v14 = vadd.f32 %v5621_v38, %v3985_v60 }
 0x750   :  { %4009 = vst [vmem:[%s7686_s10 + $0x58] sm:$0xff] %v3986_v14 }
 0x755   :  { %v3988_v26 = vpop.f32.mrf.mxu1 }
 0x756   :  { %v3989_v30 = vadd.f32 %v5621_v38, %v3988_v26 }
 0x758   :  { %4010 = vst [vmem:[%s7686_s10 + $0x60] sm:$0xff] %v3989_v30 }
 0x75d   :  { %v3990_v62 = vpop.f32.mrf.mxu1 }
 0x75e   :  { %v3991_v49 = vadd.f32 %v5621_v38, %v3990_v62 }
 0x760   :  { %4011 = vst [vmem:[%s7686_s10 + $0x68] sm:$0xff] %v3991_v49 }
 0x7a3   :  { %v3993_v0 = vpop.f32.mrf.mxu1 }
 0x7a4   :  { %v3994_v28 = vadd.f32 %v5621_v38, %v3993_v0 }
 0x7a6   :  { %4012 = vst [vmem:[%s7686_s10 + $0x70] sm:$0xff] %v3994_v28 }
 0x7ab   :  { %v3995_v35 = vpop.f32.mrf.mxu1 }
 0x7ac   :  { %v3996_v55 = vadd.f32 %v5621_v38, %v3995_v35 }
 0x7ae   :  { %4013 = vst [vmem:[%s7686_s10 + $0x78] sm:$0xff] %v3996_v55 }
 0x7af   :  { %4026 = vsyncpa [#allocation5], 1 }

</bundles_post_ra>
